<compile_context>
chip_gen: v7x
topology: tpu7x:2x2x1
jax: 0.10.0
libtpu: 0.0.40
codegen_flags: <defaults>
</compile_context>

<pallas_src>
import functools

import jax
import jax.numpy as jnp
import numpy as np
from jax.experimental import pallas as pl
from jax.experimental.pallas import tpu as pltpu

EPS = 1e-5


# ----------------------------- Pallas kernel --------------------------------
def _tcn_stack_kernel(dilations,
                      x_ref, seb_ref,
                      w1_ref, b1_ref, alpha_ref,
                      g1w_ref, g1b_ref,
                      wd_ref, bd_ref,
                      g2w_ref, g2b_ref,
                      w2_ref, b2_ref,
                      o_ref):
    """Fused TCNStack forward for one batch element.

    x_ref:   (1, O, T)  input / residual
    seb_ref: (1, P, 1)  speaker-embed rank-1 bias (used by block 0 only)
    stacked per-block weights (leading dim = num_blocks):
      w1 (NB,P,O)  b1/g1w/g1b/bd/g2w/g2b (NB,P,1)  wd (NB,P,3P)
      w2 (NB,O,P)  b2 (NB,O,1)  alphas (NB,2) in SMEM
    """
    x = x_ref[0]                                   # (O, T), stays resident
    T = x.shape[-1]
    P = w1_ref.shape[1]
    inv_n = 1.0 / float(P * T)

    # Hoisted out of the per-block loop (JAX does not CSE broadcasts).
    col = jax.lax.broadcasted_iota(jnp.int32, (P, T), 1)

    for blk, d in enumerate(dilations):
        # ---- conv1 (1x1): (P,O)@(O,T); speaker embed folded in as rank-1 bias ----
        bias1 = b1_ref[blk]
        if blk == 0:
            bias1 = bias1 + seb_ref[0]
        y = jnp.dot(w1_ref[blk], x, preferred_element_type=jnp.float32) + bias1

        # ---- PReLU + GlobalLayerNorm (one-pass stats + fused scale/shift) ----
        y = jnp.where(y >= 0.0, y, alpha_ref[blk, 0] * y)
        mean = jnp.sum(y, keepdims=True) * inv_n                    # (1,1)
        var = jnp.sum(y * y, keepdims=True) * inv_n - mean * mean   # (1,1)
        inv_std = jax.lax.rsqrt(var + EPS)
        scale = g1w_ref[blk] * inv_std                              # (P,1)
        shift = g1b_ref[blk] - mean * scale                         # (P,1)
        y = y * scale + shift

        # ---- dilated conv (k=3, "same" zero padding) as ONE merged matmul ----
        # y_m[t] = y[t-d], y_p[t] = y[t+d]  (zero outside [0, T))
        y_m = jnp.where(col >= d, pltpu.roll(y, shift=d, axis=1), 0.0)
        y_p = jnp.where(col < T - d, pltpu.roll(y, shift=T - d, axis=1), 0.0)
        y3 = jnp.concatenate([y_m, y, y_p], axis=0)                 # (3P, T)
        z = jnp.dot(wd_ref[blk], y3, preferred_element_type=jnp.float32) + bd_ref[blk]

        # ---- PReLU + GlobalLayerNorm ----
        z = jnp.where(z >= 0.0, z, alpha_ref[blk, 1] * z)
        mean2 = jnp.sum(z, keepdims=True) * inv_n
        var2 = jnp.sum(z * z, keepdims=True) * inv_n - mean2 * mean2
        inv_std2 = jax.lax.rsqrt(var2 + EPS)
        scale2 = g2w_ref[blk] * inv_std2
        shift2 = g2b_ref[blk] - mean2 * scale2
        z = z * scale2 + shift2

        # ---- conv2 (1x1) back to O channels + residual ----
        x = x + jnp.dot(w2_ref[blk], z, preferred_element_type=jnp.float32) + b2_ref[blk]

    o_ref[0] = x


# --------------------------------- wrapper -----------------------------------
@functools.partial(jax.jit, static_argnums=3)
def tcn_stack_forward(x, speaker_embed, blocks_params, dilations):
    """TCNStack.forward. `dilations` must be a tuple of Python ints (static)."""
    B, O, T = x.shape
    NB = len(blocks_params)
    P = blocks_params[0]["w1"].shape[0]

    # Block 0's 1x1 conv acts on concat(x, tiled speaker_embed); since the
    # speaker embed is constant over time, split the weight and turn the
    # embed part into a rank-1, time-constant bias (no broadcast/concat).
    w1_first = blocks_params[0]["w1"]                          # (P, O + D)
    w1_x0, w1_se = w1_first[:, :O], w1_first[:, O:]
    se_bias = jnp.einsum("bd,pd->bp", speaker_embed, w1_se)[:, :, None]   # (B,P,1)

    def stack(key):
        return jnp.stack([p[key] for p in blocks_params], axis=0)

    w1 = jnp.stack([w1_x0] + [p["w1"] for p in blocks_params[1:]], axis=0)  # (NB,P,O)
    b1 = stack("b1")
    g1w, g1b = stack("g1w"), stack("g1b")
    # Merge the 3 dilated-conv taps along the contraction axis -> (NB, P, 3P),
    # tap order matches [y[t-d]; y[t]; y[t+d]] stacking inside the kernel.
    wd = jnp.stack(
        [jnp.transpose(p["wd"], (1, 0, 2)).reshape(P, 3 * P) for p in blocks_params],
        axis=0)
    bd = stack("bd")
    g2w, g2b = stack("g2w"), stack("g2b")
    w2, b2 = stack("w2"), stack("b2")
    alphas = jnp.stack(
        [jnp.stack([p["a1"][0], p["a2"][0]]) for p in blocks_params], axis=0)  # (NB,2)

    kernel = functools.partial(_tcn_stack_kernel, tuple(int(d) for d in dilations))

    def full(a):
        zeros = (0,) * a.ndim
        return pl.BlockSpec(a.shape, lambda b: zeros)

    smem = pl.BlockSpec(memory_space=pltpu.MemorySpace.SMEM)

    in_specs = [
        pl.BlockSpec((1, O, T), lambda b: (b, 0, 0)),   # x (residual)
        pl.BlockSpec((1, P, 1), lambda b: (b, 0, 0)),   # speaker rank-1 bias
        full(w1), full(b1), smem,
        full(g1w), full(g1b),
        full(wd), full(bd),
        full(g2w), full(g2b),
        full(w2), full(b2),
    ]

    weight_bytes = sum(int(np.prod(a.shape)) * a.dtype.itemsize
                       for a in (w1, b1, alphas, g1w, g1b, wd, bd, g2w, g2b, w2, b2))
    cost = pl.CostEstimate(
        flops=2 * B * NB * T * (P * O + 3 * P * P + O * P),
        transcendentals=2 * B * NB,
        bytes_accessed=2 * B * O * T * 4 + B * P * 4 + weight_bytes,
    )

    return pl.pallas_call(
        kernel,
        grid=(B,),
        in_specs=in_specs,
        out_specs=pl.BlockSpec((1, O, T), lambda b: (b, 0, 0)),
        out_shape=jax.ShapeDtypeStruct((B, O, T), jnp.float32),
        compiler_params=pltpu.CompilerParams(dimension_semantics=("parallel",)),
        cost_estimate=cost,
    )(x, se_bias, w1, b1, alphas, g1w, g1b, wd, bd, g2w, g2b, w2, b2)


# ------------------------- pure-JAX reference (check) ------------------------
def _block_ref(x, conv_in, p, d):
    y = jnp.einsum('pc,bct->bpt', p["w1"], conv_in) + p["b1"][None]
    y = jnp.where(y >= 0, y, p["a1"][0] * y)
    mean = jnp.mean(y, axis=(1, 2), keepdims=True)
    var = jnp.mean((y - mean) ** 2, axis=(1, 2), keepdims=True)
    y = (y - mean) / jnp.sqrt(var + EPS) * p["g1w"][None] + p["g1b"][None]
    T = y.shape[-1]
    ypad = jnp.pad(y, ((0, 0), (0, 0), (d, d)))
    z = sum(jnp.einsum('pq,bqt->bpt', p["wd"][k], ypad[:, :, k * d:k * d + T])
            for k in range(3)) + p["bd"][None]
    z = jnp.where(z >= 0, z, p["a2"][0] * z)
    mean2 = jnp.mean(z, axis=(1, 2), keepdims=True)
    var2 = jnp.mean((z - mean2) ** 2, axis=(1, 2), keepdims=True)
    z = (z - mean2) / jnp.sqrt(var2 + EPS) * p["g2w"][None] + p["g2b"][None]
    return x + jnp.einsum('op,bpt->bot', p["w2"], z) + p["b2"][None]


def tcn_stack_ref(x, speaker_embed, blocks_params, dilations):
    B, O, T = x.shape
    se_tiled = jnp.broadcast_to(speaker_embed[:, :, None],
                                (B, speaker_embed.shape[1], T))
    conv_in = jnp.concatenate([x, se_tiled], axis=1)
    x = _block_ref(x, conv_in, blocks_params[0], dilations[0])
    for p, d in zip(blocks_params[1:], dilations[1:]):
        x = _block_ref(x, x, p, d)
    return x


# ------------------------------ parameter init -------------------------------
def init_block_params(key, in_ch, hidden, ref_dim):
    cin = in_ch + ref_dim
    ks = jax.random.split(key, 6)

    def u(k, shape, fan_in):
        s = 1.0 / np.sqrt(fan_in)
        return jax.random.uniform(k, shape, jnp.float32, -s, s)

    return dict(
        w1=u(ks[0], (hidden, cin), cin),               # Conv1d(cin->P, k=1)
        b1=u(ks[1], (hidden, 1), cin),
        a1=jnp.full((1,), 0.25, jnp.float32),          # PReLU (num_parameters=1)
        g1w=jnp.ones((hidden, 1), jnp.float32),        # GlobalLayerNorm weight
        g1b=jnp.zeros((hidden, 1), jnp.float32),       # GlobalLayerNorm beta
        wd=u(ks[2], (3, hidden, hidden), 3 * hidden),  # Conv1d(P->P, k=3) as (k,out,in)
        bd=u(ks[3], (hidden, 1), 3 * hidden),
        a2=jnp.full((1,), 0.25, jnp.float32),
        g2w=jnp.ones((hidden, 1), jnp.float32),
        g2b=jnp.zeros((hidden, 1), jnp.float32),
        w2=u(ks[4], (in_ch, hidden), hidden),          # Conv1d(P->O, k=1)
        b2=u(ks[5], (in_ch, 1), hidden),
    )


# ----------------------------------- main ------------------------------------
if __name__ == "__main__":
    B, O, D, P, T = 2, 16, 8, 32, 128
    NUM_BLOCKS = 4
    dilations = tuple(2 ** i for i in range(NUM_BLOCKS))   # block 0 has dilation 1

    key = jax.random.PRNGKey(0)
    key, kx, ke = jax.random.split(key, 3)
    x = jax.random.normal(kx, (B, O, T), jnp.float32)
    speaker_embed = jax.random.normal(ke, (B, D), jnp.float32)

    blocks_params = []
    for idx in range(NUM_BLOCKS):
        key, kb = jax.random.split(key)
        ref_dim = D if idx == 0 else 0
        blocks_params.append(init_block_params(kb, O, P, ref_dim))

    out = tcn_stack_forward(x, speaker_embed, blocks_params, dilations)
    out = jax.block_until_ready(out)

    ref = jax.block_until_ready(
        tcn_stack_ref(x, speaker_embed, blocks_params, dilations))
    np.testing.assert_allclose(np.asarray(out), np.asarray(ref),
                               rtol=5e-3, atol=5e-3)

    print("KERNEL_OK")
</pallas_src>

<mosaic_0001>
module attributes {stable_mosaic.version = 11 : i64} {
  func.func @_tcn_stack_kernel(%arg0: i32, %arg1: memref<1x16x128xf32, #tpu.memory_space<vmem>>, %arg2: memref<1x32x1xf32, #tpu.memory_space<vmem>>, %arg3: memref<4x32x16xf32, #tpu.memory_space<vmem>>, %arg4: memref<4x32x1xf32, #tpu.memory_space<vmem>>, %arg5: memref<4x2xf32, #tpu.memory_space<smem>>, %arg6: memref<4x32x1xf32, #tpu.memory_space<vmem>>, %arg7: memref<4x32x1xf32, #tpu.memory_space<vmem>>, %arg8: memref<4x32x96xf32, #tpu.memory_space<vmem>>, %arg9: memref<4x32x1xf32, #tpu.memory_space<vmem>>, %arg10: memref<4x32x1xf32, #tpu.memory_space<vmem>>, %arg11: memref<4x32x1xf32, #tpu.memory_space<vmem>>, %arg12: memref<4x16x32xf32, #tpu.memory_space<vmem>>, %arg13: memref<4x16x1xf32, #tpu.memory_space<vmem>>, %arg14: memref<1x16x128xf32, #tpu.memory_space<vmem>>) attributes {dimension_semantics = [#tpu.dimension_semantics<parallel>], iteration_bounds = array<i64: 2>, scalar_prefetch = 0 : i64, scratch_operands = 0 : i64, tpu.core_type = #tpu.core_type<tc>, window_params = [{transform_indices = @transform_0, window_bounds = array<i64: 1, 16, 128>}, {transform_indices = @transform_1, window_bounds = array<i64: 1, 32, 1>}, {pipeline_mode = #tpu.pipeline_mode<synchronous>, transform_indices = @transform_2, window_bounds = array<i64: 4, 32, 16>}, {pipeline_mode = #tpu.pipeline_mode<synchronous>, transform_indices = @transform_3, window_bounds = array<i64: 4, 32, 1>}, {transform_indices = @transform_4, window_bounds = array<i64: 4, 2>}, {pipeline_mode = #tpu.pipeline_mode<synchronous>, transform_indices = @transform_5, window_bounds = array<i64: 4, 32, 1>}, {pipeline_mode = #tpu.pipeline_mode<synchronous>, transform_indices = @transform_6, window_bounds = array<i64: 4, 32, 1>}, {pipeline_mode = #tpu.pipeline_mode<synchronous>, transform_indices = @transform_7, window_bounds = array<i64: 4, 32, 96>}, {pipeline_mode = #tpu.pipeline_mode<synchronous>, transform_indices = @transform_8, window_bounds = array<i64: 4, 32, 1>}, {pipeline_mode = #tpu.pipeline_mode<synchronous>, transform_indices = @transform_9, window_bounds = array<i64: 4, 32, 1>}, {pipeline_mode = #tpu.pipeline_mode<synchronous>, transform_indices = @transform_10, window_bounds = array<i64: 4, 32, 1>}, {pipeline_mode = #tpu.pipeline_mode<synchronous>, transform_indices = @transform_11, window_bounds = array<i64: 4, 16, 32>}, {pipeline_mode = #tpu.pipeline_mode<synchronous>, transform_indices = @transform_12, window_bounds = array<i64: 4, 16, 1>}, {transform_indices = @transform_13, window_bounds = array<i64: 1, 16, 128>}]} {
    %c0 = arith.constant 0 : index
    %c0_0 = arith.constant 0 : index
    %c0_1 = arith.constant 0 : index
    %0 = vector.load %arg1[%c0, %c0_0, %c0_1] : memref<1x16x128xf32, #tpu.memory_space<vmem>>, vector<1x16x128xf32>
    %1 = vector.shape_cast %0 : vector<1x16x128xf32> to vector<16x128xf32>
    %2 = tpu.iota {dimensions = array<i32: 1>} : vector<32x128xi32>
    %c0_2 = arith.constant 0 : index
    %c0_3 = arith.constant 0 : index
    %c0_4 = arith.constant 0 : index
    %3 = vector.load %arg4[%c0_2, %c0_3, %c0_4] : memref<4x32x1xf32, #tpu.memory_space<vmem>>, vector<1x32x1xf32>
    %4 = vector.shape_cast %3 : vector<1x32x1xf32> to vector<32x1xf32>
    %c0_5 = arith.constant 0 : index
    %c0_6 = arith.constant 0 : index
    %c0_7 = arith.constant 0 : index
    %5 = vector.load %arg2[%c0_5, %c0_6, %c0_7] : memref<1x32x1xf32, #tpu.memory_space<vmem>>, vector<1x32x1xf32>
    %6 = vector.shape_cast %5 : vector<1x32x1xf32> to vector<32x1xf32>
    %7 = arith.addf %4, %6 : vector<32x1xf32>
    %c0_8 = arith.constant 0 : index
    %c0_9 = arith.constant 0 : index
    %c0_10 = arith.constant 0 : index
    %8 = vector.load %arg3[%c0_8, %c0_9, %c0_10] : memref<4x32x16xf32, #tpu.memory_space<vmem>>, vector<1x32x16xf32>
    %9 = vector.shape_cast %8 : vector<1x32x16xf32> to vector<32x16xf32>
    %cst = arith.constant dense<0.000000e+00> : vector<32x128xf32>
    %10 = tpu.matmul %9, %1, %cst {dimension_numbers = #tpu.dot_dimension_numbers<[1], [0], [0], [1], [0, 0, 1, 1], [], []>} : vector<32x16xf32>, vector<16x128xf32>, vector<32x128xf32> -> vector<32x128xf32>
    %11 = vector.broadcast %7 : vector<32x1xf32> to vector<32x128xf32>
    %12 = arith.addf %10, %11 : vector<32x128xf32>
    %cst_11 = arith.constant 0.000000e+00 : f32
    %13 = vector.broadcast %cst_11 : f32 to vector<32x128xf32>
    %14 = arith.cmpf oge, %12, %13 : vector<32x128xf32>
    %c0_12 = arith.constant 0 : index
    %c0_13 = arith.constant 0 : index
    %15 = memref.load %arg5[%c0_12, %c0_13] : memref<4x2xf32, #tpu.memory_space<smem>>
    %16 = vector.broadcast %15 : f32 to vector<32x128xf32>
    %17 = arith.mulf %16, %12 : vector<32x128xf32>
    %18 = arith.select %14, %12, %17 : vector<32x128xi1>, vector<32x128xf32>
    %19 = vector.shape_cast %18 : vector<32x128xf32> to vector<1x32x128xf32>
    %cst_14 = arith.constant dense<0.000000e+00> : vector<1xf32>
    %20 = vector.multi_reduction <add>, %19, %cst_14 [1, 2] : vector<1x32x128xf32> to vector<1xf32>
    %21 = vector.shape_cast %20 : vector<1xf32> to vector<1x1x1xf32>
    %22 = vector.extract %21[0, 0, 0] : f32 from vector<1x1x1xf32>
    %23 = vector.broadcast %22 : f32 to vector<1x1xf32>
    %cst_15 = arith.constant 2.44140625E-4 : f32
    %24 = vector.broadcast %cst_15 : f32 to vector<1x1xf32>
    %25 = arith.mulf %23, %24 : vector<1x1xf32>
    %26 = arith.mulf %18, %18 : vector<32x128xf32>
    %27 = vector.shape_cast %26 : vector<32x128xf32> to vector<1x32x128xf32>
    %cst_16 = arith.constant dense<0.000000e+00> : vector<1xf32>
    %28 = vector.multi_reduction <add>, %27, %cst_16 [1, 2] : vector<1x32x128xf32> to vector<1xf32>
    %29 = vector.shape_cast %28 : vector<1xf32> to vector<1x1x1xf32>
    %30 = vector.extract %29[0, 0, 0] : f32 from vector<1x1x1xf32>
    %31 = vector.broadcast %30 : f32 to vector<1x1xf32>
    %cst_17 = arith.constant 2.44140625E-4 : f32
    %32 = vector.broadcast %cst_17 : f32 to vector<1x1xf32>
    %33 = arith.mulf %31, %32 : vector<1x1xf32>
    %34 = arith.mulf %25, %25 : vector<1x1xf32>
    %35 = arith.subf %33, %34 : vector<1x1xf32>
    %cst_18 = arith.constant 9.99999974E-6 : f32
    %36 = vector.broadcast %cst_18 : f32 to vector<1x1xf32>
    %37 = arith.addf %35, %36 : vector<1x1xf32>
    %38 = math.rsqrt %37 : vector<1x1xf32>
    %c0_19 = arith.constant 0 : index
    %c0_20 = arith.constant 0 : index
    %c0_21 = arith.constant 0 : index
    %39 = vector.load %arg6[%c0_19, %c0_20, %c0_21] : memref<4x32x1xf32, #tpu.memory_space<vmem>>, vector<1x32x1xf32>
    %40 = vector.shape_cast %39 : vector<1x32x1xf32> to vector<32x1xf32>
    %41 = vector.broadcast %38 : vector<1x1xf32> to vector<32x1xf32>
    %42 = arith.mulf %40, %41 : vector<32x1xf32>
    %c0_22 = arith.constant 0 : index
    %c0_23 = arith.constant 0 : index
    %c0_24 = arith.constant 0 : index
    %43 = vector.load %arg7[%c0_22, %c0_23, %c0_24] : memref<4x32x1xf32, #tpu.memory_space<vmem>>, vector<1x32x1xf32>
    %44 = vector.shape_cast %43 : vector<1x32x1xf32> to vector<32x1xf32>
    %45 = vector.broadcast %25 : vector<1x1xf32> to vector<32x1xf32>
    %46 = arith.mulf %45, %42 : vector<32x1xf32>
    %47 = arith.subf %44, %46 : vector<32x1xf32>
    %48 = vector.broadcast %42 : vector<32x1xf32> to vector<32x128xf32>
    %49 = arith.mulf %18, %48 : vector<32x128xf32>
    %50 = vector.broadcast %47 : vector<32x1xf32> to vector<32x128xf32>
    %51 = arith.addf %49, %50 : vector<32x128xf32>
    %c1_i32 = arith.constant 1 : i32
    %52 = vector.broadcast %c1_i32 : i32 to vector<32x128xi32>
    %53 = arith.cmpi sge, %2, %52 : vector<32x128xi32>
    %c1_i32_25 = arith.constant 1 : i32
    %54 = tpu.dynamic_rotate %51 by %c1_i32_25 dim 1 : vector<32x128xf32>, i32 -> vector<32x128xf32>
    %cst_26 = arith.constant 0.000000e+00 : f32
    %55 = vector.broadcast %cst_26 : f32 to vector<32x128xf32>
    %56 = arith.select %53, %54, %55 : vector<32x128xi1>, vector<32x128xf32>
    %c127_i32 = arith.constant 127 : i32
    %57 = vector.broadcast %c127_i32 : i32 to vector<32x128xi32>
    %58 = arith.cmpi slt, %2, %57 : vector<32x128xi32>
    %c127_i32_27 = arith.constant 127 : i32
    %59 = tpu.dynamic_rotate %51 by %c127_i32_27 dim 1 : vector<32x128xf32>, i32 -> vector<32x128xf32>
    %cst_28 = arith.constant 0.000000e+00 : f32
    %60 = vector.broadcast %cst_28 : f32 to vector<32x128xf32>
    %61 = arith.select %58, %59, %60 : vector<32x128xi1>, vector<32x128xf32>
    %62 = tpu.concatenate %56, %51, %61 in 0 : vector<32x128xf32>, vector<32x128xf32>, vector<32x128xf32> -> vector<96x128xf32>
    %c0_29 = arith.constant 0 : index
    %c0_30 = arith.constant 0 : index
    %c0_31 = arith.constant 0 : index
    %63 = vector.load %arg8[%c0_29, %c0_30, %c0_31] : memref<4x32x96xf32, #tpu.memory_space<vmem>>, vector<1x32x96xf32>
    %64 = vector.shape_cast %63 : vector<1x32x96xf32> to vector<32x96xf32>
    %cst_32 = arith.constant dense<0.000000e+00> : vector<32x128xf32>
    %65 = tpu.matmul %64, %62, %cst_32 {dimension_numbers = #tpu.dot_dimension_numbers<[1], [0], [0], [1], [0, 0, 1, 1], [], []>} : vector<32x96xf32>, vector<96x128xf32>, vector<32x128xf32> -> vector<32x128xf32>
    %c0_33 = arith.constant 0 : index
    %c0_34 = arith.constant 0 : index
    %c0_35 = arith.constant 0 : index
    %66 = vector.load %arg9[%c0_33, %c0_34, %c0_35] : memref<4x32x1xf32, #tpu.memory_space<vmem>>, vector<1x32x1xf32>
    %67 = vector.shape_cast %66 : vector<1x32x1xf32> to vector<32x1xf32>
    %68 = vector.broadcast %67 : vector<32x1xf32> to vector<32x128xf32>
    %69 = arith.addf %65, %68 : vector<32x128xf32>
    %cst_36 = arith.constant 0.000000e+00 : f32
    %70 = vector.broadcast %cst_36 : f32 to vector<32x128xf32>
    %71 = arith.cmpf oge, %69, %70 : vector<32x128xf32>
    %c0_37 = arith.constant 0 : index
    %c1 = arith.constant 1 : index
    %72 = memref.load %arg5[%c0_37, %c1] : memref<4x2xf32, #tpu.memory_space<smem>>
    %73 = vector.broadcast %72 : f32 to vector<32x128xf32>
    %74 = arith.mulf %73, %69 : vector<32x128xf32>
    %75 = arith.select %71, %69, %74 : vector<32x128xi1>, vector<32x128xf32>
    %76 = vector.shape_cast %75 : vector<32x128xf32> to vector<1x32x128xf32>
    %cst_38 = arith.constant dense<0.000000e+00> : vector<1xf32>
    %77 = vector.multi_reduction <add>, %76, %cst_38 [1, 2] : vector<1x32x128xf32> to vector<1xf32>
    %78 = vector.shape_cast %77 : vector<1xf32> to vector<1x1x1xf32>
    %79 = vector.extract %78[0, 0, 0] : f32 from vector<1x1x1xf32>
    %80 = vector.broadcast %79 : f32 to vector<1x1xf32>
    %cst_39 = arith.constant 2.44140625E-4 : f32
    %81 = vector.broadcast %cst_39 : f32 to vector<1x1xf32>
    %82 = arith.mulf %80, %81 : vector<1x1xf32>
    %83 = arith.mulf %75, %75 : vector<32x128xf32>
    %84 = vector.shape_cast %83 : vector<32x128xf32> to vector<1x32x128xf32>
    %cst_40 = arith.constant dense<0.000000e+00> : vector<1xf32>
    %85 = vector.multi_reduction <add>, %84, %cst_40 [1, 2] : vector<1x32x128xf32> to vector<1xf32>
    %86 = vector.shape_cast %85 : vector<1xf32> to vector<1x1x1xf32>
    %87 = vector.extract %86[0, 0, 0] : f32 from vector<1x1x1xf32>
    %88 = vector.broadcast %87 : f32 to vector<1x1xf32>
    %cst_41 = arith.constant 2.44140625E-4 : f32
    %89 = vector.broadcast %cst_41 : f32 to vector<1x1xf32>
    %90 = arith.mulf %88, %89 : vector<1x1xf32>
    %91 = arith.mulf %82, %82 : vector<1x1xf32>
    %92 = arith.subf %90, %91 : vector<1x1xf32>
    %cst_42 = arith.constant 9.99999974E-6 : f32
    %93 = vector.broadcast %cst_42 : f32 to vector<1x1xf32>
    %94 = arith.addf %92, %93 : vector<1x1xf32>
    %95 = math.rsqrt %94 : vector<1x1xf32>
    %c0_43 = arith.constant 0 : index
    %c0_44 = arith.constant 0 : index
    %c0_45 = arith.constant 0 : index
    %96 = vector.load %arg10[%c0_43, %c0_44, %c0_45] : memref<4x32x1xf32, #tpu.memory_space<vmem>>, vector<1x32x1xf32>
    %97 = vector.shape_cast %96 : vector<1x32x1xf32> to vector<32x1xf32>
    %98 = vector.broadcast %95 : vector<1x1xf32> to vector<32x1xf32>
    %99 = arith.mulf %97, %98 : vector<32x1xf32>
    %c0_46 = arith.constant 0 : index
    %c0_47 = arith.constant 0 : index
    %c0_48 = arith.constant 0 : index
    %100 = vector.load %arg11[%c0_46, %c0_47, %c0_48] : memref<4x32x1xf32, #tpu.memory_space<vmem>>, vector<1x32x1xf32>
    %101 = vector.shape_cast %100 : vector<1x32x1xf32> to vector<32x1xf32>
    %102 = vector.broadcast %82 : vector<1x1xf32> to vector<32x1xf32>
    %103 = arith.mulf %102, %99 : vector<32x1xf32>
    %104 = arith.subf %101, %103 : vector<32x1xf32>
    %105 = vector.broadcast %99 : vector<32x1xf32> to vector<32x128xf32>
    %106 = arith.mulf %75, %105 : vector<32x128xf32>
    %107 = vector.broadcast %104 : vector<32x1xf32> to vector<32x128xf32>
    %108 = arith.addf %106, %107 : vector<32x128xf32>
    %c0_49 = arith.constant 0 : index
    %c0_50 = arith.constant 0 : index
    %c0_51 = arith.constant 0 : index
    %109 = vector.load %arg12[%c0_49, %c0_50, %c0_51] : memref<4x16x32xf32, #tpu.memory_space<vmem>>, vector<1x16x32xf32>
    %110 = vector.shape_cast %109 : vector<1x16x32xf32> to vector<16x32xf32>
    %cst_52 = arith.constant dense<0.000000e+00> : vector<16x128xf32>
    %111 = tpu.matmul %110, %108, %cst_52 {dimension_numbers = #tpu.dot_dimension_numbers<[1], [0], [0], [1], [0, 0, 1, 1], [], []>} : vector<16x32xf32>, vector<32x128xf32>, vector<16x128xf32> -> vector<16x128xf32>
    %112 = arith.addf %1, %111 : vector<16x128xf32>
    %c0_53 = arith.constant 0 : index
    %c0_54 = arith.constant 0 : index
    %c0_55 = arith.constant 0 : index
    %113 = vector.load %arg13[%c0_53, %c0_54, %c0_55] : memref<4x16x1xf32, #tpu.memory_space<vmem>>, vector<1x16x1xf32>
    %114 = vector.shape_cast %113 : vector<1x16x1xf32> to vector<16x1xf32>
    %115 = vector.broadcast %114 : vector<16x1xf32> to vector<16x128xf32>
    %116 = arith.addf %112, %115 : vector<16x128xf32>
    %c1_56 = arith.constant 1 : index
    %c0_57 = arith.constant 0 : index
    %c0_58 = arith.constant 0 : index
    %117 = vector.load %arg4[%c1_56, %c0_57, %c0_58] : memref<4x32x1xf32, #tpu.memory_space<vmem>>, vector<1x32x1xf32>
    %118 = vector.shape_cast %117 : vector<1x32x1xf32> to vector<32x1xf32>
    %c1_59 = arith.constant 1 : index
    %c0_60 = arith.constant 0 : index
    %c0_61 = arith.constant 0 : index
    %119 = vector.load %arg3[%c1_59, %c0_60, %c0_61] : memref<4x32x16xf32, #tpu.memory_space<vmem>>, vector<1x32x16xf32>
    %120 = vector.shape_cast %119 : vector<1x32x16xf32> to vector<32x16xf32>
    %cst_62 = arith.constant dense<0.000000e+00> : vector<32x128xf32>
    %121 = tpu.matmul %120, %116, %cst_62 {dimension_numbers = #tpu.dot_dimension_numbers<[1], [0], [0], [1], [0, 0, 1, 1], [], []>} : vector<32x16xf32>, vector<16x128xf32>, vector<32x128xf32> -> vector<32x128xf32>
    %122 = vector.broadcast %118 : vector<32x1xf32> to vector<32x128xf32>
    %123 = arith.addf %121, %122 : vector<32x128xf32>
    %cst_63 = arith.constant 0.000000e+00 : f32
    %124 = vector.broadcast %cst_63 : f32 to vector<32x128xf32>
    %125 = arith.cmpf oge, %123, %124 : vector<32x128xf32>
    %c1_64 = arith.constant 1 : index
    %c0_65 = arith.constant 0 : index
    %126 = memref.load %arg5[%c1_64, %c0_65] : memref<4x2xf32, #tpu.memory_space<smem>>
    %127 = vector.broadcast %126 : f32 to vector<32x128xf32>
    %128 = arith.mulf %127, %123 : vector<32x128xf32>
    %129 = arith.select %125, %123, %128 : vector<32x128xi1>, vector<32x128xf32>
    %130 = vector.shape_cast %129 : vector<32x128xf32> to vector<1x32x128xf32>
    %cst_66 = arith.constant dense<0.000000e+00> : vector<1xf32>
    %131 = vector.multi_reduction <add>, %130, %cst_66 [1, 2] : vector<1x32x128xf32> to vector<1xf32>
    %132 = vector.shape_cast %131 : vector<1xf32> to vector<1x1x1xf32>
    %133 = vector.extract %132[0, 0, 0] : f32 from vector<1x1x1xf32>
    %134 = vector.broadcast %133 : f32 to vector<1x1xf32>
    %cst_67 = arith.constant 2.44140625E-4 : f32
    %135 = vector.broadcast %cst_67 : f32 to vector<1x1xf32>
    %136 = arith.mulf %134, %135 : vector<1x1xf32>
    %137 = arith.mulf %129, %129 : vector<32x128xf32>
    %138 = vector.shape_cast %137 : vector<32x128xf32> to vector<1x32x128xf32>
    %cst_68 = arith.constant dense<0.000000e+00> : vector<1xf32>
    %139 = vector.multi_reduction <add>, %138, %cst_68 [1, 2] : vector<1x32x128xf32> to vector<1xf32>
    %140 = vector.shape_cast %139 : vector<1xf32> to vector<1x1x1xf32>
    %141 = vector.extract %140[0, 0, 0] : f32 from vector<1x1x1xf32>
    %142 = vector.broadcast %141 : f32 to vector<1x1xf32>
    %cst_69 = arith.constant 2.44140625E-4 : f32
    %143 = vector.broadcast %cst_69 : f32 to vector<1x1xf32>
    %144 = arith.mulf %142, %143 : vector<1x1xf32>
    %145 = arith.mulf %136, %136 : vector<1x1xf32>
    %146 = arith.subf %144, %145 : vector<1x1xf32>
    %cst_70 = arith.constant 9.99999974E-6 : f32
    %147 = vector.broadcast %cst_70 : f32 to vector<1x1xf32>
    %148 = arith.addf %146, %147 : vector<1x1xf32>
    %149 = math.rsqrt %148 : vector<1x1xf32>
    %c1_71 = arith.constant 1 : index
    %c0_72 = arith.constant 0 : index
    %c0_73 = arith.constant 0 : index
    %150 = vector.load %arg6[%c1_71, %c0_72, %c0_73] : memref<4x32x1xf32, #tpu.memory_space<vmem>>, vector<1x32x1xf32>
    %151 = vector.shape_cast %150 : vector<1x32x1xf32> to vector<32x1xf32>
    %152 = vector.broadcast %149 : vector<1x1xf32> to vector<32x1xf32>
    %153 = arith.mulf %151, %152 : vector<32x1xf32>
    %c1_74 = arith.constant 1 : index
    %c0_75 = arith.constant 0 : index
    %c0_76 = arith.constant 0 : index
    %154 = vector.load %arg7[%c1_74, %c0_75, %c0_76] : memref<4x32x1xf32, #tpu.memory_space<vmem>>, vector<1x32x1xf32>
    %155 = vector.shape_cast %154 : vector<1x32x1xf32> to vector<32x1xf32>
    %156 = vector.broadcast %136 : vector<1x1xf32> to vector<32x1xf32>
    %157 = arith.mulf %156, %153 : vector<32x1xf32>
    %158 = arith.subf %155, %157 : vector<32x1xf32>
    %159 = vector.broadcast %153 : vector<32x1xf32> to vector<32x128xf32>
    %160 = arith.mulf %129, %159 : vector<32x128xf32>
    %161 = vector.broadcast %158 : vector<32x1xf32> to vector<32x128xf32>
    %162 = arith.addf %160, %161 : vector<32x128xf32>
    %c2_i32 = arith.constant 2 : i32
    %163 = vector.broadcast %c2_i32 : i32 to vector<32x128xi32>
    %164 = arith.cmpi sge, %2, %163 : vector<32x128xi32>
    %c2_i32_77 = arith.constant 2 : i32
    %165 = tpu.dynamic_rotate %162 by %c2_i32_77 dim 1 : vector<32x128xf32>, i32 -> vector<32x128xf32>
    %cst_78 = arith.constant 0.000000e+00 : f32
    %166 = vector.broadcast %cst_78 : f32 to vector<32x128xf32>
    %167 = arith.select %164, %165, %166 : vector<32x128xi1>, vector<32x128xf32>
    %c126_i32 = arith.constant 126 : i32
    %168 = vector.broadcast %c126_i32 : i32 to vector<32x128xi32>
    %169 = arith.cmpi slt, %2, %168 : vector<32x128xi32>
    %c126_i32_79 = arith.constant 126 : i32
    %170 = tpu.dynamic_rotate %162 by %c126_i32_79 dim 1 : vector<32x128xf32>, i32 -> vector<32x128xf32>
    %cst_80 = arith.constant 0.000000e+00 : f32
    %171 = vector.broadcast %cst_80 : f32 to vector<32x128xf32>
    %172 = arith.select %169, %170, %171 : vector<32x128xi1>, vector<32x128xf32>
    %173 = tpu.concatenate %167, %162, %172 in 0 : vector<32x128xf32>, vector<32x128xf32>, vector<32x128xf32> -> vector<96x128xf32>
    %c1_81 = arith.constant 1 : index
    %c0_82 = arith.constant 0 : index
    %c0_83 = arith.constant 0 : index
    %174 = vector.load %arg8[%c1_81, %c0_82, %c0_83] : memref<4x32x96xf32, #tpu.memory_space<vmem>>, vector<1x32x96xf32>
    %175 = vector.shape_cast %174 : vector<1x32x96xf32> to vector<32x96xf32>
    %cst_84 = arith.constant dense<0.000000e+00> : vector<32x128xf32>
    %176 = tpu.matmul %175, %173, %cst_84 {dimension_numbers = #tpu.dot_dimension_numbers<[1], [0], [0], [1], [0, 0, 1, 1], [], []>} : vector<32x96xf32>, vector<96x128xf32>, vector<32x128xf32> -> vector<32x128xf32>
    %c1_85 = arith.constant 1 : index
    %c0_86 = arith.constant 0 : index
    %c0_87 = arith.constant 0 : index
    %177 = vector.load %arg9[%c1_85, %c0_86, %c0_87] : memref<4x32x1xf32, #tpu.memory_space<vmem>>, vector<1x32x1xf32>
    %178 = vector.shape_cast %177 : vector<1x32x1xf32> to vector<32x1xf32>
    %179 = vector.broadcast %178 : vector<32x1xf32> to vector<32x128xf32>
    %180 = arith.addf %176, %179 : vector<32x128xf32>
    %cst_88 = arith.constant 0.000000e+00 : f32
    %181 = vector.broadcast %cst_88 : f32 to vector<32x128xf32>
    %182 = arith.cmpf oge, %180, %181 : vector<32x128xf32>
    %c1_89 = arith.constant 1 : index
    %c1_90 = arith.constant 1 : index
    %183 = memref.load %arg5[%c1_89, %c1_90] : memref<4x2xf32, #tpu.memory_space<smem>>
    %184 = vector.broadcast %183 : f32 to vector<32x128xf32>
    %185 = arith.mulf %184, %180 : vector<32x128xf32>
    %186 = arith.select %182, %180, %185 : vector<32x128xi1>, vector<32x128xf32>
    %187 = vector.shape_cast %186 : vector<32x128xf32> to vector<1x32x128xf32>
    %cst_91 = arith.constant dense<0.000000e+00> : vector<1xf32>
    %188 = vector.multi_reduction <add>, %187, %cst_91 [1, 2] : vector<1x32x128xf32> to vector<1xf32>
    %189 = vector.shape_cast %188 : vector<1xf32> to vector<1x1x1xf32>
    %190 = vector.extract %189[0, 0, 0] : f32 from vector<1x1x1xf32>
    %191 = vector.broadcast %190 : f32 to vector<1x1xf32>
    %cst_92 = arith.constant 2.44140625E-4 : f32
    %192 = vector.broadcast %cst_92 : f32 to vector<1x1xf32>
    %193 = arith.mulf %191, %192 : vector<1x1xf32>
    %194 = arith.mulf %186, %186 : vector<32x128xf32>
    %195 = vector.shape_cast %194 : vector<32x128xf32> to vector<1x32x128xf32>
    %cst_93 = arith.constant dense<0.000000e+00> : vector<1xf32>
    %196 = vector.multi_reduction <add>, %195, %cst_93 [1, 2] : vector<1x32x128xf32> to vector<1xf32>
    %197 = vector.shape_cast %196 : vector<1xf32> to vector<1x1x1xf32>
    %198 = vector.extract %197[0, 0, 0] : f32 from vector<1x1x1xf32>
    %199 = vector.broadcast %198 : f32 to vector<1x1xf32>
    %cst_94 = arith.constant 2.44140625E-4 : f32
    %200 = vector.broadcast %cst_94 : f32 to vector<1x1xf32>
    %201 = arith.mulf %199, %200 : vector<1x1xf32>
    %202 = arith.mulf %193, %193 : vector<1x1xf32>
    %203 = arith.subf %201, %202 : vector<1x1xf32>
    %cst_95 = arith.constant 9.99999974E-6 : f32
    %204 = vector.broadcast %cst_95 : f32 to vector<1x1xf32>
    %205 = arith.addf %203, %204 : vector<1x1xf32>
    %206 = math.rsqrt %205 : vector<1x1xf32>
    %c1_96 = arith.constant 1 : index
    %c0_97 = arith.constant 0 : index
    %c0_98 = arith.constant 0 : index
    %207 = vector.load %arg10[%c1_96, %c0_97, %c0_98] : memref<4x32x1xf32, #tpu.memory_space<vmem>>, vector<1x32x1xf32>
    %208 = vector.shape_cast %207 : vector<1x32x1xf32> to vector<32x1xf32>
    %209 = vector.broadcast %206 : vector<1x1xf32> to vector<32x1xf32>
    %210 = arith.mulf %208, %209 : vector<32x1xf32>
    %c1_99 = arith.constant 1 : index
    %c0_100 = arith.constant 0 : index
    %c0_101 = arith.constant 0 : index
    %211 = vector.load %arg11[%c1_99, %c0_100, %c0_101] : memref<4x32x1xf32, #tpu.memory_space<vmem>>, vector<1x32x1xf32>
    %212 = vector.shape_cast %211 : vector<1x32x1xf32> to vector<32x1xf32>
    %213 = vector.broadcast %193 : vector<1x1xf32> to vector<32x1xf32>
    %214 = arith.mulf %213, %210 : vector<32x1xf32>
    %215 = arith.subf %212, %214 : vector<32x1xf32>
    %216 = vector.broadcast %210 : vector<32x1xf32> to vector<32x128xf32>
    %217 = arith.mulf %186, %216 : vector<32x128xf32>
    %218 = vector.broadcast %215 : vector<32x1xf32> to vector<32x128xf32>
    %219 = arith.addf %217, %218 : vector<32x128xf32>
    %c1_102 = arith.constant 1 : index
    %c0_103 = arith.constant 0 : index
    %c0_104 = arith.constant 0 : index
    %220 = vector.load %arg12[%c1_102, %c0_103, %c0_104] : memref<4x16x32xf32, #tpu.memory_space<vmem>>, vector<1x16x32xf32>
    %221 = vector.shape_cast %220 : vector<1x16x32xf32> to vector<16x32xf32>
    %cst_105 = arith.constant dense<0.000000e+00> : vector<16x128xf32>
    %222 = tpu.matmul %221, %219, %cst_105 {dimension_numbers = #tpu.dot_dimension_numbers<[1], [0], [0], [1], [0, 0, 1, 1], [], []>} : vector<16x32xf32>, vector<32x128xf32>, vector<16x128xf32> -> vector<16x128xf32>
    %223 = arith.addf %116, %222 : vector<16x128xf32>
    %c1_106 = arith.constant 1 : index
    %c0_107 = arith.constant 0 : index
    %c0_108 = arith.constant 0 : index
    %224 = vector.load %arg13[%c1_106, %c0_107, %c0_108] : memref<4x16x1xf32, #tpu.memory_space<vmem>>, vector<1x16x1xf32>
    %225 = vector.shape_cast %224 : vector<1x16x1xf32> to vector<16x1xf32>
    %226 = vector.broadcast %225 : vector<16x1xf32> to vector<16x128xf32>
    %227 = arith.addf %223, %226 : vector<16x128xf32>
    %c2 = arith.constant 2 : index
    %c0_109 = arith.constant 0 : index
    %c0_110 = arith.constant 0 : index
    %228 = vector.load %arg4[%c2, %c0_109, %c0_110] : memref<4x32x1xf32, #tpu.memory_space<vmem>>, vector<1x32x1xf32>
    %229 = vector.shape_cast %228 : vector<1x32x1xf32> to vector<32x1xf32>
    %c2_111 = arith.constant 2 : index
    %c0_112 = arith.constant 0 : index
    %c0_113 = arith.constant 0 : index
    %230 = vector.load %arg3[%c2_111, %c0_112, %c0_113] : memref<4x32x16xf32, #tpu.memory_space<vmem>>, vector<1x32x16xf32>
    %231 = vector.shape_cast %230 : vector<1x32x16xf32> to vector<32x16xf32>
    %cst_114 = arith.constant dense<0.000000e+00> : vector<32x128xf32>
    %232 = tpu.matmul %231, %227, %cst_114 {dimension_numbers = #tpu.dot_dimension_numbers<[1], [0], [0], [1], [0, 0, 1, 1], [], []>} : vector<32x16xf32>, vector<16x128xf32>, vector<32x128xf32> -> vector<32x128xf32>
    %233 = vector.broadcast %229 : vector<32x1xf32> to vector<32x128xf32>
    %234 = arith.addf %232, %233 : vector<32x128xf32>
    %cst_115 = arith.constant 0.000000e+00 : f32
    %235 = vector.broadcast %cst_115 : f32 to vector<32x128xf32>
    %236 = arith.cmpf oge, %234, %235 : vector<32x128xf32>
    %c2_116 = arith.constant 2 : index
    %c0_117 = arith.constant 0 : index
    %237 = memref.load %arg5[%c2_116, %c0_117] : memref<4x2xf32, #tpu.memory_space<smem>>
    %238 = vector.broadcast %237 : f32 to vector<32x128xf32>
    %239 = arith.mulf %238, %234 : vector<32x128xf32>
    %240 = arith.select %236, %234, %239 : vector<32x128xi1>, vector<32x128xf32>
    %241 = vector.shape_cast %240 : vector<32x128xf32> to vector<1x32x128xf32>
    %cst_118 = arith.constant dense<0.000000e+00> : vector<1xf32>
    %242 = vector.multi_reduction <add>, %241, %cst_118 [1, 2] : vector<1x32x128xf32> to vector<1xf32>
    %243 = vector.shape_cast %242 : vector<1xf32> to vector<1x1x1xf32>
    %244 = vector.extract %243[0, 0, 0] : f32 from vector<1x1x1xf32>
    %245 = vector.broadcast %244 : f32 to vector<1x1xf32>
    %cst_119 = arith.constant 2.44140625E-4 : f32
    %246 = vector.broadcast %cst_119 : f32 to vector<1x1xf32>
    %247 = arith.mulf %245, %246 : vector<1x1xf32>
    %248 = arith.mulf %240, %240 : vector<32x128xf32>
    %249 = vector.shape_cast %248 : vector<32x128xf32> to vector<1x32x128xf32>
    %cst_120 = arith.constant dense<0.000000e+00> : vector<1xf32>
    %250 = vector.multi_reduction <add>, %249, %cst_120 [1, 2] : vector<1x32x128xf32> to vector<1xf32>
    %251 = vector.shape_cast %250 : vector<1xf32> to vector<1x1x1xf32>
    %252 = vector.extract %251[0, 0, 0] : f32 from vector<1x1x1xf32>
    %253 = vector.broadcast %252 : f32 to vector<1x1xf32>
    %cst_121 = arith.constant 2.44140625E-4 : f32
    %254 = vector.broadcast %cst_121 : f32 to vector<1x1xf32>
    %255 = arith.mulf %253, %254 : vector<1x1xf32>
    %256 = arith.mulf %247, %247 : vector<1x1xf32>
    %257 = arith.subf %255, %256 : vector<1x1xf32>
    %cst_122 = arith.constant 9.99999974E-6 : f32
    %258 = vector.broadcast %cst_122 : f32 to vector<1x1xf32>
    %259 = arith.addf %257, %258 : vector<1x1xf32>
    %260 = math.rsqrt %259 : vector<1x1xf32>
    %c2_123 = arith.constant 2 : index
    %c0_124 = arith.constant 0 : index
    %c0_125 = arith.constant 0 : index
    %261 = vector.load %arg6[%c2_123, %c0_124, %c0_125] : memref<4x32x1xf32, #tpu.memory_space<vmem>>, vector<1x32x1xf32>
    %262 = vector.shape_cast %261 : vector<1x32x1xf32> to vector<32x1xf32>
    %263 = vector.broadcast %260 : vector<1x1xf32> to vector<32x1xf32>
    %264 = arith.mulf %262, %263 : vector<32x1xf32>
    %c2_126 = arith.constant 2 : index
    %c0_127 = arith.constant 0 : index
    %c0_128 = arith.constant 0 : index
    %265 = vector.load %arg7[%c2_126, %c0_127, %c0_128] : memref<4x32x1xf32, #tpu.memory_space<vmem>>, vector<1x32x1xf32>
    %266 = vector.shape_cast %265 : vector<1x32x1xf32> to vector<32x1xf32>
    %267 = vector.broadcast %247 : vector<1x1xf32> to vector<32x1xf32>
    %268 = arith.mulf %267, %264 : vector<32x1xf32>
    %269 = arith.subf %266, %268 : vector<32x1xf32>
    %270 = vector.broadcast %264 : vector<32x1xf32> to vector<32x128xf32>
    %271 = arith.mulf %240, %270 : vector<32x128xf32>
    %272 = vector.broadcast %269 : vector<32x1xf32> to vector<32x128xf32>
    %273 = arith.addf %271, %272 : vector<32x128xf32>
    %c4_i32 = arith.constant 4 : i32
    %274 = vector.broadcast %c4_i32 : i32 to vector<32x128xi32>
    %275 = arith.cmpi sge, %2, %274 : vector<32x128xi32>
    %c4_i32_129 = arith.constant 4 : i32
    %276 = tpu.dynamic_rotate %273 by %c4_i32_129 dim 1 : vector<32x128xf32>, i32 -> vector<32x128xf32>
    %cst_130 = arith.constant 0.000000e+00 : f32
    %277 = vector.broadcast %cst_130 : f32 to vector<32x128xf32>
    %278 = arith.select %275, %276, %277 : vector<32x128xi1>, vector<32x128xf32>
    %c124_i32 = arith.constant 124 : i32
    %279 = vector.broadcast %c124_i32 : i32 to vector<32x128xi32>
    %280 = arith.cmpi slt, %2, %279 : vector<32x128xi32>
    %c124_i32_131 = arith.constant 124 : i32
    %281 = tpu.dynamic_rotate %273 by %c124_i32_131 dim 1 : vector<32x128xf32>, i32 -> vector<32x128xf32>
    %cst_132 = arith.constant 0.000000e+00 : f32
    %282 = vector.broadcast %cst_132 : f32 to vector<32x128xf32>
    %283 = arith.select %280, %281, %282 : vector<32x128xi1>, vector<32x128xf32>
    %284 = tpu.concatenate %278, %273, %283 in 0 : vector<32x128xf32>, vector<32x128xf32>, vector<32x128xf32> -> vector<96x128xf32>
    %c2_133 = arith.constant 2 : index
    %c0_134 = arith.constant 0 : index
    %c0_135 = arith.constant 0 : index
    %285 = vector.load %arg8[%c2_133, %c0_134, %c0_135] : memref<4x32x96xf32, #tpu.memory_space<vmem>>, vector<1x32x96xf32>
    %286 = vector.shape_cast %285 : vector<1x32x96xf32> to vector<32x96xf32>
    %cst_136 = arith.constant dense<0.000000e+00> : vector<32x128xf32>
    %287 = tpu.matmul %286, %284, %cst_136 {dimension_numbers = #tpu.dot_dimension_numbers<[1], [0], [0], [1], [0, 0, 1, 1], [], []>} : vector<32x96xf32>, vector<96x128xf32>, vector<32x128xf32> -> vector<32x128xf32>
    %c2_137 = arith.constant 2 : index
    %c0_138 = arith.constant 0 : index
    %c0_139 = arith.constant 0 : index
    %288 = vector.load %arg9[%c2_137, %c0_138, %c0_139] : memref<4x32x1xf32, #tpu.memory_space<vmem>>, vector<1x32x1xf32>
    %289 = vector.shape_cast %288 : vector<1x32x1xf32> to vector<32x1xf32>
    %290 = vector.broadcast %289 : vector<32x1xf32> to vector<32x128xf32>
    %291 = arith.addf %287, %290 : vector<32x128xf32>
    %cst_140 = arith.constant 0.000000e+00 : f32
    %292 = vector.broadcast %cst_140 : f32 to vector<32x128xf32>
    %293 = arith.cmpf oge, %291, %292 : vector<32x128xf32>
    %c2_141 = arith.constant 2 : index
    %c1_142 = arith.constant 1 : index
    %294 = memref.load %arg5[%c2_141, %c1_142] : memref<4x2xf32, #tpu.memory_space<smem>>
    %295 = vector.broadcast %294 : f32 to vector<32x128xf32>
    %296 = arith.mulf %295, %291 : vector<32x128xf32>
    %297 = arith.select %293, %291, %296 : vector<32x128xi1>, vector<32x128xf32>
    %298 = vector.shape_cast %297 : vector<32x128xf32> to vector<1x32x128xf32>
    %cst_143 = arith.constant dense<0.000000e+00> : vector<1xf32>
    %299 = vector.multi_reduction <add>, %298, %cst_143 [1, 2] : vector<1x32x128xf32> to vector<1xf32>
    %300 = vector.shape_cast %299 : vector<1xf32> to vector<1x1x1xf32>
    %301 = vector.extract %300[0, 0, 0] : f32 from vector<1x1x1xf32>
    %302 = vector.broadcast %301 : f32 to vector<1x1xf32>
    %cst_144 = arith.constant 2.44140625E-4 : f32
    %303 = vector.broadcast %cst_144 : f32 to vector<1x1xf32>
    %304 = arith.mulf %302, %303 : vector<1x1xf32>
    %305 = arith.mulf %297, %297 : vector<32x128xf32>
    %306 = vector.shape_cast %305 : vector<32x128xf32> to vector<1x32x128xf32>
    %cst_145 = arith.constant dense<0.000000e+00> : vector<1xf32>
    %307 = vector.multi_reduction <add>, %306, %cst_145 [1, 2] : vector<1x32x128xf32> to vector<1xf32>
    %308 = vector.shape_cast %307 : vector<1xf32> to vector<1x1x1xf32>
    %309 = vector.extract %308[0, 0, 0] : f32 from vector<1x1x1xf32>
    %310 = vector.broadcast %309 : f32 to vector<1x1xf32>
    %cst_146 = arith.constant 2.44140625E-4 : f32
    %311 = vector.broadcast %cst_146 : f32 to vector<1x1xf32>
    %312 = arith.mulf %310, %311 : vector<1x1xf32>
    %313 = arith.mulf %304, %304 : vector<1x1xf32>
    %314 = arith.subf %312, %313 : vector<1x1xf32>
    %cst_147 = arith.constant 9.99999974E-6 : f32
    %315 = vector.broadcast %cst_147 : f32 to vector<1x1xf32>
    %316 = arith.addf %314, %315 : vector<1x1xf32>
    %317 = math.rsqrt %316 : vector<1x1xf32>
    %c2_148 = arith.constant 2 : index
    %c0_149 = arith.constant 0 : index
    %c0_150 = arith.constant 0 : index
    %318 = vector.load %arg10[%c2_148, %c0_149, %c0_150] : memref<4x32x1xf32, #tpu.memory_space<vmem>>, vector<1x32x1xf32>
    %319 = vector.shape_cast %318 : vector<1x32x1xf32> to vector<32x1xf32>
    %320 = vector.broadcast %317 : vector<1x1xf32> to vector<32x1xf32>
    %321 = arith.mulf %319, %320 : vector<32x1xf32>
    %c2_151 = arith.constant 2 : index
    %c0_152 = arith.constant 0 : index
    %c0_153 = arith.constant 0 : index
    %322 = vector.load %arg11[%c2_151, %c0_152, %c0_153] : memref<4x32x1xf32, #tpu.memory_space<vmem>>, vector<1x32x1xf32>
    %323 = vector.shape_cast %322 : vector<1x32x1xf32> to vector<32x1xf32>
    %324 = vector.broadcast %304 : vector<1x1xf32> to vector<32x1xf32>
    %325 = arith.mulf %324, %321 : vector<32x1xf32>
    %326 = arith.subf %323, %325 : vector<32x1xf32>
    %327 = vector.broadcast %321 : vector<32x1xf32> to vector<32x128xf32>
    %328 = arith.mulf %297, %327 : vector<32x128xf32>
    %329 = vector.broadcast %326 : vector<32x1xf32> to vector<32x128xf32>
    %330 = arith.addf %328, %329 : vector<32x128xf32>
    %c2_154 = arith.constant 2 : index
    %c0_155 = arith.constant 0 : index
    %c0_156 = arith.constant 0 : index
    %331 = vector.load %arg12[%c2_154, %c0_155, %c0_156] : memref<4x16x32xf32, #tpu.memory_space<vmem>>, vector<1x16x32xf32>
    %332 = vector.shape_cast %331 : vector<1x16x32xf32> to vector<16x32xf32>
    %cst_157 = arith.constant dense<0.000000e+00> : vector<16x128xf32>
    %333 = tpu.matmul %332, %330, %cst_157 {dimension_numbers = #tpu.dot_dimension_numbers<[1], [0], [0], [1], [0, 0, 1, 1], [], []>} : vector<16x32xf32>, vector<32x128xf32>, vector<16x128xf32> -> vector<16x128xf32>
    %334 = arith.addf %227, %333 : vector<16x128xf32>
    %c2_158 = arith.constant 2 : index
    %c0_159 = arith.constant 0 : index
    %c0_160 = arith.constant 0 : index
    %335 = vector.load %arg13[%c2_158, %c0_159, %c0_160] : memref<4x16x1xf32, #tpu.memory_space<vmem>>, vector<1x16x1xf32>
    %336 = vector.shape_cast %335 : vector<1x16x1xf32> to vector<16x1xf32>
    %337 = vector.broadcast %336 : vector<16x1xf32> to vector<16x128xf32>
    %338 = arith.addf %334, %337 : vector<16x128xf32>
    %c3 = arith.constant 3 : index
    %c0_161 = arith.constant 0 : index
    %c0_162 = arith.constant 0 : index
    %339 = vector.load %arg4[%c3, %c0_161, %c0_162] : memref<4x32x1xf32, #tpu.memory_space<vmem>>, vector<1x32x1xf32>
    %340 = vector.shape_cast %339 : vector<1x32x1xf32> to vector<32x1xf32>
    %c3_163 = arith.constant 3 : index
    %c0_164 = arith.constant 0 : index
    %c0_165 = arith.constant 0 : index
    %341 = vector.load %arg3[%c3_163, %c0_164, %c0_165] : memref<4x32x16xf32, #tpu.memory_space<vmem>>, vector<1x32x16xf32>
    %342 = vector.shape_cast %341 : vector<1x32x16xf32> to vector<32x16xf32>
    %cst_166 = arith.constant dense<0.000000e+00> : vector<32x128xf32>
    %343 = tpu.matmul %342, %338, %cst_166 {dimension_numbers = #tpu.dot_dimension_numbers<[1], [0], [0], [1], [0, 0, 1, 1], [], []>} : vector<32x16xf32>, vector<16x128xf32>, vector<32x128xf32> -> vector<32x128xf32>
    %344 = vector.broadcast %340 : vector<32x1xf32> to vector<32x128xf32>
    %345 = arith.addf %343, %344 : vector<32x128xf32>
    %cst_167 = arith.constant 0.000000e+00 : f32
    %346 = vector.broadcast %cst_167 : f32 to vector<32x128xf32>
    %347 = arith.cmpf oge, %345, %346 : vector<32x128xf32>
    %c3_168 = arith.constant 3 : index
    %c0_169 = arith.constant 0 : index
    %348 = memref.load %arg5[%c3_168, %c0_169] : memref<4x2xf32, #tpu.memory_space<smem>>
    %349 = vector.broadcast %348 : f32 to vector<32x128xf32>
    %350 = arith.mulf %349, %345 : vector<32x128xf32>
    %351 = arith.select %347, %345, %350 : vector<32x128xi1>, vector<32x128xf32>
    %352 = vector.shape_cast %351 : vector<32x128xf32> to vector<1x32x128xf32>
    %cst_170 = arith.constant dense<0.000000e+00> : vector<1xf32>
    %353 = vector.multi_reduction <add>, %352, %cst_170 [1, 2] : vector<1x32x128xf32> to vector<1xf32>
    %354 = vector.shape_cast %353 : vector<1xf32> to vector<1x1x1xf32>
    %355 = vector.extract %354[0, 0, 0] : f32 from vector<1x1x1xf32>
    %356 = vector.broadcast %355 : f32 to vector<1x1xf32>
    %cst_171 = arith.constant 2.44140625E-4 : f32
    %357 = vector.broadcast %cst_171 : f32 to vector<1x1xf32>
    %358 = arith.mulf %356, %357 : vector<1x1xf32>
    %359 = arith.mulf %351, %351 : vector<32x128xf32>
    %360 = vector.shape_cast %359 : vector<32x128xf32> to vector<1x32x128xf32>
    %cst_172 = arith.constant dense<0.000000e+00> : vector<1xf32>
    %361 = vector.multi_reduction <add>, %360, %cst_172 [1, 2] : vector<1x32x128xf32> to vector<1xf32>
    %362 = vector.shape_cast %361 : vector<1xf32> to vector<1x1x1xf32>
    %363 = vector.extract %362[0, 0, 0] : f32 from vector<1x1x1xf32>
    %364 = vector.broadcast %363 : f32 to vector<1x1xf32>
    %cst_173 = arith.constant 2.44140625E-4 : f32
    %365 = vector.broadcast %cst_173 : f32 to vector<1x1xf32>
    %366 = arith.mulf %364, %365 : vector<1x1xf32>
    %367 = arith.mulf %358, %358 : vector<1x1xf32>
    %368 = arith.subf %366, %367 : vector<1x1xf32>
    %cst_174 = arith.constant 9.99999974E-6 : f32
    %369 = vector.broadcast %cst_174 : f32 to vector<1x1xf32>
    %370 = arith.addf %368, %369 : vector<1x1xf32>
    %371 = math.rsqrt %370 : vector<1x1xf32>
    %c3_175 = arith.constant 3 : index
    %c0_176 = arith.constant 0 : index
    %c0_177 = arith.constant 0 : index
    %372 = vector.load %arg6[%c3_175, %c0_176, %c0_177] : memref<4x32x1xf32, #tpu.memory_space<vmem>>, vector<1x32x1xf32>
    %373 = vector.shape_cast %372 : vector<1x32x1xf32> to vector<32x1xf32>
    %374 = vector.broadcast %371 : vector<1x1xf32> to vector<32x1xf32>
    %375 = arith.mulf %373, %374 : vector<32x1xf32>
    %c3_178 = arith.constant 3 : index
    %c0_179 = arith.constant 0 : index
    %c0_180 = arith.constant 0 : index
    %376 = vector.load %arg7[%c3_178, %c0_179, %c0_180] : memref<4x32x1xf32, #tpu.memory_space<vmem>>, vector<1x32x1xf32>
    %377 = vector.shape_cast %376 : vector<1x32x1xf32> to vector<32x1xf32>
    %378 = vector.broadcast %358 : vector<1x1xf32> to vector<32x1xf32>
    %379 = arith.mulf %378, %375 : vector<32x1xf32>
    %380 = arith.subf %377, %379 : vector<32x1xf32>
    %381 = vector.broadcast %375 : vector<32x1xf32> to vector<32x128xf32>
    %382 = arith.mulf %351, %381 : vector<32x128xf32>
    %383 = vector.broadcast %380 : vector<32x1xf32> to vector<32x128xf32>
    %384 = arith.addf %382, %383 : vector<32x128xf32>
    %c8_i32 = arith.constant 8 : i32
    %385 = vector.broadcast %c8_i32 : i32 to vector<32x128xi32>
    %386 = arith.cmpi sge, %2, %385 : vector<32x128xi32>
    %c8_i32_181 = arith.constant 8 : i32
    %387 = tpu.dynamic_rotate %384 by %c8_i32_181 dim 1 : vector<32x128xf32>, i32 -> vector<32x128xf32>
    %cst_182 = arith.constant 0.000000e+00 : f32
    %388 = vector.broadcast %cst_182 : f32 to vector<32x128xf32>
    %389 = arith.select %386, %387, %388 : vector<32x128xi1>, vector<32x128xf32>
    %c120_i32 = arith.constant 120 : i32
    %390 = vector.broadcast %c120_i32 : i32 to vector<32x128xi32>
    %391 = arith.cmpi slt, %2, %390 : vector<32x128xi32>
    %c120_i32_183 = arith.constant 120 : i32
    %392 = tpu.dynamic_rotate %384 by %c120_i32_183 dim 1 : vector<32x128xf32>, i32 -> vector<32x128xf32>
    %cst_184 = arith.constant 0.000000e+00 : f32
    %393 = vector.broadcast %cst_184 : f32 to vector<32x128xf32>
    %394 = arith.select %391, %392, %393 : vector<32x128xi1>, vector<32x128xf32>
    %395 = tpu.concatenate %389, %384, %394 in 0 : vector<32x128xf32>, vector<32x128xf32>, vector<32x128xf32> -> vector<96x128xf32>
    %c3_185 = arith.constant 3 : index
    %c0_186 = arith.constant 0 : index
    %c0_187 = arith.constant 0 : index
    %396 = vector.load %arg8[%c3_185, %c0_186, %c0_187] : memref<4x32x96xf32, #tpu.memory_space<vmem>>, vector<1x32x96xf32>
    %397 = vector.shape_cast %396 : vector<1x32x96xf32> to vector<32x96xf32>
    %cst_188 = arith.constant dense<0.000000e+00> : vector<32x128xf32>
    %398 = tpu.matmul %397, %395, %cst_188 {dimension_numbers = #tpu.dot_dimension_numbers<[1], [0], [0], [1], [0, 0, 1, 1], [], []>} : vector<32x96xf32>, vector<96x128xf32>, vector<32x128xf32> -> vector<32x128xf32>
    %c3_189 = arith.constant 3 : index
    %c0_190 = arith.constant 0 : index
    %c0_191 = arith.constant 0 : index
    %399 = vector.load %arg9[%c3_189, %c0_190, %c0_191] : memref<4x32x1xf32, #tpu.memory_space<vmem>>, vector<1x32x1xf32>
    %400 = vector.shape_cast %399 : vector<1x32x1xf32> to vector<32x1xf32>
    %401 = vector.broadcast %400 : vector<32x1xf32> to vector<32x128xf32>
    %402 = arith.addf %398, %401 : vector<32x128xf32>
    %cst_192 = arith.constant 0.000000e+00 : f32
    %403 = vector.broadcast %cst_192 : f32 to vector<32x128xf32>
    %404 = arith.cmpf oge, %402, %403 : vector<32x128xf32>
    %c3_193 = arith.constant 3 : index
    %c1_194 = arith.constant 1 : index
    %405 = memref.load %arg5[%c3_193, %c1_194] : memref<4x2xf32, #tpu.memory_space<smem>>
    %406 = vector.broadcast %405 : f32 to vector<32x128xf32>
    %407 = arith.mulf %406, %402 : vector<32x128xf32>
    %408 = arith.select %404, %402, %407 : vector<32x128xi1>, vector<32x128xf32>
    %409 = vector.shape_cast %408 : vector<32x128xf32> to vector<1x32x128xf32>
    %cst_195 = arith.constant dense<0.000000e+00> : vector<1xf32>
    %410 = vector.multi_reduction <add>, %409, %cst_195 [1, 2] : vector<1x32x128xf32> to vector<1xf32>
    %411 = vector.shape_cast %410 : vector<1xf32> to vector<1x1x1xf32>
    %412 = vector.extract %411[0, 0, 0] : f32 from vector<1x1x1xf32>
    %413 = vector.broadcast %412 : f32 to vector<1x1xf32>
    %cst_196 = arith.constant 2.44140625E-4 : f32
    %414 = vector.broadcast %cst_196 : f32 to vector<1x1xf32>
    %415 = arith.mulf %413, %414 : vector<1x1xf32>
    %416 = arith.mulf %408, %408 : vector<32x128xf32>
    %417 = vector.shape_cast %416 : vector<32x128xf32> to vector<1x32x128xf32>
    %cst_197 = arith.constant dense<0.000000e+00> : vector<1xf32>
    %418 = vector.multi_reduction <add>, %417, %cst_197 [1, 2] : vector<1x32x128xf32> to vector<1xf32>
    %419 = vector.shape_cast %418 : vector<1xf32> to vector<1x1x1xf32>
    %420 = vector.extract %419[0, 0, 0] : f32 from vector<1x1x1xf32>
    %421 = vector.broadcast %420 : f32 to vector<1x1xf32>
    %cst_198 = arith.constant 2.44140625E-4 : f32
    %422 = vector.broadcast %cst_198 : f32 to vector<1x1xf32>
    %423 = arith.mulf %421, %422 : vector<1x1xf32>
    %424 = arith.mulf %415, %415 : vector<1x1xf32>
    %425 = arith.subf %423, %424 : vector<1x1xf32>
    %cst_199 = arith.constant 9.99999974E-6 : f32
    %426 = vector.broadcast %cst_199 : f32 to vector<1x1xf32>
    %427 = arith.addf %425, %426 : vector<1x1xf32>
    %428 = math.rsqrt %427 : vector<1x1xf32>
    %c3_200 = arith.constant 3 : index
    %c0_201 = arith.constant 0 : index
    %c0_202 = arith.constant 0 : index
    %429 = vector.load %arg10[%c3_200, %c0_201, %c0_202] : memref<4x32x1xf32, #tpu.memory_space<vmem>>, vector<1x32x1xf32>
    %430 = vector.shape_cast %429 : vector<1x32x1xf32> to vector<32x1xf32>
    %431 = vector.broadcast %428 : vector<1x1xf32> to vector<32x1xf32>
    %432 = arith.mulf %430, %431 : vector<32x1xf32>
    %c3_203 = arith.constant 3 : index
    %c0_204 = arith.constant 0 : index
    %c0_205 = arith.constant 0 : index
    %433 = vector.load %arg11[%c3_203, %c0_204, %c0_205] : memref<4x32x1xf32, #tpu.memory_space<vmem>>, vector<1x32x1xf32>
    %434 = vector.shape_cast %433 : vector<1x32x1xf32> to vector<32x1xf32>
    %435 = vector.broadcast %415 : vector<1x1xf32> to vector<32x1xf32>
    %436 = arith.mulf %435, %432 : vector<32x1xf32>
    %437 = arith.subf %434, %436 : vector<32x1xf32>
    %438 = vector.broadcast %432 : vector<32x1xf32> to vector<32x128xf32>
    %439 = arith.mulf %408, %438 : vector<32x128xf32>
    %440 = vector.broadcast %437 : vector<32x1xf32> to vector<32x128xf32>
    %441 = arith.addf %439, %440 : vector<32x128xf32>
    %c3_206 = arith.constant 3 : index
    %c0_207 = arith.constant 0 : index
    %c0_208 = arith.constant 0 : index
    %442 = vector.load %arg12[%c3_206, %c0_207, %c0_208] : memref<4x16x32xf32, #tpu.memory_space<vmem>>, vector<1x16x32xf32>
    %443 = vector.shape_cast %442 : vector<1x16x32xf32> to vector<16x32xf32>
    %cst_209 = arith.constant dense<0.000000e+00> : vector<16x128xf32>
    %444 = tpu.matmul %443, %441, %cst_209 {dimension_numbers = #tpu.dot_dimension_numbers<[1], [0], [0], [1], [0, 0, 1, 1], [], []>} : vector<16x32xf32>, vector<32x128xf32>, vector<16x128xf32> -> vector<16x128xf32>
    %445 = arith.addf %338, %444 : vector<16x128xf32>
    %c3_210 = arith.constant 3 : index
    %c0_211 = arith.constant 0 : index
    %c0_212 = arith.constant 0 : index
    %446 = vector.load %arg13[%c3_210, %c0_211, %c0_212] : memref<4x16x1xf32, #tpu.memory_space<vmem>>, vector<1x16x1xf32>
    %447 = vector.shape_cast %446 : vector<1x16x1xf32> to vector<16x1xf32>
    %448 = vector.broadcast %447 : vector<16x1xf32> to vector<16x128xf32>
    %449 = arith.addf %445, %448 : vector<16x128xf32>
    %c0_213 = arith.constant 0 : index
    %c0_214 = arith.constant 0 : index
    %c0_215 = arith.constant 0 : index
    %450 = vector.load %arg14[%c0_213, %c0_214, %c0_215] : memref<1x16x128xf32, #tpu.memory_space<vmem>>, vector<1x16x128xf32>
    %451 = vector.shape_cast %450 : vector<1x16x128xf32> to vector<16x128xf32>
    %452 = vector.shape_cast %449 : vector<16x128xf32> to vector<1x16x128xf32>
    tpu.vector_store %arg14[%c0_213, %c0_214, %c0_215], %452 {strides = array<i32>} : memref<1x16x128xf32, #tpu.memory_space<vmem>>, vector<1x16x128xf32>,
    return
  }
  func.func @transform_0(%arg0: i32) -> (i32, i32, i32) {
    %c0_i32 = arith.constant 0 : i32
    %c0_i32_0 = arith.constant 0 : i32
    %c0_i32_1 = arith.constant 0 : i32
    return %arg0, %c0_i32, %c0_i32_0 : i32, i32, i32
  }
  func.func @transform_1(%arg0: i32) -> (i32, i32, i32) {
    %c0_i32 = arith.constant 0 : i32
    %c0_i32_0 = arith.constant 0 : i32
    %c0_i32_1 = arith.constant 0 : i32
    return %arg0, %c0_i32, %c0_i32_0 : i32, i32, i32
  }
  func.func @transform_2(%arg0: i32) -> (i32, i32, i32) {
    %c0_i32 = arith.constant 0 : i32
    %c0_i32_0 = arith.constant 0 : i32
    %c0_i32_1 = arith.constant 0 : i32
    %c0_i32_2 = arith.constant 0 : i32
    return %c0_i32, %c0_i32_0, %c0_i32_1 : i32, i32, i32
  }
  func.func @transform_3(%arg0: i32) -> (i32, i32, i32) {
    %c0_i32 = arith.constant 0 : i32
    %c0_i32_0 = arith.constant 0 : i32
    %c0_i32_1 = arith.constant 0 : i32
    %c0_i32_2 = arith.constant 0 : i32
    return %c0_i32, %c0_i32_0, %c0_i32_1 : i32, i32, i32
  }
  func.func @transform_4(%arg0: i32) -> (i32, i32) {
    %c0_i32 = arith.constant 0 : i32
    %c0_i32_0 = arith.constant 0 : i32
    %c0_i32_1 = arith.constant 0 : i32
    return %c0_i32, %c0_i32_0 : i32, i32
  }
  func.func @transform_5(%arg0: i32) -> (i32, i32, i32) {
    %c0_i32 = arith.constant 0 : i32
    %c0_i32_0 = arith.constant 0 : i32
    %c0_i32_1 = arith.constant 0 : i32
    %c0_i32_2 = arith.constant 0 : i32
    return %c0_i32, %c0_i32_0, %c0_i32_1 : i32, i32, i32
  }
  func.func @transform_6(%arg0: i32) -> (i32, i32, i32) {
    %c0_i32 = arith.constant 0 : i32
    %c0_i32_0 = arith.constant 0 : i32
    %c0_i32_1 = arith.constant 0 : i32
    %c0_i32_2 = arith.constant 0 : i32
    return %c0_i32, %c0_i32_0, %c0_i32_1 : i32, i32, i32
  }
  func.func @transform_7(%arg0: i32) -> (i32, i32, i32) {
    %c0_i32 = arith.constant 0 : i32
    %c0_i32_0 = arith.constant 0 : i32
    %c0_i32_1 = arith.constant 0 : i32
    %c0_i32_2 = arith.constant 0 : i32
    return %c0_i32, %c0_i32_0, %c0_i32_1 : i32, i32, i32
  }
  func.func @transform_8(%arg0: i32) -> (i32, i32, i32) {
    %c0_i32 = arith.constant 0 : i32
    %c0_i32_0 = arith.constant 0 : i32
    %c0_i32_1 = arith.constant 0 : i32
    %c0_i32_2 = arith.constant 0 : i32
    return %c0_i32, %c0_i32_0, %c0_i32_1 : i32, i32, i32
  }
  func.func @transform_9(%arg0: i32) -> (i32, i32, i32) {
    %c0_i32 = arith.constant 0 : i32
    %c0_i32_0 = arith.constant 0 : i32
    %c0_i32_1 = arith.constant 0 : i32
    %c0_i32_2 = arith.constant 0 : i32
    return %c0_i32, %c0_i32_0, %c0_i32_1 : i32, i32, i32
  }
  func.func @transform_10(%arg0: i32) -> (i32, i32, i32) {
    %c0_i32 = arith.constant 0 : i32
    %c0_i32_0 = arith.constant 0 : i32
    %c0_i32_1 = arith.constant 0 : i32
    %c0_i32_2 = arith.constant 0 : i32
    return %c0_i32, %c0_i32_0, %c0_i32_1 : i32, i32, i32
  }
  func.func @transform_11(%arg0: i32) -> (i32, i32, i32) {
    %c0_i32 = arith.constant 0 : i32
    %c0_i32_0 = arith.constant 0 : i32
    %c0_i32_1 = arith.constant 0 : i32
    %c0_i32_2 = arith.constant 0 : i32
    return %c0_i32, %c0_i32_0, %c0_i32_1 : i32, i32, i32
  }
  func.func @transform_12(%arg0: i32) -> (i32, i32, i32) {
    %c0_i32 = arith.constant 0 : i32
    %c0_i32_0 = arith.constant 0 : i32
    %c0_i32_1 = arith.constant 0 : i32
    %c0_i32_2 = arith.constant 0 : i32
    return %c0_i32, %c0_i32_0, %c0_i32_1 : i32, i32, i32
  }
  func.func @transform_13(%arg0: i32) -> (i32, i32, i32) {
    %c0_i32 = arith.constant 0 : i32
    %c0_i32_0 = arith.constant 0 : i32
    %c0_i32_1 = arith.constant 0 : i32
    return %arg0, %c0_i32, %c0_i32_0 : i32, i32, i32
  }
}

</mosaic_0001>

<bundles_post_ra>
// kernel: tcn_stack_forward.1
= control target key start
LH: loop header
LB: loop body
LE: loop exit
PB: predicated region body
PF: predicated region fallthrough
CT: control target
= control target key end

     0   :  { %s4950_s0 = inlined_call_operand.vmem [shape: f32[2,16,128], index: 0, kind: input, shape index: {}]   ;;  %s4951_s1 = inlined_call_operand.vmem [shape: f32[2,32,1], index: 1, kind: input, shape index: {}]   ;;  %s4952_s2 = inlined_call_operand.vmem [shape: f32[4,32,16], index: 2, kind: input, shape index: {}]   ;;  %s4953_s3 = inlined_call_operand.vmem [shape: f32[4,32,1], index: 3, kind: input, shape index: {}]   ;;  %s4954_s4 = inlined_call_operand.vmem [shape: f32[4,2], index: 4, kind: input, shape index: {}]   ;;  %s4955_s5 = inlined_call_operand.vmem [shape: f32[4,32,1], index: 5, kind: input, shape index: {}]   ;;  %s4956_s6 = inlined_call_operand.vmem [shape: f32[4,32,1], index: 6, kind: input, shape index: {}]   ;;  %s4957_s7 = inlined_call_operand.vmem [shape: f32[4,32,96], index: 7, kind: input, shape index: {}]   ;;  %s4958_s8 = inlined_call_operand.vmem [shape: f32[4,32,1], index: 8, kind: input, shape index: {}]   ;;  %s4959_s9 = inlined_call_operand.vmem [shape: f32[4,32,1], index: 9, kind: input, shape index: {}]   ;;  %s4960_s10 = inlined_call_operand.vmem [shape: f32[4,32,1], index: 10, kind: input, shape index: {}]   ;;  %s4961_s11 = inlined_call_operand.vmem [shape: f32[4,16,32], index: 11, kind: input, shape index: {}]   ;;  %s4962_s12 = inlined_call_operand.vmem [shape: f32[4,16,1], index: 12, kind: input, shape index: {}]   ;;  %s4963_s13 = inlined_call_operand.hbm [shape: f32[2,16,128], index: 13, kind: output, shape index: {}]  }
   0x1   :  { %4971 = sst [smem:[#allocation14_spill]] %s4954_s4 }
   0x2   :  { %4972 = sst [smem:[#allocation15_spill]] %s4963_s13 }
   0x3   :  { %18 = vsyncpa [#allocation4], 0 }
   0x4   :  { %19 = vsyncpa [#allocation3], 0 }
   0x5   :  { %21 = vsyncpa [#allocation3 + $0x1], 0  ;;  %s4117_s25 = smov 0   ;;  %s4119_s26 = smov 0  }
   0x6   :  { %s4121_s27 = smov 0   ;;  %s4123_s28 = smov 0  }
   0x7 LB: > { %4973 = sst [smem:[#allocation8_spill]] %s4021_s25  ;;  %s4138_s29 = sadd.s32 4294967295, %s4033_s28   ;;  %s4033_s28 = sphi %s4123_s28, %s4987_s28   ;;  %s4029_s27 = sphi %s4121_s27, %s4989_s27   ;;  %s4025_s26 = sphi %s4119_s26, %s4991_s26   ;;  %s4021_s25 = sphi %s4117_s25, %s4990_s25  }
   0x8   : > { %4974 = sst [smem:[#allocation9_spill]] %s4029_s27  ;;  %s3064_s30 = sadd.s32 4294967294, %s4033_s28  }
   0x9   : > { %4975 = sst [smem:[#allocation10_spill]] %s4033_s28  ;;  %s4142_s14 = sadd.s32 1, %s4033_s28  }
   0xa   : > { %4976 = sst [smem:[#allocation11_spill]] %s4142_s14  ;;  %s317_s15 = sadd.s32 1, %s4029_s27 }
   0xb   : > { %s314_s16 = ssub.s32 %s4033_s28, %s4142_s14  ;;  %p327_p0 = scmp.ne.s32.totalorder %s4029_s27, %s4025_s26 }
   0xc   : > { %p315_p1 = scmp.eq.s32.totalorder %s314_s16, 0  ;;  %p328_p2 = scmp.eq.s32.totalorder %s4138_s29, 1 }
   0xd   : > { %p333_p3 = scmp.ne.s32.totalorder %s4025_s26, %s4021_s25  ;;  %p334_p4 = scmp.eq.s32.totalorder %s3064_s30, 1 }
   0xe   : > { %s4153_s17 = scalar_select %p315_p1, %s4029_s27, %s317_s15  }
   0xf   : > { %p4155_p5 = por %p328_p2, %p327_p0  ;;  %p4159_p6 = por %p334_p4, %p333_p3 }
  0x10   : > { %4977 = sst [smem:[#allocation12_spill]] %s4153_s17  ;;  %p3065_p7 = scmp.ge.s32.totalorder %s4033_s28, 1 }
  0x11   : > { %s4979_s19 = scalar_select %p4159_p6, 1, 0 }
  0x12   : > { %p341_p8 = scmp.lt.s32.totalorder %s4033_s28, 3  ;;  %p3808_p9 = scmp.eq.s32.totalorder %s4138_s29, 0 }
  0x13   : > { %4980 = sst [smem:[#allocation13_spill]] %s4979_s19  ;;  %s4982_s4 = sld [smem:[#allocation14_spill]] }
  0x14   : > { %p4166_p10 = pnand %p3065_p7, %p341_p8 }
  0x16   : > { %p3800_p11 = pneg %p4166_p10 }
  0x18   : > { %p3801_p12 = pnand %p3808_p9, %p3800_p11 }
  0x19   : > { %s360_s23 = sshll.u32 %s4982_s4, 4  ;;  %s361_s23 = int_to_ptr.vmem [resolvable:$true] %s360_s23 }
  0x1a   : > { %s3952_s24 = scalar_lea.vmem %s361_s23, 64  ;;  %p3954_p0 = pneg %p3801_p12 }
  0x1b   : > { %p3953_p13 = scmp.ne.s32.totalorder %s361_s23, %s3952_s24  ;;  %p3960_p3 = scmp.lt.s32.totalorder %s361_s23, %s361_s23 }
  0x1c   : > { %p3961_p4 = scmp.lt.s32.totalorder %s3952_s24, %s3952_s24 }
  0x1d   : > { %p3955_p1 = pnand %p3954_p0, %p3953_p13 }
  0x1e   : > { %p3962_p7 = por %p3961_p4, %p3960_p3 }
  0x1f   : > { %p3956_p2 = pneg %p3955_p1 }
  0x21   : > { %p3963_p8 = pnand %p3962_p7, %p3956_p2 }
  0x23   : > { %3966 = shalt.err (!%p3963_p8)
}
  0x24   : > { %s4035_s30 = smov [#allocation2]   ;;  %413 = sbr.rel (%p4166_p10) target bundleno = 6300 (0x189c), region = 72 }
  0x25   : > { %3803 = dma.vmem_to_smem (!%p3801_p12), %s361_s23, 64, %s4035_s30, [#allocation4]  }
  0x2b   : > { %4012 = dma.done.wait (%p3808_p9), [#allocation4], 64  }
  0x2c   : > { %4014 = vsyncadd (%p3808_p9), [#allocation4], 4294967232 }
  0x2d   : > { %419 = sfence }
  0x2e   : > { %p463_p11 = scmp.lt.s32.totalorder %s4138_s29, 1  ;;  %v489_v0 = vld [vmem:[%s4952_s2] sm:$0xff]  ;;  %vm513_vm0 = vcmask 130048   ;;  %v4036_v1 = vmov 0   ;;  %v479_v3 = vld [vmem:[%s4953_s3 + $0x10] sm:$0xff]  ;;  %v478_v4 = vld [vmem:[%s4953_s3 + $0x8] sm:$0xff] }
  0x2f   : > { %3386 = vmatprep.mubr.msk.f32.mxu1 %vm513_vm0, %v489_v0  ;;  %3854 = vset.pattern.permute.xlu0 %v4036_v1  ;;  %v477_v2 = vld [vmem:[%s4953_s3] sm:$0xff]  ;;  %v480_v5 = vld [vmem:[%s4953_s3 + $0x18] sm:$0xff]  ;;  %v490_v16 = vld [vmem:[%s4952_s2 + $0x8] sm:$0xff]  ;;  %s4038_s23 = smov 127   ;;  %vm783_vm5 = vcmask 785408   ;;  %s3091_s24 = sld [smem:[#allocation2 + $0x1]] }
  0x30   : > { %s464_s20 = scalar_select %p463_p11, %s4138_s29, 1  ;;  %3855 = vset.pattern.permute.xlu1 %v4036_v1  ;;  %v491_v18 = vld [vmem:[%s4952_s2 + $0x10] sm:$0xff]  ;;  %v492_v19 = vld [vmem:[%s4952_s2 + $0x18] sm:$0xff]  ;;  %vm1001_vm14 = vcmask 261120  }
  0x31   : > { %s4983_s4 = sld [smem:[#allocation15_spill]]  ;;  %s4045_s27 = smov [#allocation5]  }
  0x32   : > { %s3267_s21 = sshll.u32 %s464_s20, 4  ;;  %s3268_s22 = sshll.u32 %s464_s20, 5 }
  0x33   : > { %s467_s17 = scalar_lea.vmem %s4950_s0, %s3267_s21  ;;  %s472_s16 = scalar_lea.vmem %s4951_s1, %s3268_s22 }
  0x34   : > { %v4207_v6 = vld [vmem:[%s467_s17] sm:$0xff]  ;;  %v4209_v7 = vld [vmem:[%s467_s17 + $0x8] sm:$0xff]  ;;  %v483_v11 = vld [vmem:[%s472_s16 + $0x10] sm:$0xff]  ;;  %s615_s17 = sld [smem:[#allocation2]]  ;;  %s4037_s22 = smov 1  }
  0x35   : > { %v481_v8 = vld [vmem:[%s472_s16] sm:$0xff]  ;;  %v3586_v9 = vpack.c.bf16 %v4209_v7, %v4207_v6  ;;  %v482_v12 = vld [vmem:[%s472_s16 + $0x8] sm:$0xff]  ;;  %v484_v13 = vld [vmem:[%s472_s16 + $0x18] sm:$0xff]  ;;  %v487_v14 = vadd.f32 %v483_v11, %v479_v3  ;;  %s3971_s28 = sshll.u32 %s4045_s27, 4  ;;  %s3972_s28 = int_to_ptr.vmem [resolvable:$false] %s3971_s28 }
  0x36   : > { %v485_v10 = vadd.f32 %v481_v8, %v477_v2  ;;  %v486_v15 = vadd.f32 %v482_v12, %v478_v4  ;;  %v488_v17 = vadd.f32 %v484_v13, %v480_v5  ;;  %v661_v11 = vld [vmem:[%s4955_s5] sm:$0xff]  ;;  %s3973_s14 = scalar_lea.vmem %s3972_s28, 512 }
  0x37   : > { %3587 = vmatprep.subr.bf16.mxu1 %v3586_v9  ;;  %505 = vperm.xlu1 %3855, %v487_v14  }
  0x38   : > { %495 = vperm.xlu0 %3854, %v485_v10   ;;  %3589 = vmatpush3.bf16.msra.mxu1 %v3586_v9  ;;  %v662_v10 = vld [vmem:[%s4955_s5 + $0x8] sm:$0xff] }
  0x3a   : > { %v616_v24 = vstv %s615_s17  ;;  %s3106_s17 = sld [smem:[#allocation2 + $0x80]] }
  0x3b   : > { %3387 = vmatmul.mubr.msk.f32.vlgmr.msra.gmra.mrb[0].mxu1 %vm513_vm0, %v490_v16  ;;  %510 = vperm.xlu1 %3855, %v488_v17   ;;  %v663_v16 = vld [vmem:[%s4955_s5 + $0x10] sm:$0xff] }
  0x3c   : > { %500 = vperm.xlu0 %3854, %v486_v15   ;;  %3389 = vmatprep.mubr.msk.f32.mxu1 %vm513_vm0, %v491_v18  ;;  %v664_v15 = vld [vmem:[%s4955_s5 + $0x18] sm:$0xff] }
  0x3f   : > { %3390 = vmatmul.mubr.msk.f32.gmra.mrb[2].mxu1 %vm513_vm0, %v492_v19 }
  0xb6   : > { %v506_v21 = vpop.permute.xlu1 %505 }
  0xb7   : > { %v496_v20 = vpop.permute.xlu0 %495 }
  0xba   : > { %v511_v28 = vpop.permute.xlu1 %510 }
  0xbb   : > { %v501_v22 = vpop.permute.xlu0 %500 }
 0x10e   : > { %v3388_v23 = vpop.f32.mrb[0].mxu1 }
 0x10f   : > { %v598_v25 = vadd.f32 %v3388_v23, %v501_v22  ;;  %v592_v26 = vpop.f32.mrb[1].mxu1  ;;  %v669_v22 = vld [vmem:[%s4956_s6] sm:$0xff] }
 0x110   : > { %v593_v27 = vadd.f32 %v592_v26, %v496_v20 }
 0x111   : > { %vm612_vm1 = vcmp.ge.f32.partialorder %v598_v25, 0.0  ;;  %v618_v29 = vmul.f32 %v616_v24, %v598_v25 }
 0x112   : > { %vm611_vm2 = vcmp.ge.f32.partialorder %v593_v27, 0.0  ;;  %v617_v30 = vmul.f32 %v616_v24, %v593_v27  ;;  %v3391_v31 = vpop.f32.mrb[2].mxu1 }
 0x113   : > { %v4225_v32 = vsel %vm612_vm1, %v598_v25, %v618_v29  ;;  %v608_v33 = vadd.f32 %v3391_v31, %v511_v28  ;;  %v602_v34 = vpop.f32.mrb[3].mxu1  ;;  %v671_v28 = vld [vmem:[%s4956_s6 + $0x10] sm:$0xff] }
 0x114   : > { %v4227_v35 = vsel %vm611_vm2, %v593_v27, %v617_v30  ;;  %v603_v36 = vadd.f32 %v602_v34, %v506_v21  ;;  %v640_v37 = vmul.f32 %v4225_v32, %v4225_v32  ;;  %v670_v21 = vld [vmem:[%s4956_s6 + $0x8] sm:$0xff]  ;;  %v672_v27 = vld [vmem:[%s4956_s6 + $0x18] sm:$0xff] }
 0x115   : > { %v639_v38 = vmul.f32 %v4227_v35, %v4227_v35  ;;  %vm614_vm3 = vcmp.ge.f32.partialorder %v608_v33, 0.0  ;;  %v620_v39 = vmul.f32 %v616_v24, %v608_v33  ;;  %v625_v41 = vadd.f32 %v4225_v32, %v4227_v35 }
 0x116   : > { %vm613_vm4 = vcmp.ge.f32.partialorder %v603_v36, 0.0  ;;  %v619_v40 = vmul.f32 %v616_v24, %v603_v36 }
 0x117   : > { %v4237_v43 = vsel %vm614_vm3, %v608_v33, %v620_v39  ;;  %v643_v46 = vadd.f32 %v640_v37, %v639_v38 }
 0x118   : > { %v4235_v42 = vsel %vm613_vm4, %v603_v36, %v619_v40  ;;  %v642_v48 = vmul.f32 %v4237_v43, %v4237_v43 }
 0x119   : > { %v626_v44 = vadd.f32 %v625_v41, %v4235_v42  ;;  %v641_v45 = vmul.f32 %v4235_v42, %v4235_v42 }
 0x11b   : > { %v627_v47 = vadd.f32 %v626_v44, %v4237_v43  ;;  %v644_v49 = vadd.f32 %v643_v46, %v641_v45 }
 0x11d   : > { %628 = vadd.xlane.f32.xlu0 %v627_v47  ;;  %v645_v50 = vadd.f32 %v644_v49, %v642_v48 }
 0x11f   : > { %646 = vadd.xlane.f32.xlu1 %v645_v50 }
 0x1aa   : > { %v629_v51 = vpop.xlane.xlu0 %628 }
 0x1ab   : > { %v630_v52 = vrot.slane %v629_v51, 4 }
 0x1ac   : > { %v647_v53 = vpop.xlane.xlu1 %646 }
 0x1ad   : > { %v631_v54 = vadd.f32 %v630_v52, %v629_v51  ;;  %v648_v55 = vrot.slane %v647_v53, 4 }
 0x1af   : > { %v649_v56 = vadd.f32 %v648_v55, %v647_v53  ;;  %v632_v57 = vrot.slane %v631_v54, 2  ;;  %v762_v55 = vld [vmem:[%s4958_s8 + $0x18] sm:$0xff] }
 0x1b1   : > { %v633_v58 = vadd.f32 %v632_v57, %v631_v54  ;;  %v650_v59 = vrot.slane %v649_v56, 2  ;;  %v755_v54 = vld [vmem:[%s4957_s7] sm:$0xff] }
 0x1b2   : > { %3416 = vmatprep.mubr.msk.f32.mxu1 %vm783_vm5, %v755_v54 }
 0x1b3   : > { %v634_v60 = vrot.slane %v633_v58, 1  ;;  %v651_v61 = vadd.f32 %v650_v59, %v649_v56  ;;  %v475_v56 = vlaneseq }
 0x1b5   : > { %v635_v62 = vadd.f32 %v634_v60, %v633_v58  ;;  %v652_v63 = vrot.slane %v651_v61, 1  ;;  %v4289_v57 = vand.u32 127, %v475_v56 }
 0x1b7   : > { %3762 = vpush %v635_v62  ;;  %v653_v0 = vadd.f32 %v652_v63, %v651_v61  ;;  %vm729_vm6 = vcmp.ge.s32.totalorder %v4289_v57, 1  ;;  %vm742_vm8 = vcmp.lt.s32.totalorder %v4289_v57, 127  ;;  %vm1346_vm4 = vcmp.ge.s32.totalorder %v4289_v57, 2 }
 0x1b8   : > { %vm3591_vm7 = vmpackc.low %vm729_vm6, %vm729_vm6 }
 0x1b9   : > { %3764 = vpush %v653_v0  ;;  %vm3611_vm9 = vmpackc.low %vm742_vm8, %vm742_vm8 }
 0x1ba   : > { %vm3635_vm6 = vmpackc.low %vm1346_vm4, %vm1346_vm4 }
 0x1e8   : > { %s3763_s19 = spop %3762 }
 0x1e9   : > { %v637_v1 = vstv %s3763_s19 }
 0x1ea   : > { %v638_v2 = vmul.f32 0.00024414063, %v637_v1  ;;  %s3765_s21 = spop %3764 }
 0x1eb   : > { %v655_v3 = vstv %s3765_s21 }
 0x1ec   : > { %v656_v4 = vmul.f32 0.00024414063, %v655_v3  ;;  %v657_v5 = vmul.f32 %v638_v2, %v638_v2 }
 0x1ee   : > { %v658_v8 = vsub.f32 %v656_v4, %v657_v5 }
 0x1f0   : > { %v659_v9 = vadd.f32 1e-05, %v658_v8 }
 0x1f2   : > { %3936 = vrsqrt.f32 %v659_v9 }
 0x1fc   : > { %v3937_v12 = vpop.eup %3936 }
 0x1fd   : > { %v666_v13 = vmul.f32 %v3937_v12, %v662_v10  ;;  %v665_v14 = vmul.f32 %v3937_v12, %v661_v11  ;;  %v668_v17 = vmul.f32 %v3937_v12, %v664_v15  ;;  %v667_v18 = vmul.f32 %v3937_v12, %v663_v16  ;;  %v756_v12 = vld [vmem:[%s4957_s7 + $0x8] sm:$0xff] }
 0x1ff   : > { %688 = vperm.xlu1 %3855, %v666_v13   ;;  %683 = vperm.xlu0 %3854, %v665_v14   ;;  %v674_v19 = vmul.f32 %v666_v13, %v638_v2  ;;  %v673_v20 = vmul.f32 %v665_v14, %v638_v2  ;;  %v676_v25 = vmul.f32 %v668_v17, %v638_v2  ;;  %v757_v13 = vld [vmem:[%s4957_s7 + $0x10] sm:$0xff]  ;;  %v758_v14 = vld [vmem:[%s4957_s7 + $0x18] sm:$0xff] }
 0x200   : > { %v675_v26 = vmul.f32 %v667_v18, %v638_v2 }
 0x201   : > { %v678_v23 = vsub.f32 %v670_v21, %v674_v19  ;;  %v677_v24 = vsub.f32 %v669_v22, %v673_v20  ;;  %v680_v29 = vsub.f32 %v672_v27, %v676_v25 }
 0x202   : > { %v679_v30 = vsub.f32 %v671_v28, %v675_v26 }
 0x203   : > { %698 = vperm.xlu1 %3855, %v668_v17   ;;  %693 = vperm.xlu0 %3854, %v667_v18   ;;  %v886_v18 = vstv %s3091_s24  ;;  %s3135_s24 = sld [smem:[#allocation2 + $0x81]] }
 0x207   : > { %712 = vperm.xlu1 %3855, %v678_v23   ;;  %707 = vperm.xlu0 %3854, %v677_v24  }
 0x20b   : > { %722 = vperm.xlu1 %3855, %v680_v29   ;;  %717 = vperm.xlu0 %3854, %v679_v30  }
 0x27e   : > { %v689_v31 = vpop.permute.xlu1 %688  ;;  %v684_v33 = vpop.permute.xlu0 %683 }
 0x27f   : > { %v702_v37 = vmul.f32 %v689_v31, %v4225_v32  ;;  %v701_v38 = vmul.f32 %v684_v33, %v4227_v35  ;;  %v759_v35 = vld [vmem:[%s4958_s8] sm:$0xff] }
 0x282   : > { %v699_v34 = vpop.permute.xlu1 %698  ;;  %v694_v36 = vpop.permute.xlu0 %693 }
 0x283   : > { %v704_v45 = vmul.f32 %v699_v34, %v4237_v43  ;;  %v703_v46 = vmul.f32 %v694_v36, %v4235_v42  ;;  %v761_v42 = vld [vmem:[%s4958_s8 + $0x10] sm:$0xff]  ;;  %v760_v43 = vld [vmem:[%s4958_s8 + $0x8] sm:$0xff] }
 0x286   : > { %v713_v39 = vpop.permute.xlu1 %712  ;;  %v708_v40 = vpop.permute.xlu0 %707 }
 0x287   : > { %v726_v41 = vadd.f32 %v713_v39, %v702_v37  ;;  %v725_v44 = vadd.f32 %v708_v40, %v701_v38 }
 0x289   : > { %v3856_v47 = vpack.i.bf16 %v726_v41, %v725_v44  ;;  %v3602_v48 = vpack.c.bf16 %v726_v41, %v725_v44 }
 0x28a   : > { %v723_v49 = vpop.permute.xlu1 %722  ;;  %v718_v50 = vpop.permute.xlu0 %717 }
 0x28b   : > { %v728_v51 = vadd.f32 %v723_v49, %v704_v45  ;;  %v727_v52 = vadd.f32 %v718_v50, %v703_v46  ;;  %3857 = vrot.lane.b32.xlu0 %v3856_v47, %s4037_s22 }
 0x28d   : > { %v3861_v53 = vpack.i.bf16 %v728_v51, %v727_v52  ;;  %v3606_v32 = vpack.c.bf16 %v728_v51, %v727_v52 }
 0x28f   : > { %3867 = vrot.lane.b32.xlu0 %v3856_v47, %s4038_s23  ;;  %3862 = vrot.lane.b32.xlu1 %v3861_v53, %s4037_s22  ;;  %s4039_s22 = smov 2  }
 0x293   : > { %765 = vperm.xlu0 %3854, %v759_v35   ;;  %3872 = vrot.lane.b32.xlu1 %v3861_v53, %s4038_s23  ;;  %s4040_s23 = smov 126  }
 0x297   : > { %775 = vperm.xlu0 %3854, %v761_v42   ;;  %770 = vperm.xlu1 %3855, %v760_v43  }
 0x29b   : > { %780 = vperm.xlu1 %3855, %v762_v55  }
 0x2fd   : > { %v3858_v58 = vpop.permute.xlu0 %3857 }
 0x2fe   : > { %v3860_v59 = vunpack.i.h.bf16 %v3858_v58  ;;  %v3859_v60 = vunpack.i.l.bf16 %v3858_v58 }
 0x300   : > { %v3590_v61 = vpack.c.bf16 %v3860_v59, %v3859_v60 }
 0x301   : > { %v3863_v62 = vpop.permute.xlu1 %3862  ;;  %v3868_v2 = vpop.permute.xlu0 %3867 }
 0x302   : > { %v3865_v63 = vunpack.i.h.bf16 %v3863_v62  ;;  %v3864_v0 = vunpack.i.l.bf16 %v3863_v62  ;;  %3592 = vmatprep.subr.msk.bf16.mxu1 %vm3591_vm7, %v3590_v61  ;;  %v3870_v3 = vunpack.i.h.bf16 %v3868_v2  ;;  %v3869_v4 = vunpack.i.l.bf16 %v3868_v2 }
 0x303   : > { %3595 = vmatpush3.bf16.msk.msra.mxu1 %vm3591_vm7, %v3590_v61 }
 0x304   : > { %v3596_v1 = vpack.c.bf16 %v3865_v63, %v3864_v0  ;;  %v3610_v8 = vpack.c.bf16 %v3870_v3, %v3869_v4  ;;  %v932_v4 = vld [vmem:[%s4959_s9 + $0x8] sm:$0xff] }
 0x305   : > { %v3873_v5 = vpop.permute.xlu1 %3872 }
 0x306   : > { %3598 = vmatprep.subr.msk.bf16.mxu1 %vm3591_vm7, %v3596_v1  ;;  %v3875_v9 = vunpack.i.h.bf16 %v3873_v5  ;;  %v3874_v10 = vunpack.i.l.bf16 %v3873_v5  ;;  %v931_v5 = vld [vmem:[%s4959_s9] sm:$0xff] }
 0x307   : > { %3601 = vmatpush3.bf16.msk.msra.mxu1 %vm3591_vm7, %v3596_v1  ;;  %vm1359_vm7 = vcmp.lt.s32.totalorder %v4289_v57, 126 }
 0x308   : > { %3603 = vmatprep.subr.bf16.mxu1 %v3602_v48  ;;  %v3616_v11 = vpack.c.bf16 %v3875_v9, %v3874_v10  ;;  %vm3655_vm8 = vmpackc.low %vm1359_vm7, %vm1359_vm7 }
 0x30b   : > { %3605 = vmatpush3.bf16.msra.mxu1 %v3602_v48 }
 0x30c   : > { %3607 = vmatprep.subr.bf16.mxu1 %v3606_v32 }
 0x30f   : > { %3609 = vmatpush3.bf16.msra.mxu1 %v3606_v32 }
 0x310   : > { %3612 = vmatprep.subr.msk.bf16.mxu1 %vm3611_vm9, %v3610_v8 }
 0x312   : > { %v766_v16 = vpop.permute.xlu0 %765 }
 0x313   : > { %3615 = vmatpush3.bf16.msk.msra.mxu1 %vm3611_vm9, %v3610_v8 }
 0x314   : > { %3618 = vmatprep.subr.msk.bf16.mxu1 %vm3611_vm9, %v3616_v11 }
 0x316   : > { %v771_v15 = vpop.permute.xlu1 %770  ;;  %v776_v26 = vpop.permute.xlu0 %775 }
 0x317   : > { %3621 = vmatpush3.bf16.msk.msra.mxu1 %vm3611_vm9, %v3616_v11  ;;  %v934_v11 = vld [vmem:[%s4959_s9 + $0x18] sm:$0xff] }
 0x31a   : > { %3417 = vmatmul.mubr.msk.f32.vlgmr.msra.gmra.mrb[4].mxu1 %vm783_vm5, %v756_v12  ;;  %v781_v23 = vpop.permute.xlu1 %780  ;;  %v933_v12 = vld [vmem:[%s4959_s9 + $0x10] sm:$0xff] }
 0x31b   : > { %3419 = vmatprep.mubr.msk.f32.mxu1 %vm783_vm5, %v757_v13 }
 0x31e   : > { %3420 = vmatmul.mubr.msk.f32.gmra.mrb[6].mxu1 %vm783_vm5, %v758_v14 }
 0x3ed   : > { %v3418_v17 = vpop.f32.mrb[4].mxu1 }
 0x3ee   : > { %v868_v19 = vadd.f32 %v3418_v17, %v771_v15  ;;  %v862_v20 = vpop.f32.mrb[5].mxu1  ;;  %v940_v17 = vld [vmem:[%s4960_s10 + $0x8] sm:$0xff] }
 0x3ef   : > { %v863_v21 = vadd.f32 %v862_v20, %v766_v16 }
 0x3f0   : > { %vm882_vm10 = vcmp.ge.f32.partialorder %v868_v19, 0.0  ;;  %v888_v22 = vmul.f32 %v886_v18, %v868_v19 }
 0x3f1   : > { %vm881_vm11 = vcmp.ge.f32.partialorder %v863_v21, 0.0  ;;  %v887_v24 = vmul.f32 %v886_v18, %v863_v21  ;;  %v3421_v25 = vpop.f32.mrb[6].mxu1 }
 0x3f2   : > { %v4305_v27 = vsel %vm882_vm10, %v868_v19, %v888_v22  ;;  %v878_v28 = vadd.f32 %v3421_v25, %v781_v23  ;;  %v872_v29 = vpop.f32.mrb[7].mxu1  ;;  %v942_v23 = vld [vmem:[%s4960_s10 + $0x18] sm:$0xff] }
 0x3f3   : > { %v4307_v30 = vsel %vm881_vm11, %v863_v21, %v887_v24  ;;  %v873_v31 = vadd.f32 %v872_v29, %v776_v26  ;;  %v910_v33 = vmul.f32 %v4305_v27, %v4305_v27  ;;  %v941_v24 = vld [vmem:[%s4960_s10 + $0x10] sm:$0xff]  ;;  %v1085_v29 = vld [vmem:[%s4962_s12] sm:$0xff] }
 0x3f4   : > { %v909_v34 = vmul.f32 %v4307_v30, %v4307_v30  ;;  %vm884_vm12 = vcmp.ge.f32.partialorder %v878_v28, 0.0  ;;  %v890_v36 = vmul.f32 %v886_v18, %v878_v28  ;;  %v895_v38 = vadd.f32 %v4305_v27, %v4307_v30 }
 0x3f5   : > { %vm883_vm13 = vcmp.ge.f32.partialorder %v873_v31, 0.0  ;;  %v889_v37 = vmul.f32 %v886_v18, %v873_v31  ;;  %v939_v18 = vld [vmem:[%s4960_s10] sm:$0xff] }
 0x3f6   : > { %v4317_v40 = vsel %vm884_vm12, %v878_v28, %v890_v36  ;;  %v913_v45 = vadd.f32 %v910_v33, %v909_v34  ;;  %v1086_v28 = vld [vmem:[%s4962_s12 + $0x8] sm:$0xff]  ;;  %v3094_v33 = vld [vmem:[%s4953_s3 + $0x20] sm:$0xff]  ;;  %v3097_v36 = vld [vmem:[%s4953_s3 + $0x38] sm:$0xff] }
 0x3f7   : > { %v4315_v39 = vsel %vm883_vm13, %v873_v31, %v889_v37  ;;  %v912_v47 = vmul.f32 %v4317_v40, %v4317_v40  ;;  %v3095_v31 = vld [vmem:[%s4953_s3 + $0x28] sm:$0xff]  ;;  %v999_v34 = vld [vmem:[%s4961_s11] sm:$0xff]  ;;  %v3096_v37 = vld [vmem:[%s4953_s3 + $0x30] sm:$0xff] }
 0x3f8   : > { %v896_v41 = vadd.f32 %v895_v38, %v4315_v39  ;;  %v911_v44 = vmul.f32 %v4315_v39, %v4315_v39  ;;  %3430 = vmatprep.mubr.msk.f32.mxu0 %vm1001_vm14, %v999_v34 }
 0x3fa   : > { %v897_v46 = vadd.f32 %v896_v41, %v4317_v40  ;;  %v914_v48 = vadd.f32 %v913_v45, %v911_v44 }
 0x3fc   : > { %898 = vadd.xlane.f32.xlu0 %v897_v46  ;;  %v915_v49 = vadd.f32 %v914_v48, %v912_v47 }
 0x3fe   : > { %916 = vadd.xlane.f32.xlu1 %v915_v49 }
 0x489   : > { %v899_v50 = vpop.xlane.xlu0 %898 }
 0x48a   : > { %v900_v51 = vrot.slane %v899_v50, 4 }
 0x48b   : > { %v917_v52 = vpop.xlane.xlu1 %916 }
 0x48c   : > { %v901_v53 = vadd.f32 %v900_v51, %v899_v50  ;;  %v918_v32 = vrot.slane %v917_v52, 4 }
 0x48e   : > { %v919_v35 = vadd.f32 %v918_v32, %v917_v52  ;;  %v902_v42 = vrot.slane %v901_v53, 2 }
 0x490   : > { %v903_v43 = vadd.f32 %v902_v42, %v901_v53  ;;  %v920_v54 = vrot.slane %v919_v35, 2 }
 0x492   : > { %v904_v55 = vrot.slane %v903_v43, 1  ;;  %v921_v56 = vadd.f32 %v920_v54, %v919_v35 }
 0x494   : > { %v905_v58 = vadd.f32 %v904_v55, %v903_v43  ;;  %v922_v59 = vrot.slane %v921_v56, 1 }
 0x496   : > { %3766 = vpush %v905_v58  ;;  %v923_v60 = vadd.f32 %v922_v59, %v921_v56 }
 0x498   : > { %3768 = vpush %v923_v60 }
 0x4c7   : > { %s3767_s30 = spop %3766 }
 0x4c8   : > { %v907_v61 = vstv %s3767_s30 }
 0x4c9   : > { %v908_v62 = vmul.f32 0.00024414063, %v907_v61  ;;  %s3769_s15 = spop %3768 }
 0x4ca   : > { %v925_v63 = vstv %s3769_s15 }
 0x4cb   : > { %v926_v0 = vmul.f32 0.00024414063, %v925_v63  ;;  %v927_v1 = vmul.f32 %v908_v62, %v908_v62 }
 0x4cd   : > { %v928_v2 = vsub.f32 %v926_v0, %v927_v1  ;;  %v3099_v0 = vld [vmem:[%s4952_s2 + $0x28] sm:$0xff] }
 0x4cf   : > { %v929_v3 = vadd.f32 1e-05, %v928_v2 }
 0x4d1   : > { %3938 = vrsqrt.f32 %v929_v3 }
 0x4db   : > { %v3939_v8 = vpop.eup %3938 }
 0x4dc   : > { %v936_v9 = vmul.f32 %v3939_v8, %v932_v4  ;;  %v935_v10 = vmul.f32 %v3939_v8, %v931_v5  ;;  %v938_v13 = vmul.f32 %v3939_v8, %v934_v11  ;;  %v937_v14 = vmul.f32 %v3939_v8, %v933_v12 }
 0x4dd   : > { %v1231_v4 = vstv %s3106_s17  ;;  %s3162_s17 = sld [smem:[#allocation2 + $0x100]] }
 0x4de   : > { %958 = vperm.xlu1 %3855, %v936_v9   ;;  %953 = vperm.xlu0 %3854, %v935_v10   ;;  %v944_v15 = vmul.f32 %v936_v9, %v908_v62  ;;  %v943_v16 = vmul.f32 %v935_v10, %v908_v62  ;;  %v946_v21 = vmul.f32 %v938_v13, %v908_v62 }
 0x4df   : > { %v945_v22 = vmul.f32 %v937_v14, %v908_v62 }
 0x4e0   : > { %v948_v19 = vsub.f32 %v940_v17, %v944_v15  ;;  %v947_v20 = vsub.f32 %v939_v18, %v943_v16  ;;  %v950_v25 = vsub.f32 %v942_v23, %v946_v21 }
 0x4e1   : > { %v949_v26 = vsub.f32 %v941_v24, %v945_v22 }
 0x4e2   : > { %968 = vperm.xlu1 %3855, %v938_v13   ;;  %963 = vperm.xlu0 %3854, %v937_v14  }
 0x4e6   : > { %982 = vperm.xlu1 %3855, %v948_v19   ;;  %977 = vperm.xlu0 %3854, %v947_v20  }
 0x4ea   : > { %992 = vperm.xlu1 %3855, %v950_v25   ;;  %987 = vperm.xlu0 %3854, %v949_v26  }
 0x4ee   : > { %1094 = vperm.xlu1 %3855, %v1086_v28   ;;  %1089 = vperm.xlu0 %3854, %v1085_v29  }
 0x4f2   : > { %1116 = vperm.xlu1 %3855, %v3095_v31   ;;  %1111 = vperm.xlu0 %3854, %v3094_v33  }
 0x4f6   : > { %1126 = vperm.xlu1 %3855, %v3097_v36   ;;  %1121 = vperm.xlu0 %3854, %v3096_v37  }
 0x55d   : > { %v959_v38 = vpop.permute.xlu1 %958  ;;  %v954_v41 = vpop.permute.xlu0 %953 }
 0x55e   : > { %v972_v46 = vmul.f32 %v959_v38, %v4305_v27  ;;  %v971_v47 = vmul.f32 %v954_v41, %v4307_v30  ;;  %v1000_v27 = vld [vmem:[%s4961_s11 + $0x8] sm:$0xff]  ;;  %v3098_v30 = vld [vmem:[%s4952_s2 + $0x20] sm:$0xff] }
 0x561   : > { %v969_v44 = vpop.permute.xlu1 %968  ;;  %v964_v45 = vpop.permute.xlu0 %963 }
 0x562   : > { %v974_v52 = vmul.f32 %v969_v44, %v4317_v40  ;;  %v973_v53 = vmul.f32 %v964_v45, %v4315_v39 }
 0x565   : > { %v983_v48 = vpop.permute.xlu1 %982  ;;  %v978_v49 = vpop.permute.xlu0 %977 }
 0x566   : > { %v996_v50 = vadd.f32 %v983_v48, %v972_v46  ;;  %v995_v51 = vadd.f32 %v978_v49, %v971_v47 }
 0x568   : > { %v3622_v32 = vpack.c.bf16 %v996_v50, %v995_v51 }
 0x569   : > { %v993_v35 = vpop.permute.xlu1 %992  ;;  %v988_v42 = vpop.permute.xlu0 %987 }
 0x56a   : > { %v998_v43 = vadd.f32 %v993_v35, %v974_v52  ;;  %v997_v54 = vadd.f32 %v988_v42, %v973_v53  ;;  %3623 = vmatprep.subr.bf16.mxu0 %v3622_v32 }
 0x56b   : > { %3625 = vmatpush3.bf16.msra.mxu0 %v3622_v32 }
 0x56c   : > { %v3626_v55 = vpack.c.bf16 %v998_v43, %v997_v54 }
 0x56d   : > { %v1095_v58 = vpop.permute.xlu1 %1094  ;;  %v1090_v60 = vpop.permute.xlu0 %1089 }
 0x56e   : > { %3627 = vmatprep.subr.bf16.mxu0 %v3626_v55 }
 0x56f   : > { %3629 = vmatpush3.bf16.msra.mxu0 %v3626_v55 }
 0x571   : > { %v1117_v1 = vpop.permute.xlu1 %1116  ;;  %v1112_v2 = vpop.permute.xlu0 %1111 }
 0x572   : > { %3431 = vmatmul.mubr.msk.f32.vlgmr.msra.gmra.mrb[0].mxu0 %vm1001_vm14, %v1000_v27 }
 0x573   : > { %3437 = vmatprep.mubr.msk.f32.mxu0 %vm513_vm0, %v3098_v30 }
 0x575   : > { %v1127_v11 = vpop.permute.xlu1 %1126  ;;  %v1122_v14 = vpop.permute.xlu0 %1121 }
 0x645   : > { %v3432_v39 = vpop.f32.mrb[0].mxu0 }
 0x646   : > { %v1084_v40 = vadd.f32 %v3432_v39, %v4209_v7  ;;  %v1074_v56 = vpop.f32.mrb[1].mxu0  ;;  %v3100_v7 = vld [vmem:[%s4952_s2 + $0x30] sm:$0xff] }
 0x647   : > { %v1083_v59 = vadd.f32 %v1074_v56, %v4207_v6  ;;  %v3101_v6 = vld [vmem:[%s4952_s2 + $0x38] sm:$0xff]  ;;  %v3107_v56 = vld [vmem:[%s4955_s5 + $0x20] sm:$0xff] }
 0x648   : > { %v4385_v61 = vadd.f32 %v1095_v58, %v1084_v40  ;;  %v3108_v40 = vld [vmem:[%s4955_s5 + $0x28] sm:$0xff] }
 0x649   : > { %v4387_v62 = vadd.f32 %v1090_v60, %v1083_v59 }
 0x64b   : > { %v3630_v63 = vpack.c.bf16 %v4385_v61, %v4387_v62 }
 0x64d   : > { %3631 = vmatprep.subr.bf16.mxu0 %v3630_v63 }
 0x64e   : > { %3633 = vmatpush3.bf16.msra.mxu0 %v3630_v63  ;;  %v3110_v63 = vld [vmem:[%s4955_s5 + $0x38] sm:$0xff] }
 0x651   : > { %3438 = vmatmul.mubr.msk.f32.vlgmr.msra.gmra.mrb[2].mxu0 %vm513_vm0, %v3099_v0  ;;  %v3109_v0 = vld [vmem:[%s4955_s5 + $0x30] sm:$0xff] }
 0x652   : > { %3440 = vmatprep.mubr.msk.f32.mxu0 %vm513_vm0, %v3100_v7 }
 0x655   : > { %3441 = vmatmul.mubr.msk.f32.gmra.mrb[4].mxu0 %vm513_vm0, %v3101_v6 }
 0x724   : > { %v3439_v3 = vpop.f32.mrb[2].mxu0 }
 0x725   : > { %v1213_v5 = vadd.f32 %v3439_v3, %v1117_v1  ;;  %v1207_v8 = vpop.f32.mrb[3].mxu0  ;;  %v3112_v3 = vld [vmem:[%s4956_s6 + $0x28] sm:$0xff] }
 0x726   : > { %v1208_v9 = vadd.f32 %v1207_v8, %v1112_v2 }
 0x727   : > { %vm1227_vm15 = vcmp.ge.f32.partialorder %v1213_v5, 0.0  ;;  %v1233_v10 = vmul.f32 %v1231_v4, %v1213_v5 }
 0x728   : > { %vm1226_vm1 = vcmp.ge.f32.partialorder %v1208_v9, 0.0  ;;  %v1232_v12 = vmul.f32 %v1231_v4, %v1208_v9  ;;  %v3442_v13 = vpop.f32.mrb[4].mxu0 }
 0x729   : > { %v4403_v15 = vsel %vm1227_vm15, %v1213_v5, %v1233_v10  ;;  %v1223_v16 = vadd.f32 %v3442_v13, %v1127_v11  ;;  %v1217_v17 = vpop.f32.mrb[5].mxu0  ;;  %v3114_v11 = vld [vmem:[%s4956_s6 + $0x38] sm:$0xff] }
 0x72a   : > { %v4405_v18 = vsel %vm1226_vm1, %v1208_v9, %v1232_v12  ;;  %v1218_v19 = vadd.f32 %v1217_v17, %v1122_v14  ;;  %v1255_v20 = vmul.f32 %v4403_v15, %v4403_v15  ;;  %v3113_v12 = vld [vmem:[%s4956_s6 + $0x30] sm:$0xff] }
 0x72b   : > { %v1254_v21 = vmul.f32 %v4405_v18, %v4405_v18  ;;  %vm1229_vm2 = vcmp.ge.f32.partialorder %v1223_v16, 0.0  ;;  %v1235_v22 = vmul.f32 %v1231_v4, %v1223_v16  ;;  %v1240_v24 = vadd.f32 %v4403_v15, %v4405_v18 }
 0x72c   : > { %vm1228_vm3 = vcmp.ge.f32.partialorder %v1218_v19, 0.0  ;;  %v1234_v23 = vmul.f32 %v1231_v4, %v1218_v19  ;;  %v3111_v4 = vld [vmem:[%s4956_s6 + $0x20] sm:$0xff] }
 0x72d   : > { %v4415_v26 = vsel %vm1229_vm2, %v1223_v16, %v1235_v22  ;;  %v1258_v31 = vadd.f32 %v1255_v20, %v1254_v21 }
 0x72e   : > { %v4413_v25 = vsel %vm1228_vm3, %v1218_v19, %v1234_v23  ;;  %v1257_v34 = vmul.f32 %v4415_v26, %v4415_v26  ;;  %vm1967_vm3 = vcmp.ge.s32.totalorder %v4289_v57, 4 }
 0x72f   : > { %v1241_v28 = vadd.f32 %v1240_v24, %v4413_v25  ;;  %v1256_v29 = vmul.f32 %v4413_v25, %v4413_v25  ;;  %vm3679_vm4 = vmpackc.low %vm1967_vm3, %vm1967_vm3  ;;  %vm2601_vm3 = vcmp.lt.s32.totalorder %v4289_v57, 120 }
 0x731   : > { %v1242_v33 = vadd.f32 %v1241_v28, %v4415_v26  ;;  %v1259_v36 = vadd.f32 %v1258_v31, %v1256_v29 }
 0x733   : > { %1243 = vadd.xlane.f32.xlu0 %v1242_v33  ;;  %v1260_v37 = vadd.f32 %v1259_v36, %v1257_v34 }
 0x735   : > { %1261 = vadd.xlane.f32.xlu1 %v1260_v37 }
 0x7c0   : > { %v1244_v38 = vpop.xlane.xlu0 %1243 }
 0x7c1   : > { %v1245_v41 = vrot.slane %v1244_v38, 4 }
 0x7c2   : > { %v1262_v44 = vpop.xlane.xlu1 %1261 }
 0x7c3   : > { %v1246_v45 = vadd.f32 %v1245_v41, %v1244_v38  ;;  %v1263_v46 = vrot.slane %v1262_v44, 4 }
 0x7c5   : > { %v1247_v47 = vrot.slane %v1246_v45, 2  ;;  %v1264_v48 = vadd.f32 %v1263_v46, %v1262_v44  ;;  %v3115_v46 = vld [vmem:[%s4957_s7 + $0x20] sm:$0xff] }
 0x7c6   : > { %3467 = vmatprep.mubr.msk.f32.mxu0 %vm783_vm5, %v3115_v46 }
 0x7c7   : > { %v1265_v49 = vrot.slane %v1264_v48, 2  ;;  %v1248_v50 = vadd.f32 %v1247_v47, %v1246_v45  ;;  %v3122_v47 = vld [vmem:[%s4958_s8 + $0x38] sm:$0xff] }
 0x7c9   : > { %v1249_v51 = vrot.slane %v1248_v50, 1  ;;  %v1266_v52 = vadd.f32 %v1265_v49, %v1264_v48 }
 0x7cb   : > { %v1250_v53 = vadd.f32 %v1249_v51, %v1248_v50  ;;  %v1267_v32 = vrot.slane %v1266_v52, 1 }
 0x7cd   : > { %3770 = vpush %v1250_v53  ;;  %v1268_v35 = vadd.f32 %v1267_v32, %v1266_v52 }
 0x7cf   : > { %3772 = vpush %v1268_v35 }
 0x7fe   : > { %s3771_s19 = spop %3770 }
 0x7ff   : > { %v1252_v42 = vstv %s3771_s19 }
 0x800   : > { %v1253_v43 = vmul.f32 0.00024414063, %v1252_v42  ;;  %s3773_s21 = spop %3772 }
 0x801   : > { %v1270_v54 = vstv %s3773_s21 }
 0x802   : > { %v1271_v55 = vmul.f32 0.00024414063, %v1270_v54  ;;  %v1272_v27 = vmul.f32 %v1253_v43, %v1253_v43 }
 0x804   : > { %v1273_v30 = vsub.f32 %v1271_v55, %v1272_v27 }
 0x806   : > { %v1274_v39 = vadd.f32 1e-05, %v1273_v30 }
 0x808   : > { %3940 = vrsqrt.f32 %v1274_v39 }
 0x812   : > { %v3941_v58 = vpop.eup %3940 }
 0x813   : > { %v1282_v59 = vmul.f32 %v3941_v58, %v3108_v40  ;;  %v1281_v60 = vmul.f32 %v3941_v58, %v3107_v56  ;;  %v1284_v7 = vmul.f32 %v3941_v58, %v3110_v63  ;;  %v1283_v6 = vmul.f32 %v3941_v58, %v3109_v0  ;;  %v3116_v56 = vld [vmem:[%s4957_s7 + $0x28] sm:$0xff]  ;;  %v3117_v58 = vld [vmem:[%s4957_s7 + $0x30] sm:$0xff] }
 0x815   : > { %1305 = vperm.xlu1 %3855, %v1282_v59   ;;  %1300 = vperm.xlu0 %3854, %v1281_v60   ;;  %v1291_v1 = vmul.f32 %v1282_v59, %v1253_v43  ;;  %v1290_v2 = vmul.f32 %v1281_v60, %v1253_v43  ;;  %v1293_v9 = vmul.f32 %v1284_v7, %v1253_v43  ;;  %v3118_v59 = vld [vmem:[%s4957_s7 + $0x38] sm:$0xff] }
 0x816   : > { %v1292_v10 = vmul.f32 %v1283_v6, %v1253_v43 }
 0x817   : > { %v1295_v5 = vsub.f32 %v3112_v3, %v1291_v1  ;;  %v1294_v8 = vsub.f32 %v3111_v4, %v1290_v2  ;;  %v1297_v13 = vsub.f32 %v3114_v11, %v1293_v9 }
 0x818   : > { %v1296_v14 = vsub.f32 %v3113_v12, %v1292_v10 }
 0x819   : > { %1315 = vperm.xlu1 %3855, %v1284_v7   ;;  %1310 = vperm.xlu0 %3854, %v1283_v6   ;;  %v1504_v7 = vstv %s3135_s24  ;;  %s3191_s24 = sld [smem:[#allocation2 + $0x101]] }
 0x81d   : > { %1329 = vperm.xlu1 %3855, %v1295_v5   ;;  %1324 = vperm.xlu0 %3854, %v1294_v8  }
 0x821   : > { %1339 = vperm.xlu1 %3855, %v1297_v13   ;;  %1334 = vperm.xlu0 %3854, %v1296_v14  }
 0x894   : > { %v1306_v16 = vpop.permute.xlu1 %1305  ;;  %v1301_v17 = vpop.permute.xlu0 %1300 }
 0x895   : > { %v1319_v21 = vmul.f32 %v1306_v16, %v4403_v15  ;;  %v1318_v22 = vmul.f32 %v1301_v17, %v4405_v18  ;;  %v3119_v18 = vld [vmem:[%s4958_s8 + $0x20] sm:$0xff] }
 0x898   : > { %v1316_v19 = vpop.permute.xlu1 %1315  ;;  %v1311_v20 = vpop.permute.xlu0 %1310 }
 0x899   : > { %v1321_v31 = vmul.f32 %v1316_v19, %v4415_v26  ;;  %v1320_v33 = vmul.f32 %v1311_v20, %v4413_v25  ;;  %v3121_v25 = vld [vmem:[%s4958_s8 + $0x30] sm:$0xff]  ;;  %v3120_v26 = vld [vmem:[%s4958_s8 + $0x28] sm:$0xff] }
 0x89c   : > { %v1330_v23 = vpop.permute.xlu1 %1329  ;;  %v1325_v24 = vpop.permute.xlu0 %1324 }
 0x89d   : > { %v1343_v28 = vadd.f32 %v1330_v23, %v1319_v21  ;;  %v1342_v29 = vadd.f32 %v1325_v24, %v1318_v22 }
 0x89f   : > { %v3876_v34 = vpack.i.bf16 %v1343_v28, %v1342_v29  ;;  %v3646_v36 = vpack.c.bf16 %v1343_v28, %v1342_v29 }
 0x8a0   : > { %v1340_v37 = vpop.permute.xlu1 %1339  ;;  %v1335_v38 = vpop.permute.xlu0 %1334 }
 0x8a1   : > { %v1345_v41 = vadd.f32 %v1340_v37, %v1321_v31  ;;  %v1344_v44 = vadd.f32 %v1335_v38, %v1320_v33  ;;  %3877 = vrot.lane.b32.xlu0 %v3876_v34, %s4039_s22 }
 0x8a3   : > { %v3881_v45 = vpack.i.bf16 %v1345_v41, %v1344_v44  ;;  %v3650_v15 = vpack.c.bf16 %v1345_v41, %v1344_v44 }
 0x8a5   : > { %3887 = vrot.lane.b32.xlu0 %v3876_v34, %s4040_s23  ;;  %3882 = vrot.lane.b32.xlu1 %v3881_v45, %s4039_s22  ;;  %s4041_s22 = smov 4  }
 0x8a9   : > { %1384 = vperm.xlu0 %3854, %v3119_v18   ;;  %3892 = vrot.lane.b32.xlu1 %v3881_v45, %s4040_s23  ;;  %s4042_s23 = smov 124  }
 0x8ad   : > { %1394 = vperm.xlu0 %3854, %v3121_v25   ;;  %1389 = vperm.xlu1 %3855, %v3120_v26  }
 0x8b1   : > { %1399 = vperm.xlu1 %3855, %v3122_v47  }
 0x913   : > { %v3878_v48 = vpop.permute.xlu0 %3877 }
 0x914   : > { %v3880_v49 = vunpack.i.h.bf16 %v3878_v48  ;;  %v3879_v50 = vunpack.i.l.bf16 %v3878_v48 }
 0x916   : > { %v3634_v51 = vpack.c.bf16 %v3880_v49, %v3879_v50 }
 0x917   : > { %v3883_v52 = vpop.permute.xlu1 %3882  ;;  %v3888_v42 = vpop.permute.xlu0 %3887 }
 0x918   : > { %v3885_v53 = vunpack.i.h.bf16 %v3883_v52  ;;  %v3884_v32 = vunpack.i.l.bf16 %v3883_v52  ;;  %3636 = vmatprep.subr.msk.bf16.mxu0 %vm3635_vm6, %v3634_v51  ;;  %v3890_v43 = vunpack.i.h.bf16 %v3888_v42  ;;  %v3889_v54 = vunpack.i.l.bf16 %v3888_v42 }
 0x919   : > { %3639 = vmatpush3.bf16.msk.msra.mxu0 %vm3635_vm6, %v3634_v51 }
 0x91a   : > { %v3640_v35 = vpack.c.bf16 %v3885_v53, %v3884_v32  ;;  %v3654_v27 = vpack.c.bf16 %v3890_v43, %v3889_v54  ;;  %v3137_v54 = vld [vmem:[%s4959_s9 + $0x28] sm:$0xff] }
 0x91b   : > { %v3893_v55 = vpop.permute.xlu1 %3892 }
 0x91c   : > { %3642 = vmatprep.subr.msk.bf16.mxu0 %vm3635_vm6, %v3640_v35  ;;  %v3895_v30 = vunpack.i.h.bf16 %v3893_v55  ;;  %v3894_v39 = vunpack.i.l.bf16 %v3893_v55  ;;  %v3136_v55 = vld [vmem:[%s4959_s9 + $0x20] sm:$0xff] }
 0x91d   : > { %3645 = vmatpush3.bf16.msk.msra.mxu0 %vm3635_vm6, %v3640_v35  ;;  %vm1980_vm6 = vcmp.lt.s32.totalorder %v4289_v57, 124 }
 0x91e   : > { %3647 = vmatprep.subr.bf16.mxu0 %v3646_v36  ;;  %v3660_v40 = vpack.c.bf16 %v3895_v30, %v3894_v39  ;;  %vm3699_vm7 = vmpackc.low %vm1980_vm6, %vm1980_vm6 }
 0x921   : > { %3649 = vmatpush3.bf16.msra.mxu0 %v3646_v36 }
 0x922   : > { %3651 = vmatprep.subr.bf16.mxu0 %v3650_v15 }
 0x925   : > { %3653 = vmatpush3.bf16.msra.mxu0 %v3650_v15 }
 0x926   : > { %3656 = vmatprep.subr.msk.bf16.mxu0 %vm3655_vm8, %v3654_v27 }
 0x928   : > { %v1385_v63 = vpop.permute.xlu0 %1384 }
 0x929   : > { %3659 = vmatpush3.bf16.msk.msra.mxu0 %vm3655_vm8, %v3654_v27 }
 0x92a   : > { %3662 = vmatprep.subr.msk.bf16.mxu0 %vm3655_vm8, %v3660_v40 }
 0x92c   : > { %v1390_v60 = vpop.permute.xlu1 %1389  ;;  %v1395_v9 = vpop.permute.xlu0 %1394 }
 0x92d   : > { %3665 = vmatpush3.bf16.msk.msra.mxu0 %vm3655_vm8, %v3660_v40  ;;  %v3139_v40 = vld [vmem:[%s4959_s9 + $0x38] sm:$0xff] }
 0x930   : > { %3468 = vmatmul.mubr.msk.f32.vlgmr.msra.gmra.mrb[6].mxu0 %vm783_vm5, %v3116_v56  ;;  %v1400_v4 = vpop.permute.xlu1 %1399  ;;  %v3138_v56 = vld [vmem:[%s4959_s9 + $0x30] sm:$0xff] }
 0x931   : > { %3470 = vmatprep.mubr.msk.f32.mxu0 %vm783_vm5, %v3117_v58 }
 0x934   : > { %3471 = vmatmul.mubr.msk.f32.gmra.mrb[8].mxu0 %vm783_vm5, %v3118_v59 }
 0xa03   : > { %v3469_v0 = vpop.f32.mrb[6].mxu0 }
 0xa04   : > { %v1486_v6 = vadd.f32 %v3469_v0, %v1390_v60  ;;  %v1480_v1 = vpop.f32.mrb[7].mxu0  ;;  %v3141_v0 = vld [vmem:[%s4960_s10 + $0x28] sm:$0xff] }
 0xa05   : > { %v1481_v2 = vadd.f32 %v1480_v1, %v1385_v63 }
 0xa06   : > { %vm1500_vm9 = vcmp.ge.f32.partialorder %v1486_v6, 0.0  ;;  %v1506_v3 = vmul.f32 %v1504_v7, %v1486_v6 }
 0xa07   : > { %vm1499_vm10 = vcmp.ge.f32.partialorder %v1481_v2, 0.0  ;;  %v1505_v5 = vmul.f32 %v1504_v7, %v1481_v2  ;;  %v3472_v8 = vpop.f32.mrb[8].mxu0 }
 0xa08   : > { %v4481_v10 = vsel %vm1500_vm9, %v1486_v6, %v1506_v3  ;;  %v1496_v11 = vadd.f32 %v3472_v8, %v1400_v4  ;;  %v1490_v12 = vpop.f32.mrb[9].mxu0  ;;  %v3143_v4 = vld [vmem:[%s4960_s10 + $0x38] sm:$0xff] }
 0xa09   : > { %v4483_v13 = vsel %vm1499_vm10, %v1481_v2, %v1505_v5  ;;  %v1491_v14 = vadd.f32 %v1490_v12, %v1395_v9  ;;  %v1528_v16 = vmul.f32 %v4481_v10, %v4481_v10  ;;  %v3142_v5 = vld [vmem:[%s4960_s10 + $0x30] sm:$0xff] }
 0xa0a   : > { %v1527_v17 = vmul.f32 %v4483_v13, %v4483_v13  ;;  %vm1502_vm11 = vcmp.ge.f32.partialorder %v1496_v11, 0.0  ;;  %v1508_v19 = vmul.f32 %v1504_v7, %v1496_v11  ;;  %v1513_v21 = vadd.f32 %v4481_v10, %v4483_v13  ;;  %v3148_v12 = vld [vmem:[%s4962_s12 + $0x10] sm:$0xff] }
 0xa0b   : > { %vm1501_vm12 = vcmp.ge.f32.partialorder %v1491_v14, 0.0  ;;  %v1507_v20 = vmul.f32 %v1504_v7, %v1491_v14  ;;  %v3140_v7 = vld [vmem:[%s4960_s10 + $0x20] sm:$0xff] }
 0xa0c   : > { %v4493_v23 = vsel %vm1502_vm11, %v1496_v11, %v1508_v19  ;;  %v1531_v29 = vadd.f32 %v1528_v16, %v1527_v17  ;;  %v3149_v11 = vld [vmem:[%s4962_s12 + $0x18] sm:$0xff]  ;;  %v3150_v16 = vld [vmem:[%s4953_s3 + $0x40] sm:$0xff]  ;;  %v3144_v17 = vld [vmem:[%s4961_s11 + $0x10] sm:$0xff] }
 0xa0d   : > { %v4491_v22 = vsel %vm1501_vm12, %v1491_v14, %v1507_v20  ;;  %v1530_v33 = vmul.f32 %v4493_v23, %v4493_v23  ;;  %v3151_v14 = vld [vmem:[%s4953_s3 + $0x48] sm:$0xff]  ;;  %3481 = vmatprep.mubr.msk.f32.mxu1 %vm1001_vm14, %v3144_v17  ;;  %v3153_v19 = vld [vmem:[%s4953_s3 + $0x58] sm:$0xff]  ;;  %v3152_v20 = vld [vmem:[%s4953_s3 + $0x50] sm:$0xff] }
 0xa0e   : > { %v1514_v24 = vadd.f32 %v1513_v21, %v4491_v22  ;;  %v1529_v28 = vmul.f32 %v4491_v22, %v4491_v22 }
 0xa10   : > { %v1515_v31 = vadd.f32 %v1514_v24, %v4493_v23  ;;  %v1532_v34 = vadd.f32 %v1531_v29, %v1529_v28 }
 0xa12   : > { %1516 = vadd.xlane.f32.xlu0 %v1515_v31  ;;  %v1533_v36 = vadd.f32 %v1532_v34, %v1530_v33 }
 0xa14   : > { %1534 = vadd.xlane.f32.xlu1 %v1533_v36 }
 0xa9f   : > { %v1517_v37 = vpop.xlane.xlu0 %1516 }
 0xaa0   : > { %v1518_v38 = vrot.slane %v1517_v37, 4 }
 0xaa1   : > { %v1535_v41 = vpop.xlane.xlu1 %1534 }
 0xaa2   : > { %v1519_v44 = vadd.f32 %v1518_v38, %v1517_v37  ;;  %v1536_v45 = vrot.slane %v1535_v41, 4 }
 0xaa4   : > { %v1520_v15 = vrot.slane %v1519_v44, 2  ;;  %v1537_v18 = vadd.f32 %v1536_v45, %v1535_v41 }
 0xaa6   : > { %v1538_v25 = vrot.slane %v1537_v18, 2  ;;  %v1521_v26 = vadd.f32 %v1520_v15, %v1519_v44 }
 0xaa8   : > { %v1522_v46 = vrot.slane %v1521_v26, 1  ;;  %v1539_v47 = vadd.f32 %v1538_v25, %v1537_v18 }
 0xaaa   : > { %v1523_v48 = vadd.f32 %v1522_v46, %v1521_v26  ;;  %v1540_v49 = vrot.slane %v1539_v47, 1 }
 0xaac   : > { %3774 = vpush %v1523_v48  ;;  %v1541_v50 = vadd.f32 %v1540_v49, %v1539_v47 }
 0xaae   : > { %3776 = vpush %v1541_v50 }
 0xadd   : > { %s3775_s30 = spop %3774 }
 0xade   : > { %v1525_v51 = vstv %s3775_s30 }
 0xadf   : > { %v1526_v52 = vmul.f32 0.00024414063, %v1525_v51  ;;  %s3777_s15 = spop %3776 }
 0xae0   : > { %v1543_v53 = vstv %s3777_s15 }
 0xae1   : > { %v1544_v32 = vmul.f32 0.00024414063, %v1543_v53  ;;  %v1545_v35 = vmul.f32 %v1526_v52, %v1526_v52 }
 0xae3   : > { %v1546_v42 = vsub.f32 %v1544_v32, %v1545_v35  ;;  %v3155_v32 = vld [vmem:[%s4952_s2 + $0x48] sm:$0xff] }
 0xae5   : > { %v1547_v43 = vadd.f32 1e-05, %v1546_v42 }
 0xae7   : > { %3942 = vrsqrt.f32 %v1547_v43 }
 0xaf1   : > { %v3943_v27 = vpop.eup %3942 }
 0xaf2   : > { %v1555_v30 = vmul.f32 %v3943_v27, %v3137_v54  ;;  %v1554_v39 = vmul.f32 %v3943_v27, %v3136_v55  ;;  %v1557_v58 = vmul.f32 %v3943_v27, %v3139_v40  ;;  %v1556_v59 = vmul.f32 %v3943_v27, %v3138_v56 }
 0xaf3   : > { %v1852_v54 = vstv %s3162_s17  ;;  %s3218_s17 = sld [smem:[#allocation2 + $0x180]] }
 0xaf4   : > { %1578 = vperm.xlu1 %3855, %v1555_v30   ;;  %1573 = vperm.xlu0 %3854, %v1554_v39   ;;  %v1564_v60 = vmul.f32 %v1555_v30, %v1526_v52  ;;  %v1563_v63 = vmul.f32 %v1554_v39, %v1526_v52  ;;  %v1566_v2 = vmul.f32 %v1557_v58, %v1526_v52 }
 0xaf5   : > { %v1565_v3 = vmul.f32 %v1556_v59, %v1526_v52 }
 0xaf6   : > { %v1568_v6 = vsub.f32 %v3141_v0, %v1564_v60  ;;  %v1567_v1 = vsub.f32 %v3140_v7, %v1563_v63  ;;  %v1570_v8 = vsub.f32 %v3143_v4, %v1566_v2 }
 0xaf7   : > { %v1569_v9 = vsub.f32 %v3142_v5, %v1565_v3 }
 0xaf8   : > { %1588 = vperm.xlu1 %3855, %v1557_v58   ;;  %1583 = vperm.xlu0 %3854, %v1556_v59  }
 0xafc   : > { %1602 = vperm.xlu1 %3855, %v1568_v6   ;;  %1597 = vperm.xlu0 %3854, %v1567_v1  }
 0xb00   : > { %1612 = vperm.xlu1 %3855, %v1570_v8   ;;  %1607 = vperm.xlu0 %3854, %v1569_v9  }
 0xb04   : > { %1715 = vperm.xlu1 %3855, %v3149_v11   ;;  %1710 = vperm.xlu0 %3854, %v3148_v12  }
 0xb08   : > { %1737 = vperm.xlu1 %3855, %v3151_v14   ;;  %1732 = vperm.xlu0 %3854, %v3150_v16  }
 0xb0c   : > { %1747 = vperm.xlu1 %3855, %v3153_v19   ;;  %1742 = vperm.xlu0 %3854, %v3152_v20  }
 0xb73   : > { %v1579_v21 = vpop.permute.xlu1 %1578  ;;  %v1574_v24 = vpop.permute.xlu0 %1573 }
 0xb74   : > { %v1592_v31 = vmul.f32 %v1579_v21, %v4481_v10  ;;  %v1591_v33 = vmul.f32 %v1574_v24, %v4483_v13  ;;  %v3145_v10 = vld [vmem:[%s4961_s11 + $0x18] sm:$0xff]  ;;  %v3154_v13 = vld [vmem:[%s4952_s2 + $0x40] sm:$0xff] }
 0xb77   : > { %v1589_v28 = vpop.permute.xlu1 %1588  ;;  %v1584_v29 = vpop.permute.xlu0 %1583 }
 0xb78   : > { %v1594_v41 = vmul.f32 %v1589_v28, %v4493_v23  ;;  %v1593_v44 = vmul.f32 %v1584_v29, %v4491_v22 }
 0xb7b   : > { %v1603_v34 = vpop.permute.xlu1 %1602  ;;  %v1598_v36 = vpop.permute.xlu0 %1597 }
 0xb7c   : > { %v1616_v37 = vadd.f32 %v1603_v34, %v1592_v31  ;;  %v1615_v38 = vadd.f32 %v1598_v36, %v1591_v33 }
 0xb7e   : > { %v3666_v45 = vpack.c.bf16 %v1616_v37, %v1615_v38 }
 0xb7f   : > { %v1613_v15 = vpop.permute.xlu1 %1612  ;;  %v1608_v18 = vpop.permute.xlu0 %1607 }
 0xb80   : > { %v1618_v25 = vadd.f32 %v1613_v15, %v1594_v41  ;;  %v1617_v26 = vadd.f32 %v1608_v18, %v1593_v44  ;;  %3667 = vmatprep.subr.bf16.mxu1 %v3666_v45 }
 0xb81   : > { %3669 = vmatpush3.bf16.msra.mxu1 %v3666_v45 }
 0xb82   : > { %v3670_v46 = vpack.c.bf16 %v1618_v25, %v1617_v26 }
 0xb83   : > { %v1716_v48 = vpop.permute.xlu1 %1715  ;;  %v1711_v50 = vpop.permute.xlu0 %1710 }
 0xb84   : > { %3671 = vmatprep.subr.bf16.mxu1 %v3670_v46 }
 0xb85   : > { %3673 = vmatpush3.bf16.msra.mxu1 %v3670_v46 }
 0xb87   : > { %v1738_v35 = vpop.permute.xlu1 %1737  ;;  %v1733_v42 = vpop.permute.xlu0 %1732 }
 0xb88   : > { %3482 = vmatmul.mubr.msk.f32.vlgmr.msra.gmra.mrb[8].mxu1 %vm1001_vm14, %v3145_v10 }
 0xb89   : > { %3488 = vmatprep.mubr.msk.f32.mxu1 %vm513_vm0, %v3154_v13 }
 0xb8b   : > { %v1748_v40 = vpop.permute.xlu1 %1747  ;;  %v1743_v59 = vpop.permute.xlu0 %1742 }
 0xc5b   : > { %v3483_v22 = vpop.f32.mrb[8].mxu1 }
 0xc5c   : > { %v1704_v23 = vadd.f32 %v3483_v22, %v4385_v61  ;;  %v1694_v47 = vpop.f32.mrb[9].mxu1  ;;  %v3156_v61 = vld [vmem:[%s4952_s2 + $0x50] sm:$0xff] }
 0xc5d   : > { %v1703_v49 = vadd.f32 %v1694_v47, %v4387_v62  ;;  %v3157_v62 = vld [vmem:[%s4952_s2 + $0x58] sm:$0xff]  ;;  %v3163_v47 = vld [vmem:[%s4955_s5 + $0x40] sm:$0xff] }
 0xc5e   : > { %v4561_v51 = vadd.f32 %v1716_v48, %v1704_v23  ;;  %v3164_v23 = vld [vmem:[%s4955_s5 + $0x48] sm:$0xff] }
 0xc5f   : > { %v4563_v52 = vadd.f32 %v1711_v50, %v1703_v49 }
 0xc61   : > { %v3674_v53 = vpack.c.bf16 %v4561_v51, %v4563_v52 }
 0xc63   : > { %3675 = vmatprep.subr.bf16.mxu1 %v3674_v53 }
 0xc64   : > { %3677 = vmatpush3.bf16.msra.mxu1 %v3674_v53  ;;  %v3166_v53 = vld [vmem:[%s4955_s5 + $0x58] sm:$0xff] }
 0xc67   : > { %3489 = vmatmul.mubr.msk.f32.vlgmr.msra.gmra.mrb[10].mxu1 %vm513_vm0, %v3155_v32  ;;  %v3165_v32 = vld [vmem:[%s4955_s5 + $0x50] sm:$0xff] }
 0xc68   : > { %3491 = vmatprep.mubr.msk.f32.mxu1 %vm513_vm0, %v3156_v61 }
 0xc6b   : > { %3492 = vmatmul.mubr.msk.f32.gmra.mrb[12].mxu1 %vm513_vm0, %v3157_v62 }
 0xd3a   : > { %v3490_v43 = vpop.f32.mrb[10].mxu1 }
 0xd3b   : > { %v1834_v55 = vadd.f32 %v3490_v43, %v1738_v35  ;;  %v1828_v27 = vpop.f32.mrb[11].mxu1  ;;  %v3168_v43 = vld [vmem:[%s4956_s6 + $0x48] sm:$0xff] }
 0xd3c   : > { %v1829_v30 = vadd.f32 %v1828_v27, %v1733_v42 }
 0xd3d   : > { %vm1848_vm13 = vcmp.ge.f32.partialorder %v1834_v55, 0.0  ;;  %v1854_v39 = vmul.f32 %v1852_v54, %v1834_v55 }
 0xd3e   : > { %vm1847_vm15 = vcmp.ge.f32.partialorder %v1829_v30, 0.0  ;;  %v1853_v56 = vmul.f32 %v1852_v54, %v1829_v30  ;;  %v3493_v58 = vpop.f32.mrb[12].mxu1 }
 0xd3f   : > { %v4579_v60 = vsel %vm1848_vm13, %v1834_v55, %v1854_v39  ;;  %v1844_v63 = vadd.f32 %v3493_v58, %v1748_v40  ;;  %v1838_v0 = vpop.f32.mrb[13].mxu1  ;;  %v3170_v40 = vld [vmem:[%s4956_s6 + $0x58] sm:$0xff] }
 0xd40   : > { %v4581_v7 = vsel %vm1847_vm15, %v1829_v30, %v1853_v56  ;;  %v1839_v6 = vadd.f32 %v1838_v0, %v1743_v59  ;;  %v1876_v1 = vmul.f32 %v4579_v60, %v4579_v60  ;;  %v3169_v56 = vld [vmem:[%s4956_s6 + $0x50] sm:$0xff] }
 0xd41   : > { %v1875_v2 = vmul.f32 %v4581_v7, %v4581_v7  ;;  %vm1850_vm1 = vcmp.ge.f32.partialorder %v1844_v63, 0.0  ;;  %v1856_v3 = vmul.f32 %v1852_v54, %v1844_v63  ;;  %v1861_v5 = vadd.f32 %v4579_v60, %v4581_v7 }
 0xd42   : > { %vm1849_vm2 = vcmp.ge.f32.partialorder %v1839_v6, 0.0  ;;  %v1855_v4 = vmul.f32 %v1852_v54, %v1839_v6  ;;  %v3167_v54 = vld [vmem:[%s4956_s6 + $0x40] sm:$0xff] }
 0xd43   : > { %v4591_v9 = vsel %vm1850_vm1, %v1844_v63, %v1856_v3  ;;  %v1879_v14 = vadd.f32 %v1876_v1, %v1875_v2  ;;  %vm2588_vm1 = vcmp.ge.s32.totalorder %v4289_v57, 8  ;;  %v3229_v57 = vld [vmem:[%s4957_s7 + $0x70] sm:$0xff] }
 0xd44   : > { %v4589_v8 = vsel %vm1849_vm2, %v1839_v6, %v1855_v4  ;;  %v1878_v17 = vmul.f32 %v4591_v9, %v4591_v9  ;;  %vm3723_vm2 = vmpackc.low %vm2588_vm1, %vm2588_vm1 }
 0xd45   : > { %v1862_v11 = vadd.f32 %v1861_v5, %v4589_v8  ;;  %v1877_v12 = vmul.f32 %v4589_v8, %v4589_v8 }
 0xd47   : > { %v1863_v16 = vadd.f32 %v1862_v11, %v4591_v9  ;;  %v1880_v19 = vadd.f32 %v1879_v14, %v1877_v12 }
 0xd49   : > { %1864 = vadd.xlane.f32.xlu0 %v1863_v16  ;;  %v1881_v20 = vadd.f32 %v1880_v19, %v1878_v17 }
 0xd4b   : > { %1882 = vadd.xlane.f32.xlu1 %v1881_v20 }
 0xdd6   : > { %v1865_v21 = vpop.xlane.xlu0 %1864 }
 0xdd7   : > { %v1866_v24 = vrot.slane %v1865_v21, 4 }
 0xdd8   : > { %v1883_v28 = vpop.xlane.xlu1 %1882 }
 0xdd9   : > { %v1867_v29 = vadd.f32 %v1866_v24, %v1865_v21  ;;  %v1884_v31 = vrot.slane %v1883_v28, 4 }
 0xddb   : > { %v1868_v33 = vrot.slane %v1867_v29, 2  ;;  %v1885_v34 = vadd.f32 %v1884_v31, %v1883_v28  ;;  %v3171_v31 = vld [vmem:[%s4957_s7 + $0x40] sm:$0xff] }
 0xddc   : > { %3518 = vmatprep.mubr.msk.f32.mxu1 %vm783_vm5, %v3171_v31 }
 0xddd   : > { %v1886_v36 = vrot.slane %v1885_v34, 2  ;;  %v1869_v37 = vadd.f32 %v1868_v33, %v1867_v29  ;;  %v3178_v33 = vld [vmem:[%s4958_s8 + $0x58] sm:$0xff] }
 0xddf   : > { %v1870_v38 = vrot.slane %v1869_v37, 1  ;;  %v1887_v41 = vadd.f32 %v1886_v36, %v1885_v34 }
 0xde1   : > { %v1871_v44 = vadd.f32 %v1870_v38, %v1869_v37  ;;  %v1888_v45 = vrot.slane %v1887_v41, 1 }
 0xde3   : > { %3778 = vpush %v1871_v44  ;;  %v1889_v15 = vadd.f32 %v1888_v45, %v1887_v41 }
 0xde5   : > { %3780 = vpush %v1889_v15 }
 0xe14   : > { %s3779_s19 = spop %3778 }
 0xe15   : > { %v1873_v18 = vstv %s3779_s19 }
 0xe16   : > { %v1874_v25 = vmul.f32 0.00024414063, %v1873_v18  ;;  %s3781_s21 = spop %3780 }
 0xe17   : > { %v1891_v26 = vstv %s3781_s21 }
 0xe18   : > { %v1892_v46 = vmul.f32 0.00024414063, %v1891_v26  ;;  %v1893_v10 = vmul.f32 %v1874_v25, %v1874_v25 }
 0xe1a   : > { %v1894_v13 = vsub.f32 %v1892_v46, %v1893_v10 }
 0xe1c   : > { %v1895_v22 = vadd.f32 1e-05, %v1894_v13 }
 0xe1e   : > { %3944 = vrsqrt.f32 %v1895_v22 }
 0xe28   : > { %v3945_v48 = vpop.eup %3944 }
 0xe29   : > { %v1903_v49 = vmul.f32 %v3945_v48, %v3164_v23  ;;  %v1902_v50 = vmul.f32 %v3945_v48, %v3163_v47  ;;  %v1905_v61 = vmul.f32 %v3945_v48, %v3166_v53  ;;  %v1904_v62 = vmul.f32 %v3945_v48, %v3165_v32  ;;  %v3172_v47 = vld [vmem:[%s4957_s7 + $0x48] sm:$0xff]  ;;  %v3173_v48 = vld [vmem:[%s4957_s7 + $0x50] sm:$0xff] }
 0xe2b   : > { %1926 = vperm.xlu1 %3855, %v1903_v49   ;;  %1921 = vperm.xlu0 %3854, %v1902_v50   ;;  %v1912_v35 = vmul.f32 %v1903_v49, %v1874_v25  ;;  %v1911_v42 = vmul.f32 %v1902_v50, %v1874_v25  ;;  %v1914_v30 = vmul.f32 %v1905_v61, %v1874_v25  ;;  %v3174_v49 = vld [vmem:[%s4957_s7 + $0x58] sm:$0xff] }
 0xe2c   : > { %v1913_v39 = vmul.f32 %v1904_v62, %v1874_v25 }
 0xe2d   : > { %v1916_v55 = vsub.f32 %v3168_v43, %v1912_v35  ;;  %v1915_v27 = vsub.f32 %v3167_v54, %v1911_v42  ;;  %v1918_v58 = vsub.f32 %v3170_v40, %v1914_v30 }
 0xe2e   : > { %v1917_v59 = vsub.f32 %v3169_v56, %v1913_v39 }
 0xe2f   : > { %1936 = vperm.xlu1 %3855, %v1905_v61   ;;  %1931 = vperm.xlu0 %3854, %v1904_v62   ;;  %v2125_v61 = vstv %s3191_s24 }
 0xe33   : > { %1950 = vperm.xlu1 %3855, %v1916_v55   ;;  %1945 = vperm.xlu0 %3854, %v1915_v27  }
 0xe37   : > { %1960 = vperm.xlu1 %3855, %v1918_v58   ;;  %1955 = vperm.xlu0 %3854, %v1917_v59  }
 0xeaa   : > { %v1927_v63 = vpop.permute.xlu1 %1926  ;;  %v1922_v0 = vpop.permute.xlu0 %1921 }
 0xeab   : > { %v1940_v2 = vmul.f32 %v1927_v63, %v4579_v60  ;;  %v1939_v3 = vmul.f32 %v1922_v0, %v4581_v7  ;;  %v3175_v7 = vld [vmem:[%s4958_s8 + $0x40] sm:$0xff] }
 0xeae   : > { %v1937_v6 = vpop.permute.xlu1 %1936  ;;  %v1932_v1 = vpop.permute.xlu0 %1931 }
 0xeaf   : > { %v1942_v14 = vmul.f32 %v1937_v6, %v4591_v9  ;;  %v1941_v16 = vmul.f32 %v1932_v1, %v4589_v8  ;;  %v3177_v8 = vld [vmem:[%s4958_s8 + $0x50] sm:$0xff]  ;;  %v3176_v9 = vld [vmem:[%s4958_s8 + $0x48] sm:$0xff] }
 0xeb2   : > { %v1951_v4 = vpop.permute.xlu1 %1950  ;;  %v1946_v5 = vpop.permute.xlu0 %1945 }
 0xeb3   : > { %v1964_v11 = vadd.f32 %v1951_v4, %v1940_v2  ;;  %v1963_v12 = vadd.f32 %v1946_v5, %v1939_v3 }
 0xeb5   : > { %v3896_v17 = vpack.i.bf16 %v1964_v11, %v1963_v12  ;;  %v3690_v19 = vpack.c.bf16 %v1964_v11, %v1963_v12 }
 0xeb6   : > { %v1961_v20 = vpop.permute.xlu1 %1960  ;;  %v1956_v21 = vpop.permute.xlu0 %1955 }
 0xeb7   : > { %v1966_v24 = vadd.f32 %v1961_v20, %v1942_v14  ;;  %v1965_v28 = vadd.f32 %v1956_v21, %v1941_v16  ;;  %3897 = vrot.lane.b32.xlu0 %v3896_v17, %s4041_s22 }
 0xeb9   : > { %v3901_v29 = vpack.i.bf16 %v1966_v24, %v1965_v28  ;;  %v3694_v60 = vpack.c.bf16 %v1966_v24, %v1965_v28 }
 0xebb   : > { %3907 = vrot.lane.b32.xlu0 %v3896_v17, %s4042_s23  ;;  %3902 = vrot.lane.b32.xlu1 %v3901_v29, %s4041_s22  ;;  %s4043_s22 = smov 8  }
 0xebf   : > { %2005 = vperm.xlu0 %3854, %v3175_v7   ;;  %3912 = vrot.lane.b32.xlu1 %v3901_v29, %s4042_s23  ;;  %s4044_s23 = smov 120  }
 0xec3   : > { %2015 = vperm.xlu0 %3854, %v3177_v8   ;;  %2010 = vperm.xlu1 %3855, %v3176_v9  }
 0xec7   : > { %2020 = vperm.xlu1 %3855, %v3178_v33  }
 0xf29   : > { %v3898_v34 = vpop.permute.xlu0 %3897 }
 0xf2a   : > { %v3900_v36 = vunpack.i.h.bf16 %v3898_v34  ;;  %v3899_v37 = vunpack.i.l.bf16 %v3898_v34 }
 0xf2c   : > { %v3678_v38 = vpack.c.bf16 %v3900_v36, %v3899_v37 }
 0xf2d   : > { %v3903_v41 = vpop.permute.xlu1 %3902  ;;  %v3908_v18 = vpop.permute.xlu0 %3907 }
 0xf2e   : > { %v3905_v44 = vunpack.i.h.bf16 %v3903_v41  ;;  %v3904_v45 = vunpack.i.l.bf16 %v3903_v41  ;;  %3680 = vmatprep.subr.msk.bf16.mxu1 %vm3679_vm4, %v3678_v38  ;;  %v3910_v25 = vunpack.i.h.bf16 %v3908_v18  ;;  %v3909_v26 = vunpack.i.l.bf16 %v3908_v18 }
 0xf2f   : > { %3683 = vmatpush3.bf16.msk.msra.mxu1 %vm3679_vm4, %v3678_v38 }
 0xf30   : > { %v3684_v15 = vpack.c.bf16 %v3905_v44, %v3904_v45  ;;  %v3698_v10 = vpack.c.bf16 %v3910_v25, %v3909_v26  ;;  %v3193_v26 = vld [vmem:[%s4959_s9 + $0x48] sm:$0xff] }
 0xf31   : > { %v3913_v46 = vpop.permute.xlu1 %3912 }
 0xf32   : > { %3686 = vmatprep.subr.msk.bf16.mxu1 %vm3679_vm4, %v3684_v15  ;;  %v3915_v13 = vunpack.i.h.bf16 %v3913_v46  ;;  %v3914_v22 = vunpack.i.l.bf16 %v3913_v46  ;;  %v3192_v46 = vld [vmem:[%s4959_s9 + $0x40] sm:$0xff] }
 0xf33   : > { %3689 = vmatpush3.bf16.msk.msra.mxu1 %vm3679_vm4, %v3684_v15  ;;  %vm3743_vm4 = vmpackc.low %vm2601_vm3, %vm2601_vm3 }
 0xf34   : > { %3691 = vmatprep.subr.bf16.mxu1 %v3690_v19  ;;  %v3704_v23 = vpack.c.bf16 %v3915_v13, %v3914_v22 }
 0xf37   : > { %3693 = vmatpush3.bf16.msra.mxu1 %v3690_v19 }
 0xf38   : > { %3695 = vmatprep.subr.bf16.mxu1 %v3694_v60 }
 0xf3b   : > { %3697 = vmatpush3.bf16.msra.mxu1 %v3694_v60 }
 0xf3c   : > { %3700 = vmatprep.subr.msk.bf16.mxu1 %vm3699_vm7, %v3698_v10 }
 0xf3e   : > { %v2006_v53 = vpop.permute.xlu0 %2005 }
 0xf3f   : > { %3703 = vmatpush3.bf16.msk.msra.mxu1 %vm3699_vm7, %v3698_v10 }
 0xf40   : > { %3706 = vmatprep.subr.msk.bf16.mxu1 %vm3699_vm7, %v3704_v23 }
 0xf42   : > { %v2011_v50 = vpop.permute.xlu1 %2010  ;;  %v2016_v30 = vpop.permute.xlu0 %2015 }
 0xf43   : > { %3709 = vmatpush3.bf16.msk.msra.mxu1 %vm3699_vm7, %v3704_v23  ;;  %v3195_v23 = vld [vmem:[%s4959_s9 + $0x58] sm:$0xff] }
 0xf46   : > { %3519 = vmatmul.mubr.msk.f32.vlgmr.msra.gmra.mrb[14].mxu1 %vm783_vm5, %v3172_v47  ;;  %v2021_v54 = vpop.permute.xlu1 %2020  ;;  %v3194_v47 = vld [vmem:[%s4959_s9 + $0x50] sm:$0xff] }
 0xf47   : > { %3521 = vmatprep.mubr.msk.f32.mxu1 %vm783_vm5, %v3173_v48 }
 0xf4a   : > { %3522 = vmatmul.mubr.msk.f32.gmra.mrb[16].mxu1 %vm783_vm5, %v3174_v49 }
0x1019   : > { %v3520_v32 = vpop.f32.mrb[14].mxu1 }
0x101a   : > { %v2107_v62 = vadd.f32 %v3520_v32, %v2011_v50  ;;  %v2101_v35 = vpop.f32.mrb[15].mxu1  ;;  %v3197_v32 = vld [vmem:[%s4960_s10 + $0x48] sm:$0xff] }
0x101b   : > { %v2102_v42 = vadd.f32 %v2101_v35, %v2006_v53 }
0x101c   : > { %vm2121_vm8 = vcmp.ge.f32.partialorder %v2107_v62, 0.0  ;;  %v2127_v43 = vmul.f32 %v2125_v61, %v2107_v62 }
0x101d   : > { %vm2120_vm9 = vcmp.ge.f32.partialorder %v2102_v42, 0.0  ;;  %v2126_v55 = vmul.f32 %v2125_v61, %v2102_v42  ;;  %v3523_v27 = vpop.f32.mrb[16].mxu1 }
0x101e   : > { %v4657_v39 = vsel %vm2121_vm8, %v2107_v62, %v2127_v43  ;;  %v2117_v40 = vadd.f32 %v3523_v27, %v2021_v54  ;;  %v2111_v56 = vpop.f32.mrb[17].mxu1  ;;  %v3199_v54 = vld [vmem:[%s4960_s10 + $0x58] sm:$0xff] }
0x101f   : > { %v4659_v58 = vsel %vm2120_vm9, %v2102_v42, %v2126_v55  ;;  %v2112_v59 = vadd.f32 %v2111_v56, %v2016_v30  ;;  %v2149_v63 = vmul.f32 %v4657_v39, %v4657_v39  ;;  %v3198_v55 = vld [vmem:[%s4960_s10 + $0x50] sm:$0xff]  ;;  %v3204_v56 = vld [vmem:[%s4962_s12 + $0x20] sm:$0xff] }
0x1020   : > { %v2148_v0 = vmul.f32 %v4659_v58, %v4659_v58  ;;  %vm2123_vm10 = vcmp.ge.f32.partialorder %v2117_v40, 0.0  ;;  %v2129_v6 = vmul.f32 %v2125_v61, %v2117_v40  ;;  %v2134_v2 = vadd.f32 %v4657_v39, %v4659_v58 }
0x1021   : > { %vm2122_vm11 = vcmp.ge.f32.partialorder %v2112_v59, 0.0  ;;  %v2128_v1 = vmul.f32 %v2125_v61, %v2112_v59  ;;  %v3196_v61 = vld [vmem:[%s4960_s10 + $0x40] sm:$0xff] }
0x1022   : > { %v4669_v4 = vsel %vm2123_vm10, %v2117_v40, %v2129_v6  ;;  %v2152_v12 = vadd.f32 %v2149_v63, %v2148_v0  ;;  %v3205_v40 = vld [vmem:[%s4962_s12 + $0x28] sm:$0xff]  ;;  %v3206_v63 = vld [vmem:[%s4953_s3 + $0x60] sm:$0xff]  ;;  %v3209_v6 = vld [vmem:[%s4953_s3 + $0x78] sm:$0xff] }
0x1023   : > { %v4667_v3 = vsel %vm2122_vm11, %v2112_v59, %v2128_v1  ;;  %v2151_v16 = vmul.f32 %v4669_v4, %v4669_v4  ;;  %v3207_v59 = vld [vmem:[%s4953_s3 + $0x68] sm:$0xff]  ;;  %v3200_v0 = vld [vmem:[%s4961_s11 + $0x20] sm:$0xff]  ;;  %v3208_v1 = vld [vmem:[%s4953_s3 + $0x70] sm:$0xff] }
0x1024   : > { %v2135_v5 = vadd.f32 %v2134_v2, %v4667_v3  ;;  %v2150_v11 = vmul.f32 %v4667_v3, %v4667_v3  ;;  %3532 = vmatprep.mubr.msk.f32.mxu0 %vm1001_vm14, %v3200_v0 }
0x1026   : > { %v2136_v14 = vadd.f32 %v2135_v5, %v4669_v4  ;;  %v2153_v17 = vadd.f32 %v2152_v12, %v2150_v11 }
0x1028   : > { %2137 = vadd.xlane.f32.xlu0 %v2136_v14  ;;  %v2154_v19 = vadd.f32 %v2153_v17, %v2151_v16 }
0x102a   : > { %2155 = vadd.xlane.f32.xlu1 %v2154_v19 }
0x10b5   : > { %v2138_v20 = vpop.xlane.xlu0 %2137 }
0x10b6   : > { %v2139_v21 = vrot.slane %v2138_v20, 4 }
0x10b7   : > { %v2156_v24 = vpop.xlane.xlu1 %2155 }
0x10b8   : > { %v2140_v28 = vadd.f32 %v2139_v21, %v2138_v20  ;;  %v2157_v29 = vrot.slane %v2156_v24, 4 }
0x10ba   : > { %v2141_v60 = vrot.slane %v2140_v28, 2  ;;  %v2158_v7 = vadd.f32 %v2157_v29, %v2156_v24 }
0x10bc   : > { %v2159_v8 = vrot.slane %v2158_v7, 2  ;;  %v2142_v9 = vadd.f32 %v2141_v60, %v2140_v28 }
0x10be   : > { %v2143_v31 = vrot.slane %v2142_v9, 1  ;;  %v2160_v33 = vadd.f32 %v2159_v8, %v2158_v7 }
0x10c0   : > { %v2144_v34 = vadd.f32 %v2143_v31, %v2142_v9  ;;  %v2161_v36 = vrot.slane %v2160_v33, 1 }
0x10c2   : > { %3782 = vpush %v2144_v34  ;;  %v2162_v37 = vadd.f32 %v2161_v36, %v2160_v33 }
0x10c4   : > { %3784 = vpush %v2162_v37 }
0x10f3   : > { %s3783_s30 = spop %3782 }
0x10f4   : > { %v2146_v38 = vstv %s3783_s30  ;;  %s3247_s30 = sld [smem:[#allocation2 + $0x181]] }
0x10f5   : > { %v2147_v41 = vmul.f32 0.00024414063, %v2146_v38  ;;  %s3785_s15 = spop %3784 }
0x10f6   : > { %v2164_v44 = vstv %s3785_s15 }
0x10f7   : > { %v2165_v45 = vmul.f32 0.00024414063, %v2164_v44  ;;  %v2166_v15 = vmul.f32 %v2147_v41, %v2147_v41 }
0x10f9   : > { %v2167_v18 = vsub.f32 %v2165_v45, %v2166_v15  ;;  %v3211_v45 = vld [vmem:[%s4952_s2 + $0x68] sm:$0xff] }
0x10fb   : > { %v2168_v25 = vadd.f32 1e-05, %v2167_v18 }
0x10fd   : > { %3946 = vrsqrt.f32 %v2168_v25 }
0x1107   : > { %v3947_v10 = vpop.eup %3946 }
0x1108   : > { %v2176_v13 = vmul.f32 %v3947_v10, %v3193_v26  ;;  %v2175_v22 = vmul.f32 %v3947_v10, %v3192_v46  ;;  %v2178_v48 = vmul.f32 %v3947_v10, %v3195_v23  ;;  %v2177_v49 = vmul.f32 %v3947_v10, %v3194_v47 }
0x1109   : > { %v2473_v26 = vstv %s3218_s17 }
0x110a   : > { %2199 = vperm.xlu1 %3855, %v2176_v13   ;;  %2194 = vperm.xlu0 %3854, %v2175_v22   ;;  %v2185_v50 = vmul.f32 %v2176_v13, %v2147_v41  ;;  %v2184_v53 = vmul.f32 %v2175_v22, %v2147_v41  ;;  %v2187_v62 = vmul.f32 %v2178_v48, %v2147_v41 }
0x110b   : > { %v2186_v35 = vmul.f32 %v2177_v49, %v2147_v41 }
0x110c   : > { %v2189_v42 = vsub.f32 %v3197_v32, %v2185_v50  ;;  %v2188_v43 = vsub.f32 %v3196_v61, %v2184_v53  ;;  %v2191_v27 = vsub.f32 %v3199_v54, %v2187_v62 }
0x110d   : > { %v2190_v30 = vsub.f32 %v3198_v55, %v2186_v35 }
0x110e   : > { %2209 = vperm.xlu1 %3855, %v2178_v48   ;;  %2204 = vperm.xlu0 %3854, %v2177_v49  }
0x1112   : > { %2223 = vperm.xlu1 %3855, %v2189_v42   ;;  %2218 = vperm.xlu0 %3854, %v2188_v43  }
0x1116   : > { %2233 = vperm.xlu1 %3855, %v2191_v27   ;;  %2228 = vperm.xlu0 %3854, %v2190_v30  }
0x111a   : > { %2336 = vperm.xlu1 %3855, %v3205_v40   ;;  %2331 = vperm.xlu0 %3854, %v3204_v56  }
0x111e   : > { %2358 = vperm.xlu1 %3855, %v3207_v59   ;;  %2353 = vperm.xlu0 %3854, %v3206_v63  }
0x1122   : > { %2368 = vperm.xlu1 %3855, %v3209_v6   ;;  %2363 = vperm.xlu0 %3854, %v3208_v1  }
0x1189   : > { %v2200_v2 = vpop.permute.xlu1 %2199  ;;  %v2195_v5 = vpop.permute.xlu0 %2194 }
0x118a   : > { %v2213_v14 = vmul.f32 %v2200_v2, %v4657_v39  ;;  %v2212_v16 = vmul.f32 %v2195_v5, %v4659_v58  ;;  %v3201_v39 = vld [vmem:[%s4961_s11 + $0x28] sm:$0xff]  ;;  %v3210_v58 = vld [vmem:[%s4952_s2 + $0x60] sm:$0xff] }
0x118d   : > { %v2210_v11 = vpop.permute.xlu1 %2209  ;;  %v2205_v12 = vpop.permute.xlu0 %2204 }
0x118e   : > { %v2215_v24 = vmul.f32 %v2210_v11, %v4669_v4  ;;  %v2214_v28 = vmul.f32 %v2205_v12, %v4667_v3 }
0x1191   : > { %v2224_v17 = vpop.permute.xlu1 %2223  ;;  %v2219_v19 = vpop.permute.xlu0 %2218 }
0x1192   : > { %v2237_v20 = vadd.f32 %v2224_v17, %v2213_v14  ;;  %v2236_v21 = vadd.f32 %v2219_v19, %v2212_v16 }
0x1194   : > { %v3710_v29 = vpack.c.bf16 %v2237_v20, %v2236_v21 }
0x1195   : > { %v2234_v60 = vpop.permute.xlu1 %2233  ;;  %v2229_v7 = vpop.permute.xlu0 %2228 }
0x1196   : > { %v2239_v8 = vadd.f32 %v2234_v60, %v2215_v24  ;;  %v2238_v9 = vadd.f32 %v2229_v7, %v2214_v28  ;;  %3711 = vmatprep.subr.bf16.mxu0 %v3710_v29 }
0x1197   : > { %3713 = vmatpush3.bf16.msra.mxu0 %v3710_v29 }
0x1198   : > { %v3714_v31 = vpack.c.bf16 %v2239_v8, %v2238_v9 }
0x1199   : > { %v2337_v34 = vpop.permute.xlu1 %2336  ;;  %v2332_v37 = vpop.permute.xlu0 %2331 }
0x119a   : > { %3715 = vmatprep.subr.bf16.mxu0 %v3714_v31 }
0x119b   : > { %3717 = vmatpush3.bf16.msra.mxu0 %v3714_v31 }
0x119d   : > { %v2359_v15 = vpop.permute.xlu1 %2358  ;;  %v2354_v18 = vpop.permute.xlu0 %2353 }
0x119e   : > { %3533 = vmatmul.mubr.msk.f32.vlgmr.msra.gmra.mrb[10].mxu0 %vm1001_vm14, %v3201_v39 }
0x119f   : > { %3539 = vmatprep.mubr.msk.f32.mxu0 %vm513_vm0, %v3210_v58 }
0x11a1   : > { %v2369_v23 = vpop.permute.xlu1 %2368  ;;  %v2364_v49 = vpop.permute.xlu0 %2363 }
0x1271   : > { %v3534_v3 = vpop.f32.mrb[10].mxu0 }
0x1272   : > { %v2325_v4 = vadd.f32 %v3534_v3, %v4561_v51  ;;  %v2315_v33 = vpop.f32.mrb[11].mxu0  ;;  %v3212_v51 = vld [vmem:[%s4952_s2 + $0x70] sm:$0xff] }
0x1273   : > { %v2324_v36 = vadd.f32 %v2315_v33, %v4563_v52  ;;  %v3213_v52 = vld [vmem:[%s4952_s2 + $0x78] sm:$0xff]  ;;  %v3219_v33 = vld [vmem:[%s4955_s5 + $0x60] sm:$0xff] }
0x1274   : > { %v4737_v38 = vadd.f32 %v2337_v34, %v2325_v4  ;;  %v3220_v4 = vld [vmem:[%s4955_s5 + $0x68] sm:$0xff] }
0x1275   : > { %v4739_v41 = vadd.f32 %v2332_v37, %v2324_v36 }
0x1277   : > { %v3718_v44 = vpack.c.bf16 %v4737_v38, %v4739_v41 }
0x1279   : > { %3719 = vmatprep.subr.bf16.mxu0 %v3718_v44 }
0x127a   : > { %3721 = vmatpush3.bf16.msra.mxu0 %v3718_v44  ;;  %v3222_v44 = vld [vmem:[%s4955_s5 + $0x78] sm:$0xff] }
0x127d   : > { %3540 = vmatmul.mubr.msk.f32.vlgmr.msra.gmra.mrb[12].mxu0 %vm513_vm0, %v3211_v45  ;;  %v3221_v45 = vld [vmem:[%s4955_s5 + $0x70] sm:$0xff] }
0x127e   : > { %3542 = vmatprep.mubr.msk.f32.mxu0 %vm513_vm0, %v3212_v51 }
0x1281   : > { %3543 = vmatmul.mubr.msk.f32.gmra.mrb[14].mxu0 %vm513_vm0, %v3213_v52 }
0x1350   : > { %v3541_v25 = vpop.f32.mrb[12].mxu0 }
0x1351   : > { %v2455_v46 = vadd.f32 %v3541_v25, %v2359_v15  ;;  %v2449_v10 = vpop.f32.mrb[13].mxu0  ;;  %v3224_v25 = vld [vmem:[%s4956_s6 + $0x68] sm:$0xff] }
0x1352   : > { %v2450_v13 = vadd.f32 %v2449_v10, %v2354_v18 }
0x1353   : > { %vm2469_vm12 = vcmp.ge.f32.partialorder %v2455_v46, 0.0  ;;  %v2475_v22 = vmul.f32 %v2473_v26, %v2455_v46 }
0x1354   : > { %vm2468_vm13 = vcmp.ge.f32.partialorder %v2450_v13, 0.0  ;;  %v2474_v47 = vmul.f32 %v2473_v26, %v2450_v13  ;;  %v3544_v48 = vpop.f32.mrb[14].mxu0 }
0x1355   : > { %v4755_v50 = vsel %vm2469_vm12, %v2455_v46, %v2475_v22  ;;  %v2465_v53 = vadd.f32 %v3544_v48, %v2369_v23  ;;  %v2459_v32 = vpop.f32.mrb[15].mxu0  ;;  %v3226_v23 = vld [vmem:[%s4956_s6 + $0x78] sm:$0xff] }
0x1356   : > { %v4757_v61 = vsel %vm2468_vm13, %v2450_v13, %v2474_v47  ;;  %v2460_v62 = vadd.f32 %v2459_v32, %v2364_v49  ;;  %v2497_v35 = vmul.f32 %v4755_v50, %v4755_v50  ;;  %v3225_v47 = vld [vmem:[%s4956_s6 + $0x70] sm:$0xff] }
0x1357   : > { %v2496_v42 = vmul.f32 %v4757_v61, %v4757_v61  ;;  %vm2471_vm0 = vcmp.ge.f32.partialorder %v2465_v53, 0.0  ;;  %v2477_v43 = vmul.f32 %v2473_v26, %v2465_v53  ;;  %v2482_v55 = vadd.f32 %v4755_v50, %v4757_v61 }
0x1358   : > { %vm2470_vm15 = vcmp.ge.f32.partialorder %v2460_v62, 0.0  ;;  %v2476_v54 = vmul.f32 %v2473_v26, %v2460_v62  ;;  %v3223_v26 = vld [vmem:[%s4956_s6 + $0x60] sm:$0xff] }
0x1359   : > { %v4765_v27 = vsel %vm2471_vm0, %v2465_v53, %v2477_v43  ;;  %v2500_v59 = vadd.f32 %v2497_v35, %v2496_v42 }
0x135a   : > { %v4767_v30 = vsel %vm2470_vm15, %v2460_v62, %v2476_v54  ;;  %v2499_v0 = vmul.f32 %v4765_v27, %v4765_v27 }
0x135b   : > { %v2498_v40 = vmul.f32 %v4767_v30, %v4767_v30  ;;  %v2483_v56 = vadd.f32 %v2482_v55, %v4767_v30 }
0x135d   : > { %v2484_v63 = vadd.f32 %v2483_v56, %v4765_v27  ;;  %v2501_v6 = vadd.f32 %v2500_v59, %v2498_v40 }
0x135f   : > { %2485 = vadd.xlane.f32.xlu0 %v2484_v63  ;;  %v2502_v1 = vadd.f32 %v2501_v6, %v2499_v0 }
0x1361   : > { %2503 = vadd.xlane.f32.xlu1 %v2502_v1 }
0x13ec   : > { %v2486_v2 = vpop.xlane.xlu0 %2485 }
0x13ed   : > { %v2487_v5 = vrot.slane %v2486_v2, 4 }
0x13ee   : > { %v2504_v11 = vpop.xlane.xlu1 %2503 }
0x13ef   : > { %v2488_v12 = vadd.f32 %v2487_v5, %v2486_v2  ;;  %v2505_v14 = vrot.slane %v2504_v11, 4 }
0x13f1   : > { %v2489_v16 = vrot.slane %v2488_v12, 2  ;;  %v2506_v17 = vadd.f32 %v2505_v14, %v2504_v11  ;;  %v3227_v14 = vld [vmem:[%s4957_s7 + $0x60] sm:$0xff] }
0x13f2   : > { %3569 = vmatprep.mubr.msk.f32.mxu0 %vm783_vm5, %v3227_v14 }
0x13f3   : > { %v2507_v19 = vrot.slane %v2506_v17, 2  ;;  %v2490_v20 = vadd.f32 %v2489_v16, %v2488_v12  ;;  %v3234_v16 = vld [vmem:[%s4958_s8 + $0x78] sm:$0xff] }
0x13f5   : > { %v2491_v21 = vrot.slane %v2490_v20, 1  ;;  %v2508_v24 = vadd.f32 %v2507_v19, %v2506_v17 }
0x13f7   : > { %v2492_v28 = vadd.f32 %v2491_v21, %v2490_v20  ;;  %v2509_v29 = vrot.slane %v2508_v24, 1 }
0x13f9   : > { %3786 = vpush %v2492_v28  ;;  %v2510_v60 = vadd.f32 %v2509_v29, %v2508_v24 }
0x13fb   : > { %3788 = vpush %v2510_v60 }
0x142a   : > { %s3787_s19 = spop %3786 }
0x142b   : > { %v2494_v7 = vstv %s3787_s19 }
0x142c   : > { %v2495_v8 = vmul.f32 0.00024414063, %v2494_v7  ;;  %s3789_s21 = spop %3788 }
0x142d   : > { %v2512_v9 = vstv %s3789_s21  ;;  %s460_s21 = sand.u32 1, %s4025_s26  }
0x142e   : > { %v2513_v31 = vmul.f32 0.00024414063, %v2512_v9  ;;  %v2514_v39 = vmul.f32 %v2495_v8, %v2495_v8  ;;  %s4908_s25 = scalar_lea.sflag [#allocation3], %s460_s21 }
0x1430   : > { %v2515_v58 = vsub.f32 %v2513_v31, %v2514_v39 }
0x1432   : > { %v2516_v3 = vadd.f32 1e-05, %v2515_v58 }
0x1434   : > { %3948 = vrsqrt.f32 %v2516_v3 }
0x143e   : > { %v3949_v34 = vpop.eup %3948 }
0x143f   : > { %v2524_v36 = vmul.f32 %v3949_v34, %v3220_v4  ;;  %v2523_v37 = vmul.f32 %v3949_v34, %v3219_v33  ;;  %v2526_v51 = vmul.f32 %v3949_v34, %v3222_v44  ;;  %v2525_v52 = vmul.f32 %v3949_v34, %v3221_v45  ;;  %v3228_v33 = vld [vmem:[%s4957_s7 + $0x68] sm:$0xff]  ;;  %v3230_v34 = vld [vmem:[%s4957_s7 + $0x78] sm:$0xff] }
0x1440   : > { %v2746_v45 = vstv %s3247_s30 }
0x1441   : > { %2547 = vperm.xlu1 %3855, %v2524_v36   ;;  %2542 = vperm.xlu0 %3854, %v2523_v37   ;;  %v2533_v15 = vmul.f32 %v2524_v36, %v2495_v8  ;;  %v2532_v18 = vmul.f32 %v2523_v37, %v2495_v8  ;;  %v2535_v13 = vmul.f32 %v2526_v51, %v2495_v8 }
0x1442   : > { %v2534_v22 = vmul.f32 %v2525_v52, %v2495_v8 }
0x1443   : > { %v2537_v46 = vsub.f32 %v3224_v25, %v2533_v15  ;;  %v2536_v10 = vsub.f32 %v3223_v26, %v2532_v18  ;;  %v2539_v48 = vsub.f32 %v3226_v23, %v2535_v13 }
0x1444   : > { %v2538_v49 = vsub.f32 %v3225_v47, %v2534_v22 }
0x1445   : > { %2557 = vperm.xlu1 %3855, %v2526_v51   ;;  %2552 = vperm.xlu0 %3854, %v2525_v52  }
0x1449   : > { %2571 = vperm.xlu1 %3855, %v2537_v46   ;;  %2566 = vperm.xlu0 %3854, %v2536_v10  }
0x144d   : > { %2581 = vperm.xlu1 %3855, %v2539_v48   ;;  %2576 = vperm.xlu0 %3854, %v2538_v49  }
0x14c0   : > { %v2548_v53 = vpop.permute.xlu1 %2547  ;;  %v2543_v32 = vpop.permute.xlu0 %2542 }
0x14c1   : > { %v2561_v42 = vmul.f32 %v2548_v53, %v4755_v50  ;;  %v2560_v43 = vmul.f32 %v2543_v32, %v4757_v61  ;;  %v3231_v61 = vld [vmem:[%s4958_s8 + $0x60] sm:$0xff] }
0x14c4   : > { %v2558_v62 = vpop.permute.xlu1 %2557  ;;  %v2553_v35 = vpop.permute.xlu0 %2552 }
0x14c5   : > { %v2563_v59 = vmul.f32 %v2558_v62, %v4765_v27  ;;  %v2562_v63 = vmul.f32 %v2553_v35, %v4767_v30  ;;  %v3233_v27 = vld [vmem:[%s4958_s8 + $0x70] sm:$0xff]  ;;  %v3232_v30 = vld [vmem:[%s4958_s8 + $0x68] sm:$0xff] }
0x14c8   : > { %v2572_v54 = vpop.permute.xlu1 %2571  ;;  %v2567_v55 = vpop.permute.xlu0 %2566 }
0x14c9   : > { %v2585_v40 = vadd.f32 %v2572_v54, %v2561_v42  ;;  %v2584_v56 = vadd.f32 %v2567_v55, %v2560_v43 }
0x14cb   : > { %v3916_v0 = vpack.i.bf16 %v2585_v40, %v2584_v56  ;;  %v3734_v6 = vpack.c.bf16 %v2585_v40, %v2584_v56 }
0x14cc   : > { %v2582_v1 = vpop.permute.xlu1 %2581  ;;  %v2577_v2 = vpop.permute.xlu0 %2576 }
0x14cd   : > { %v2587_v5 = vadd.f32 %v2582_v1, %v2563_v59  ;;  %v2586_v11 = vadd.f32 %v2577_v2, %v2562_v63  ;;  %3917 = vrot.lane.b32.xlu0 %v3916_v0, %s4043_s22 }
0x14cf   : > { %v3921_v50 = vpack.i.bf16 %v2587_v5, %v2586_v11  ;;  %v3738_v12 = vpack.c.bf16 %v2587_v5, %v2586_v11 }
0x14d1   : > { %3927 = vrot.lane.b32.xlu0 %v3916_v0, %s4044_s23  ;;  %3922 = vrot.lane.b32.xlu1 %v3921_v50, %s4043_s22 }
0x14d5   : > { %2626 = vperm.xlu0 %3854, %v3231_v61   ;;  %3932 = vrot.lane.b32.xlu1 %v3921_v50, %s4044_s23  ;;  %s3070_s23 = sshll.u32 %s460_s21, 4 }
0x14d6   : > { %s462_s24 = scalar_lea.vmem [#allocation5], %s3070_s23 }
0x14d7   : > { %s2978_s30 = sshll.u32 %s462_s24, 4  ;;  %s4901_s30 = int_to_ptr.vmem [resolvable:$true] %s2978_s30 }
0x14d8   : > { %p3974_p13 = scmp.lt.s32.totalorder %s4901_s30, %s3972_s28 }
0x14d9   : > { %2636 = vperm.xlu0 %3854, %v3233_v27   ;;  %2631 = vperm.xlu1 %3855, %v3232_v30  }
0x14dd   : > { %2641 = vperm.xlu1 %3855, %v3234_v16  }
0x153f   : > { %v3918_v17 = vpop.permute.xlu0 %3917 }
0x1540   : > { %v3920_v19 = vunpack.i.h.bf16 %v3918_v17  ;;  %v3919_v20 = vunpack.i.l.bf16 %v3918_v17 }
0x1542   : > { %v3722_v21 = vpack.c.bf16 %v3920_v19, %v3919_v20 }
0x1543   : > { %v3923_v24 = vpop.permute.xlu1 %3922  ;;  %v3928_v7 = vpop.permute.xlu0 %3927 }
0x1544   : > { %v3925_v28 = vunpack.i.h.bf16 %v3923_v24  ;;  %v3924_v29 = vunpack.i.l.bf16 %v3923_v24  ;;  %3724 = vmatprep.subr.msk.bf16.mxu0 %vm3723_vm2, %v3722_v21  ;;  %v3930_v8 = vunpack.i.h.bf16 %v3928_v7  ;;  %v3929_v9 = vunpack.i.l.bf16 %v3928_v7 }
0x1545   : > { %3727 = vmatpush3.bf16.msk.msra.mxu0 %vm3723_vm2, %v3722_v21 }
0x1546   : > { %v3728_v60 = vpack.c.bf16 %v3925_v28, %v3924_v29  ;;  %v3742_v39 = vpack.c.bf16 %v3930_v8, %v3929_v9  ;;  %v3249_v8 = vld [vmem:[%s4959_s9 + $0x68] sm:$0xff]  ;;  %v3248_v9 = vld [vmem:[%s4959_s9 + $0x60] sm:$0xff] }
0x1547   : > { %v3933_v31 = vpop.permute.xlu1 %3932 }
0x1548   : > { %3730 = vmatprep.subr.msk.bf16.mxu0 %vm3723_vm2, %v3728_v60  ;;  %v3935_v58 = vunpack.i.h.bf16 %v3933_v31  ;;  %v3934_v3 = vunpack.i.l.bf16 %v3933_v31 }
0x1549   : > { %3733 = vmatpush3.bf16.msk.msra.mxu0 %vm3723_vm2, %v3728_v60 }
0x154a   : > { %3735 = vmatprep.subr.bf16.mxu0 %v3734_v6  ;;  %v3748_v4 = vpack.c.bf16 %v3935_v58, %v3934_v3  ;;  %v3251_v3 = vld [vmem:[%s4959_s9 + $0x78] sm:$0xff] }
0x154d   : > { %3737 = vmatpush3.bf16.msra.mxu0 %v3734_v6 }
0x154e   : > { %3739 = vmatprep.subr.bf16.mxu0 %v3738_v12 }
0x1551   : > { %3741 = vmatpush3.bf16.msra.mxu0 %v3738_v12 }
0x1552   : > { %3744 = vmatprep.subr.msk.bf16.mxu0 %vm3743_vm4, %v3742_v39 }
0x1554   : > { %v2627_v37 = vpop.permute.xlu0 %2626 }
0x1555   : > { %3747 = vmatpush3.bf16.msk.msra.mxu0 %vm3743_vm4, %v3742_v39 }
0x1556   : > { %3750 = vmatprep.subr.msk.bf16.mxu0 %vm3743_vm4, %v3748_v4 }
0x1558   : > { %v2632_v36 = vpop.permute.xlu1 %2631  ;;  %v2637_v10 = vpop.permute.xlu0 %2636 }
0x1559   : > { %3753 = vmatpush3.bf16.msk.msra.mxu0 %vm3743_vm4, %v3748_v4  ;;  %v3250_v4 = vld [vmem:[%s4959_s9 + $0x70] sm:$0xff] }
0x155c   : > { %3570 = vmatmul.mubr.msk.f32.vlgmr.msra.gmra.mrb[16].mxu0 %vm783_vm5, %v3228_v33  ;;  %v2642_v25 = vpop.permute.xlu1 %2641 }
0x155d   : > { %3572 = vmatprep.mubr.msk.f32.mxu0 %vm783_vm5, %v3229_v57 }
0x1560   : > { %3573 = vmatmul.mubr.msk.f32.gmra.mrb[18].mxu0 %vm783_vm5, %v3230_v34 }
0x162f   : > { %v3571_v44 = vpop.f32.mrb[16].mxu0 }
0x1630   : > { %v2728_v51 = vadd.f32 %v3571_v44, %v2632_v36  ;;  %v2722_v52 = vpop.f32.mrb[17].mxu0  ;;  %v3252_v44 = vld [vmem:[%s4960_s10 + $0x60] sm:$0xff] }
0x1631   : > { %v2723_v15 = vadd.f32 %v2722_v52, %v2627_v37  ;;  %v3253_v37 = vld [vmem:[%s4960_s10 + $0x68] sm:$0xff] }
0x1632   : > { %vm2742_vm6 = vcmp.ge.f32.partialorder %v2728_v51, 0.0  ;;  %v2748_v18 = vmul.f32 %v2746_v45, %v2728_v51 }
0x1633   : > { %vm2741_vm7 = vcmp.ge.f32.partialorder %v2723_v15, 0.0  ;;  %v2747_v26 = vmul.f32 %v2746_v45, %v2723_v15  ;;  %v3574_v46 = vpop.f32.mrb[18].mxu0 }
0x1634   : > { %v4835_v13 = vsel %vm2742_vm6, %v2728_v51, %v2748_v18  ;;  %v2738_v22 = vadd.f32 %v3574_v46, %v2642_v25  ;;  %v2732_v23 = vpop.f32.mrb[19].mxu0  ;;  %v3255_v18 = vld [vmem:[%s4960_s10 + $0x78] sm:$0xff]  ;;  %v3254_v25 = vld [vmem:[%s4960_s10 + $0x70] sm:$0xff] }
0x1635   : > { %v4837_v47 = vsel %vm2741_vm7, %v2723_v15, %v2747_v26  ;;  %v2733_v48 = vadd.f32 %v2732_v23, %v2637_v10  ;;  %v2770_v49 = vmul.f32 %v4835_v13, %v4835_v13  ;;  %v3261_v10 = vld [vmem:[%s4962_s12 + $0x38] sm:$0xff]  ;;  %v3256_v23 = vld [vmem:[%s4961_s11 + $0x30] sm:$0xff] }
0x1636   : > { %v2769_v53 = vmul.f32 %v4837_v47, %v4837_v47  ;;  %vm2744_vm5 = vcmp.ge.f32.partialorder %v2738_v22, 0.0  ;;  %v2750_v32 = vmul.f32 %v2746_v45, %v2738_v22  ;;  %v2755_v35 = vadd.f32 %v4835_v13, %v4837_v47  ;;  %3583 = vmatprep.mubr.msk.f32.mxu1 %vm1001_vm14, %v3256_v23 }
0x1637   : > { %vm2743_vm8 = vcmp.ge.f32.partialorder %v2733_v48, 0.0  ;;  %v2749_v62 = vmul.f32 %v2746_v45, %v2733_v48 }
0x1638   : > { %v4845_v42 = vsel %vm2744_vm5, %v2738_v22, %v2750_v32  ;;  %v2773_v40 = vadd.f32 %v2770_v49, %v2769_v53  ;;  %v3260_v22 = vld [vmem:[%s4962_s12 + $0x30] sm:$0xff] }
0x1639   : > { %v4847_v43 = vsel %vm2743_vm8, %v2733_v48, %v2749_v62  ;;  %v2772_v59 = vmul.f32 %v4845_v42, %v4845_v42 }
0x163a   : > { %v2771_v54 = vmul.f32 %v4847_v43, %v4847_v43  ;;  %v2756_v55 = vadd.f32 %v2755_v35, %v4847_v43 }
0x163c   : > { %v2757_v56 = vadd.f32 %v2756_v55, %v4845_v42  ;;  %v2774_v63 = vadd.f32 %v2773_v40, %v2771_v54 }
0x163e   : > { %2758 = vadd.xlane.f32.xlu0 %v2757_v56  ;;  %v2775_v0 = vadd.f32 %v2774_v63, %v2772_v59 }
0x1640   : > { %2776 = vadd.xlane.f32.xlu1 %v2775_v0 }
0x16cb   : > { %v2759_v6 = vpop.xlane.xlu0 %2758 }
0x16cc   : > { %v2760_v1 = vrot.slane %v2759_v6, 4 }
0x16cd   : > { %v2777_v2 = vpop.xlane.xlu1 %2776 }
0x16ce   : > { %v2761_v5 = vadd.f32 %v2760_v1, %v2759_v6  ;;  %v2778_v11 = vrot.slane %v2777_v2, 4 }
0x16d0   : > { %v2762_v50 = vrot.slane %v2761_v5, 2  ;;  %v2779_v12 = vadd.f32 %v2778_v11, %v2777_v2 }
0x16d2   : > { %v2780_v61 = vrot.slane %v2779_v12, 2  ;;  %v2763_v27 = vadd.f32 %v2762_v50, %v2761_v5 }
0x16d4   : > { %v2764_v30 = vrot.slane %v2763_v27, 1  ;;  %v2781_v14 = vadd.f32 %v2780_v61, %v2779_v12 }
0x16d6   : > { %v2765_v16 = vadd.f32 %v2764_v30, %v2763_v27  ;;  %v2782_v17 = vrot.slane %v2781_v14, 1 }
0x16d8   : > { %3790 = vpush %v2765_v16  ;;  %v2783_v19 = vadd.f32 %v2782_v17, %v2781_v14 }
0x16da   : > { %3792 = vpush %v2783_v19 }
0x1709   : > { %s3791_s15 = spop %3790 }
0x170a   : > { %v2767_v20 = vstv %s3791_s15  ;;  %s3269_s15 = sshll.u32 %s4138_s29, 8  ;;  %s3967_s29 = scalar_lea.vmem %s4901_s30, 256 }
0x170b   : > { %v2768_v21 = vmul.f32 0.00024414063, %v2767_v20  ;;  %s3793_s16 = spop %3792  ;;  %s4906_s13 = scalar_lea.hbm %s4983_s4, %s3269_s15 }
0x170c   : > { %v2785_v24 = vstv %s3793_s16  ;;  %p3968_p9 = scmp.ne.s32.totalorder %s4901_s30, %s3967_s29  ;;  %p3975_p0 = scmp.lt.s32.totalorder %s3973_s14, %s3967_s29 }
0x170d   : > { %v2786_v28 = vmul.f32 0.00024414063, %v2785_v24  ;;  %v2787_v29 = vmul.f32 %v2768_v21, %v2768_v21 }
0x170e   : > { %p3969_p10 = pnand %p3968_p9, %p4155_p5  ;;  %p3976_p1 = por %p3975_p0, %p3974_p13 }
0x170f   : > { %v2788_v60 = vsub.f32 %v2786_v28, %v2787_v29 }
0x1710   : > { %p3970_p12 = pneg %p3969_p10 }
0x1711   : > { %v2789_v7 = vadd.f32 1e-05, %v2788_v60 }
0x1712   : > { %p3977_p2 = pnand %p3976_p1, %p3970_p12 }
0x1713   : > { %3950 = vrsqrt.f32 %v2789_v7 }
0x171d   : > { %v3951_v31 = vpop.eup %3950 }
0x171e   : > { %v2797_v39 = vmul.f32 %v3951_v31, %v3249_v8  ;;  %v2796_v58 = vmul.f32 %v3951_v31, %v3248_v9  ;;  %v2799_v33 = vmul.f32 %v3951_v31, %v3251_v3  ;;  %v2798_v57 = vmul.f32 %v3951_v31, %v3250_v4 }
0x1720   : > { %2820 = vperm.xlu1 %3855, %v2797_v39   ;;  %2815 = vperm.xlu0 %3854, %v2796_v58   ;;  %v2806_v34 = vmul.f32 %v2797_v39, %v2768_v21  ;;  %v2805_v36 = vmul.f32 %v2796_v58, %v2768_v21  ;;  %v2808_v52 = vmul.f32 %v2799_v33, %v2768_v21 }
0x1721   : > { %v2807_v15 = vmul.f32 %v2798_v57, %v2768_v21 }
0x1722   : > { %v2810_v45 = vsub.f32 %v3253_v37, %v2806_v34  ;;  %v2809_v51 = vsub.f32 %v3252_v44, %v2805_v36  ;;  %v2812_v26 = vsub.f32 %v3255_v18, %v2808_v52 }
0x1723   : > { %v2811_v46 = vsub.f32 %v3254_v25, %v2807_v15 }
0x1724   : > { %2830 = vperm.xlu1 %3855, %v2799_v33   ;;  %2825 = vperm.xlu0 %3854, %v2798_v57  }
0x1728   : > { %2844 = vperm.xlu1 %3855, %v2810_v45   ;;  %2839 = vperm.xlu0 %3854, %v2809_v51  }
0x172c   : > { %2854 = vperm.xlu1 %3855, %v2812_v26   ;;  %2849 = vperm.xlu0 %3854, %v2811_v46  }
0x1730   : > { %2957 = vperm.xlu1 %3855, %v3261_v10   ;;  %2952 = vperm.xlu0 %3854, %v3260_v22  }
0x179f   : > { %v2821_v48 = vpop.permute.xlu1 %2820  ;;  %v2816_v49 = vpop.permute.xlu0 %2815 }
0x17a0   : > { %v2834_v62 = vmul.f32 %v2821_v48, %v4835_v13  ;;  %v2833_v35 = vmul.f32 %v2816_v49, %v4837_v47  ;;  %v3257_v47 = vld [vmem:[%s4961_s11 + $0x38] sm:$0xff] }
0x17a3   : > { %v2831_v53 = vpop.permute.xlu1 %2830  ;;  %v2826_v32 = vpop.permute.xlu0 %2825 }
0x17a4   : > { %v2836_v59 = vmul.f32 %v2831_v53, %v4845_v42  ;;  %v2835_v63 = vmul.f32 %v2826_v32, %v4847_v43 }
0x17a7   : > { %v2845_v54 = vpop.permute.xlu1 %2844  ;;  %v2840_v55 = vpop.permute.xlu0 %2839 }
0x17a8   : > { %v2858_v40 = vadd.f32 %v2845_v54, %v2834_v62  ;;  %v2857_v56 = vadd.f32 %v2840_v55, %v2833_v35 }
0x17aa   : > { %v3754_v0 = vpack.c.bf16 %v2858_v40, %v2857_v56 }
0x17ab   : > { %v2855_v6 = vpop.permute.xlu1 %2854  ;;  %v2850_v1 = vpop.permute.xlu0 %2849 }
0x17ac   : > { %v2860_v2 = vadd.f32 %v2855_v6, %v2836_v59  ;;  %v2859_v5 = vadd.f32 %v2850_v1, %v2835_v63  ;;  %3755 = vmatprep.subr.bf16.mxu1 %v3754_v0 }
0x17ad   : > { %3757 = vmatpush3.bf16.msra.mxu1 %v3754_v0 }
0x17ae   : > { %v3758_v13 = vpack.c.bf16 %v2860_v2, %v2859_v5 }
0x17af   : > { %v2958_v50 = vpop.permute.xlu1 %2957  ;;  %v2953_v61 = vpop.permute.xlu0 %2952 }
0x17b0   : > { %3759 = vmatprep.subr.bf16.mxu1 %v3758_v13 }
0x17b1   : > { %3761 = vmatpush3.bf16.msra.mxu1 %v3758_v13 }
0x17b4   : > { %3584 = vmatmul.mubr.msk.f32.vlgmr.msra.gmra.mrb[18].mxu1 %vm1001_vm14, %v3257_v47 }
0x1887   : > { %v3585_v42 = vpop.f32.mrb[18].mxu1 }
0x1888   : > { %v2946_v43 = vadd.f32 %v3585_v42, %v4737_v38  ;;  %v2936_v11 = vpop.f32.mrb[19].mxu1 }
0x1889   : > { %v2945_v12 = vadd.f32 %v2936_v11, %v4739_v41 }
0x188a   : > { %v2961_v27 = vadd.f32 %v2958_v50, %v2946_v43 }
0x188b   : > { %v2960_v30 = vadd.f32 %v2953_v61, %v2945_v12 }
0x188c   : > { %2963 = vst [vmem:[%s462_s24 + $0x8] sm:$0xff] %v2961_v27 }
0x188d   : > { %2962 = vst [vmem:[%s462_s24] sm:$0xff] %v2960_v30 }
0x188e   : > { %3980 = shalt.err (!%p3977_p2)
}
0x188f   : > { %s3981_s17 = scalar_lea.hbm %s4906_s13, 256  ;;  %s3985_s23 = scalar_lea.hbm %s4983_s4, 512 }
0x1890   : > { %p3982_p3 = scmp.ne.s32.totalorder %s4906_s13, %s3981_s17  ;;  %p3986_p8 = scmp.lt.u32.totalorder %s4906_s13, %s4983_s4 }
0x1891   : > { %p3987_p11 = scmp.lt.u32.totalorder %s3985_s23, %s3981_s17  ;;  %p3989_p10 = scmp.lt.u32.totalorder %s3981_s17, %s4906_s13 }
0x1892   : > { %p3983_p4 = pnand %p3982_p3, %p4155_p5 }
0x1893   : > { %p3988_p9 = por %p3987_p11, %p3986_p8 }
0x1894   : > { %p3984_p7 = pneg %p3983_p4 }
0x1895   : > { %p3990_p12 = por %p3989_p10, %p3988_p9 }
0x1897   : > { %p3991_p13 = pnand %p3990_p12, %p3984_p7 }
0x1899   : > { %3994 = shalt.err (!%p3991_p13)
}
0x189a   : > { %s4046_s16 = smov 128  }
0x189b   : > { %3798 = dma.vmem_to_hbm [thread:$0]  (%p4155_p5), %s4901_s30, 256, %s4906_s13, %s4908_s25, %s4046_s16, %s4046_s16, %s4043_s22  }
0x189c PF: > { %s4984_s20 = sld [smem:[#allocation10_spill]]  ;;  %s4985_s29 = sld [smem:[#allocation8_spill]] }
0x18a2   : > { %p3810_p0 = scmp.ge.s32.totalorder %s4984_s20, 2  ;;  %s2993_s28 = sand.u32 1, %s4985_s29  }
0x18a3   : > { %s2994_s14 = scalar_lea.sflag [#allocation3], %s2993_s28 }
0x18a4   : > { %p3805_p1 = pnand %p3810_p0, %p4159_p6 }
0x18a6   : > { %4016 = dma.done.wait (!%p3805_p1), %s2994_s14, 256  }
0x18a7   : > { %4018 = vsyncadd (!%p3805_p1), %s2994_s14, 4294967040  ;;  %s4987_s28 = sld [smem:[#allocation11_spill]]  ;;  %s4988_s17 = sld [smem:[#allocation9_spill]] }
0x18a8   : > { %s4989_s27 = sld [smem:[#allocation12_spill]]  ;;  %s4990_s25 = smov %s4025_s26 }
0x18ad   : > { %p24_p2 = scmp.ge.s32.totalorder %s4987_s28, 4   ;;  %s4991_s26 = smov %s4988_s17 }
0x18af   :  { %26 = sbr.rel (!%p24_p2) target bundleno = 7 (0x7), region = 145 }
0x18b6   :  { %2999 = vsyncpa [#allocation3], 1 }
0x18b7   :  { %3001 = vsyncpa [#allocation3 + $0x1], 1 }
0x18b8   :  { %3002 = vsyncpa [#allocation4], 1 }
0x18b9   :  { %3004 = vsyncpa [#allocation4 + $0x1], 1 }

</bundles_post_ra>
